<compile_context>
chip_gen: v6e
topology: v6e:2x2x1
jax: 0.10.0
libtpu: 0.0.40
codegen_flags: <defaults>
</compile_context>

<pallas_src>
import functools
import math

import jax
import jax.numpy as jnp
from jax.experimental import pallas as pl
from jax.experimental.pallas import tpu as pltpu

N_HEADS = 8          # nn.TransformerEncoderLayer(nhead=8)
FF_DIM = 2048        # nn.TransformerEncoderLayer default dim_feedforward
LN_EPS = 1e-5        # default layer_norm_eps
NEG_BIG = -1e30      # additive key-padding bias
OUT_LANES = 128      # lane-dense output slab width


def _layer_norm(x, gamma, beta):
    mu = jnp.mean(x, axis=-1, keepdims=True)
    xc = x - mu
    var = jnp.mean(xc * xc, axis=-1, keepdims=True)
    return xc * jax.lax.rsqrt(var + LN_EPS) * gamma + beta


def fused_transformer_kernel(
        # activations / mask
        x_ref, bias_ref,
        # stacked per-layer encoder params (leading dim = layer, block of 1 layer)
        wqkv_ref, bqkv_ref, wo_ref, bo_ref, g1_ref, be1_ref,
        w1_ref, bf1_ref, w2_ref, bf2_ref, g2_ref, be2_ref,
        # head params (resident across all grid steps)
        hw1_ref, hb1_ref, hw2_ref, hb2_ref,
        # output
        o_ref,
        # scratch: activations carried across layer steps
        xbuf,
        *, matmul_dtype, approx_recip):
    l = pl.program_id(1)
    n_layers = pl.num_programs(1)

    BT, _, S = bias_ref.shape          # batch tile, 1, seq len
    N, D = x_ref.shape                 # N = BT * S rows
    H = N_HEADS
    hd = D // H
    scale = 1.0 / math.sqrt(hd)

    # load the input activations into the carried buffer at the first layer step
    @pl.when(l == 0)
    def _():
        xbuf[...] = x_ref[...]

    x = xbuf[...]                      # (N, D) f32
    xb = x.astype(matmul_dtype)
    bias = bias_ref[...]               # (BT, 1, S) additive key-padding bias

    # ---- fused QKV projection: ONE wide matmul instead of 24 per-head dots.
    qkv = (jnp.dot(xb, wqkv_ref[0], preferred_element_type=jnp.float32)
           + bqkv_ref[0]).reshape(BT, S, 3 * D)          # columns: [q(D), k(D), v(D)]

    # ---- attention: short static loop over heads for the tiny score/context
    # contractions (hd=4, S small) with bf16 MXU operands; batched over BT.
    ctx_heads = []
    for h in range(H):
        qh = qkv[:, :, h * hd:(h + 1) * hd].astype(matmul_dtype)
        kh = qkv[:, :, D + h * hd:D + (h + 1) * hd].astype(matmul_dtype)
        vh = qkv[:, :, 2 * D + h * hd:2 * D + (h + 1) * hd].astype(matmul_dtype)

        s = (jnp.einsum('bqd,bkd->bqk', qh, kh,
                        preferred_element_type=jnp.float32) * scale + bias)
        s = s - jnp.max(s, axis=-1, keepdims=True)
        p = jnp.exp(s)
        p = p * pl.reciprocal(jnp.sum(p, axis=-1, keepdims=True),
                              approx=approx_recip)
        ctx_heads.append(
            jnp.einsum('bqk,bkd->bqd', p.astype(matmul_dtype), vh,
                       preferred_element_type=jnp.float32))

    # concatenate heads along the feature (lane) axis -> ONE wide out-projection
    ctx = jnp.concatenate(ctx_heads, axis=-1).reshape(N, D)
    attn = (jnp.dot(ctx.astype(matmul_dtype), wo_ref[0],
                    preferred_element_type=jnp.float32) + bo_ref[0])

    # post-norm residual 1 (f32)
    y = _layer_norm(x + attn, g1_ref[0], be1_ref[0])

    # ---- feed-forward: bf16 operands, f32 accumulation, f32 elementwise
    h1 = jnp.maximum(
        jnp.dot(y.astype(matmul_dtype), w1_ref[0],
                preferred_element_type=jnp.float32) + bf1_ref[0], 0.0)
    ff = jnp.dot(h1.astype(matmul_dtype), w2_ref[0],
                 preferred_element_type=jnp.float32) + bf2_ref[0]
    z = _layer_norm(y + ff, g2_ref[0], be2_ref[0])

    xbuf[...] = z                      # carry to next layer step

    # ---- final layer step: sum over sequence + MLP head; one lane-dense
    # (1, bt, 128) slab per batch tile (written once per tile).
    @pl.when(l == n_layers - 1)
    def _():
        pooled = jnp.sum(z.reshape(BT, S, D), axis=1)                       # (BT, D)
        hh = jnp.maximum(
            jnp.dot(pooled, hw1_ref[...], preferred_element_type=jnp.float32)
            + hb1_ref[...], 0.0)                                            # (BT, HID)
        oo = jnp.sum(hh * hw2_ref[...], axis=-1, keepdims=True) + hb2_ref[...]  # (BT, 1)
        o_ref[...] = jnp.broadcast_to(oo[None, :, :], o_ref.shape)


def _auto_bt(B, S, max_rows=512):
    """Pick the batch tile: fill the MXU M dim (target ~512 rows) while keeping
    the FFN intermediate inside the v7x VMEM cap; keep >=2 tiles (megacore)
    when each tile would still have >=128 rows."""
    bt = max(1, min(B, max(1, max_rows // max(S, 1))))
    while B % bt:
        bt -= 1
    if B // bt < 2:
        for cand in range(bt // 2, 0, -1):
            if B % cand == 0 and cand * S >= 128:
                bt = cand
                break
    return bt


def transformer_forward(epitope, mask, enc, head, *, bt=None,
                        approx_recip=True, interpret=False):
    """epitope: (B, S, D) float; mask: (B, S) bool, True = padded key."""
    B, S, D = epitope.shape
    L = enc["wqkv"].shape[0]
    FF = enc["w1"].shape[2]
    HID = head["w1"].shape[1]
    if bt is None:
        bt = _auto_bt(B, S)
    assert B % bt == 0 and D % N_HEADS == 0
    n_row = bt * S
    n_tiles = B // bt
    matmul_dtype = enc["wqkv"].dtype

    x2 = epitope.reshape(B * S, D).astype(jnp.float32)
    bias = jnp.where(mask, jnp.float32(NEG_BIG), jnp.float32(0.0))[:, None, :]  # (B,1,S)

    def xmap(b, l): return (b, 0)
    def biasmap(b, l): return (b, 0, 0)
    def layer3(b, l): return (l, 0, 0)
    def headmap(b, l): return (0, 0)
    def outmap(b, l): return (b, 0, 0)

    in_specs = [
        pl.BlockSpec((n_row, D), xmap),
        pl.BlockSpec((bt, 1, S), biasmap),
        # per-layer stacked params: block of one layer -> double-buffered prefetch
        pl.BlockSpec((1, D, 3 * D), layer3),   # wqkv
        pl.BlockSpec((1, 1, 3 * D), layer3),   # bqkv
        pl.BlockSpec((1, D, D), layer3),       # wo
        pl.BlockSpec((1, 1, D), layer3),       # bo
        pl.BlockSpec((1, 1, D), layer3),       # g1
        pl.BlockSpec((1, 1, D), layer3),       # be1
        pl.BlockSpec((1, D, FF), layer3),      # w1
        pl.BlockSpec((1, 1, FF), layer3),      # bf1
        pl.BlockSpec((1, FF, D), layer3),      # w2
        pl.BlockSpec((1, 1, D), layer3),       # bf2
        pl.BlockSpec((1, 1, D), layer3),       # g2
        pl.BlockSpec((1, 1, D), layer3),       # be2
        # head params (resident)
        pl.BlockSpec((D, HID), headmap),
        pl.BlockSpec((1, HID), headmap),
        pl.BlockSpec((1, HID), headmap),
        pl.BlockSpec((1, 1), headmap),
    ]

    kernel = functools.partial(fused_transformer_kernel,
                               matmul_dtype=matmul_dtype,
                               approx_recip=approx_recip)

    out = pl.pallas_call(
        kernel,
        out_shape=jax.ShapeDtypeStruct((n_tiles, bt, OUT_LANES), jnp.float32),
        grid=(n_tiles, L),
        in_specs=in_specs,
        out_specs=pl.BlockSpec((1, bt, OUT_LANES), outmap),
        scratch_shapes=[pltpu.VMEM((n_row, D), jnp.float32)],
        compiler_params=pltpu.CompilerParams(
            dimension_semantics=("parallel", "arbitrary"),   # batch tiles shard over v7x's 2 TCs
            vmem_limit_bytes=32 * 1024 * 1024),
        interpret=interpret,
    )(x2, bias,
      enc["wqkv"], enc["bqkv"], enc["wo"], enc["bo"], enc["g1"], enc["be1"],
      enc["w1"], enc["bf1"], enc["w2"], enc["bf2"], enc["g2"], enc["be2"],
      head["w1"], head["b1"], head["w2"], head["b2"])
    return out[:, :, 0].reshape(B)                           # (B,)


# ---------------- parameter construction (PyTorch layout) + one-time packing ----------------

def init_torch_style_params(key, d_model, ff_dim, hidden_dim, n_layers):
    def nrm(k, shape, scale=0.02):
        return scale * jax.random.normal(k, shape, jnp.float32)
    layers = []
    for i in range(n_layers):
        ks = jax.random.split(jax.random.fold_in(key, i), 8)
        layers.append(dict(
            in_proj_weight=nrm(ks[0], (3 * d_model, d_model)),
            in_proj_bias=nrm(ks[1], (3 * d_model,)),
            out_proj_weight=nrm(ks[2], (d_model, d_model)),
            out_proj_bias=nrm(ks[3], (d_model,)),
            norm1_weight=jnp.ones((d_model,), jnp.float32),
            norm1_bias=jnp.zeros((d_model,), jnp.float32),
            linear1_weight=nrm(ks[4], (ff_dim, d_model)),
            linear1_bias=nrm(ks[5], (ff_dim,)),
            linear2_weight=nrm(ks[6], (d_model, ff_dim)),
            linear2_bias=nrm(ks[7], (d_model,)),
            norm2_weight=jnp.ones((d_model,), jnp.float32),
            norm2_bias=jnp.zeros((d_model,), jnp.float32),
        ))
    hk = jax.random.split(jax.random.fold_in(key, 10_000), 4)
    head = dict(
        linear1_weight=nrm(hk[0], (hidden_dim, d_model)),
        linear1_bias=nrm(hk[1], (hidden_dim,)),
        linear2_weight=nrm(hk[2], (1, hidden_dim)),
        linear2_bias=nrm(hk[3], (1,)),
    )
    return layers, head


def pack_params(layers, head, matmul_dtype=jnp.bfloat16):
    """One-time rearrangement to kernel layout: pre-transposed fused QKV / out-proj
    / FFN weights, stacked along a leading layer axis; matmul weights cast to
    `matmul_dtype` (bf16 for the perf path, f32 for exact validation)."""
    def per_layer(p):
        return dict(
            wqkv=p["in_proj_weight"].T.astype(matmul_dtype),    # (D, 3D) cols: q|k|v
            bqkv=p["in_proj_bias"][None, :],                    # (1, 3D)
            wo=p["out_proj_weight"].T.astype(matmul_dtype),     # (D, D)
            bo=p["out_proj_bias"][None, :],
            g1=p["norm1_weight"][None, :], be1=p["norm1_bias"][None, :],
            w1=p["linear1_weight"].T.astype(matmul_dtype),      # (D, FF)
            bf1=p["linear1_bias"][None, :],
            w2=p["linear2_weight"].T.astype(matmul_dtype),      # (FF, D)
            bf2=p["linear2_bias"][None, :],
            g2=p["norm2_weight"][None, :], be2=p["norm2_bias"][None, :],
        )

    per = [per_layer(p) for p in layers]
    enc = {k: jnp.stack([pp[k] for pp in per], axis=0) for k in per[0]}
    head_packed = dict(
        w1=head["linear1_weight"].T,           # (D, HID) f32 (tiny)
        b1=head["linear1_bias"][None, :],      # (1, HID)
        w2=head["linear2_weight"],             # (1, HID)
        b2=head["linear2_bias"][None, :],      # (1, 1)
    )
    return enc, head_packed


# ---------------- pure-JAX reference (PyTorch math, f32) ----------------

def reference_forward(epitope, mask, layers, head):
    x = epitope.astype(jnp.float32)
    B, S, D = x.shape
    H, hd = N_HEADS, D // N_HEADS
    bias = jnp.where(mask, NEG_BIG, 0.0)[:, None, None, :]
    for p in layers:
        qkv = x @ p["in_proj_weight"].T + p["in_proj_bias"]
        q, k, v = jnp.split(qkv, 3, axis=-1)
        def heads(t):
            return t.reshape(B, S, H, hd).transpose(0, 2, 1, 3)
        qh, kh, vh = heads(q), heads(k), heads(v)
        s = jnp.einsum('bhqd,bhkd->bhqk', qh, kh) / math.sqrt(hd) + bias
        pa = jax.nn.softmax(s, axis=-1)
        ctx = jnp.einsum('bhqk,bhkd->bhqd', pa, vh).transpose(0, 2, 1, 3).reshape(B, S, D)
        attn = ctx @ p["out_proj_weight"].T + p["out_proj_bias"]
        x = _layer_norm(x + attn, p["norm1_weight"], p["norm1_bias"])
        ff = (jax.nn.relu(x @ p["linear1_weight"].T + p["linear1_bias"])
              @ p["linear2_weight"].T + p["linear2_bias"])
        x = _layer_norm(x + ff, p["norm2_weight"], p["norm2_bias"])
    pooled = x.sum(axis=1)
    hh = jax.nn.relu(pooled @ head["linear1_weight"].T + head["linear1_bias"])
    return (hh @ head["linear2_weight"].T + head["linear2_bias"])[:, 0]


if __name__ == "__main__":
    B, S = 4, 8
    d_model = 32          # divisible by nhead=8
    hidden_dim = 32
    n_encoder_layers = 2

    key = jax.random.PRNGKey(0)
    kx, kp = jax.random.split(key)

    epitope = jax.random.normal(kx, (B, S, d_model), jnp.float32)
    # key-padding mask: True = padded (every sample keeps >=1 unpadded key)
    mask = (jnp.zeros((B, S), dtype=jnp.bool_)
            .at[1, 5:].set(True)
            .at[3, 6:].set(True))

    layers, head = init_torch_style_params(kp, d_model, FF_DIM, hidden_dim,
                                           n_encoder_layers)

    with jax.default_matmul_precision("float32"):
        ref = reference_forward(epitope, mask, layers, head)
    ref_scale = float(jnp.max(jnp.abs(ref)))

    # 1) validation config: f32 weights + exact softmax reciprocal, single batch tile
    enc_f32, head_f32 = pack_params(layers, head, matmul_dtype=jnp.float32)
    fwd_exact = jax.jit(functools.partial(transformer_forward, approx_recip=False))
    out_exact = jax.block_until_ready(fwd_exact(epitope, mask, enc_f32, head_f32))
    assert out_exact.shape == (B,), out_exact.shape
    assert bool(jnp.all(jnp.isfinite(out_exact)))
    err_exact = float(jnp.max(jnp.abs(out_exact - ref)))
    assert err_exact <= 2e-3 * (1.0 + ref_scale), (err_exact, ref_scale)

    # 2) performance config: bf16 MXU operands + approx reciprocal; 2 batch tiles
    #    (exercises the multi-tile / megacore path and the per-tile output slab)
    enc_bf16, head_bf16 = pack_params(layers, head, matmul_dtype=jnp.bfloat16)
    fwd = jax.jit(functools.partial(transformer_forward, bt=2, approx_recip=True))
    out = jax.block_until_ready(fwd(epitope, mask, enc_bf16, head_bf16))
    assert out.shape == (B,), out.shape
    assert bool(jnp.all(jnp.isfinite(out)))
    err_bf16 = float(jnp.max(jnp.abs(out - ref)))
    assert err_bf16 <= 3e-2 * (1.0 + ref_scale), (err_bf16, ref_scale)

    print("KERNEL_OK")
</pallas_src>

<mosaic_0001>
module attributes {stable_mosaic.version = 11 : i64} {
  func.func @fused_transformer_kernel(%arg0: i32, %arg1: i32, %arg2: memref<32x32xf32, #tpu.memory_space<vmem>>, %arg3: memref<4x1x8xf32, #tpu.memory_space<vmem>>, %arg4: memref<1x32x96xf32, #tpu.memory_space<vmem>>, %arg5: memref<1x1x96xf32, #tpu.memory_space<vmem>>, %arg6: memref<1x32x32xf32, #tpu.memory_space<vmem>>, %arg7: memref<1x1x32xf32, #tpu.memory_space<vmem>>, %arg8: memref<1x1x32xf32, #tpu.memory_space<vmem>>, %arg9: memref<1x1x32xf32, #tpu.memory_space<vmem>>, %arg10: memref<1x32x2048xf32, #tpu.memory_space<vmem>>, %arg11: memref<1x1x2048xf32, #tpu.memory_space<vmem>>, %arg12: memref<1x2048x32xf32, #tpu.memory_space<vmem>>, %arg13: memref<1x1x32xf32, #tpu.memory_space<vmem>>, %arg14: memref<1x1x32xf32, #tpu.memory_space<vmem>>, %arg15: memref<1x1x32xf32, #tpu.memory_space<vmem>>, %arg16: memref<32x32xf32, #tpu.memory_space<vmem>>, %arg17: memref<1x32xf32, #tpu.memory_space<vmem>>, %arg18: memref<1x32xf32, #tpu.memory_space<vmem>>, %arg19: memref<1x1xf32, #tpu.memory_space<vmem>>, %arg20: memref<1x4x128xf32, #tpu.memory_space<vmem>>, %arg21: memref<32x32xf32, #tpu.memory_space<vmem>>) attributes {dimension_semantics = [#tpu.dimension_semantics<parallel>, #tpu.dimension_semantics<arbitrary>], iteration_bounds = array<i64: 1, 2>, scalar_prefetch = 0 : i64, scratch_operands = 1 : i64, tpu.core_type = #tpu.core_type<tc>, window_params = [{transform_indices = @transform_0, window_bounds = array<i64: 32, 32>}, {transform_indices = @transform_1, window_bounds = array<i64: 4, 1, 8>}, {transform_indices = @transform_2, window_bounds = array<i64: 1, 32, 96>}, {transform_indices = @transform_3, window_bounds = array<i64: 1, 1, 96>}, {transform_indices = @transform_4, window_bounds = array<i64: 1, 32, 32>}, {transform_indices = @transform_5, window_bounds = array<i64: 1, 1, 32>}, {transform_indices = @transform_6, window_bounds = array<i64: 1, 1, 32>}, {transform_indices = @transform_7, window_bounds = array<i64: 1, 1, 32>}, {transform_indices = @transform_8, window_bounds = array<i64: 1, 32, 2048>}, {transform_indices = @transform_9, window_bounds = array<i64: 1, 1, 2048>}, {transform_indices = @transform_10, window_bounds = array<i64: 1, 2048, 32>}, {transform_indices = @transform_11, window_bounds = array<i64: 1, 1, 32>}, {transform_indices = @transform_12, window_bounds = array<i64: 1, 1, 32>}, {transform_indices = @transform_13, window_bounds = array<i64: 1, 1, 32>}, {pipeline_mode = #tpu.pipeline_mode<synchronous>, transform_indices = @transform_14, window_bounds = array<i64: 32, 32>}, {pipeline_mode = #tpu.pipeline_mode<synchronous>, transform_indices = @transform_15, window_bounds = array<i64: 1, 32>}, {pipeline_mode = #tpu.pipeline_mode<synchronous>, transform_indices = @transform_16, window_bounds = array<i64: 1, 32>}, {pipeline_mode = #tpu.pipeline_mode<synchronous>, transform_indices = @transform_17, window_bounds = array<i64: 1, 1>}, {transform_indices = @transform_18, window_bounds = array<i64: 1, 4, 128>}]} {
    %c0_i32 = arith.constant 0 : i32
    %0 = arith.cmpi eq, %arg1, %c0_i32 : i32
    %1 = arith.extui %0 : i1 to i32
    %c0_i32_0 = arith.constant 0 : i32
    %2 = arith.cmpi ne, %1, %c0_i32_0 : i32
    scf.if %2 {
      %c0_98 = arith.constant 0 : index
      %c0_99 = arith.constant 0 : index
      %244 = vector.load %arg2[%c0_98, %c0_99] : memref<32x32xf32, #tpu.memory_space<vmem>>, vector<32x32xf32>
      %c0_100 = arith.constant 0 : index
      %c0_101 = arith.constant 0 : index
      %245 = vector.load %arg21[%c0_100, %c0_101] : memref<32x32xf32, #tpu.memory_space<vmem>>, vector<32x32xf32>
      tpu.vector_store %arg21[%c0_100, %c0_101], %244 {strides = array<i32>} : memref<32x32xf32, #tpu.memory_space<vmem>>, vector<32x32xf32>,
    } else {
    }
    %c0 = arith.constant 0 : index
    %c0_1 = arith.constant 0 : index
    %3 = vector.load %arg21[%c0, %c0_1] : memref<32x32xf32, #tpu.memory_space<vmem>>, vector<32x32xf32>
    %c0_2 = arith.constant 0 : index
    %c0_3 = arith.constant 0 : index
    %c0_4 = arith.constant 0 : index
    %4 = vector.load %arg3[%c0_2, %c0_3, %c0_4] : memref<4x1x8xf32, #tpu.memory_space<vmem>>, vector<4x1x8xf32>
    %c0_5 = arith.constant 0 : index
    %c0_6 = arith.constant 0 : index
    %c0_7 = arith.constant 0 : index
    %5 = vector.load %arg4[%c0_5, %c0_6, %c0_7] : memref<1x32x96xf32, #tpu.memory_space<vmem>>, vector<1x32x96xf32>
    %6 = vector.shape_cast %5 : vector<1x32x96xf32> to vector<32x96xf32>
    %cst = arith.constant dense<0.000000e+00> : vector<32x96xf32>
    %7 = tpu.matmul %3, %6, %cst {dimension_numbers = #tpu.dot_dimension_numbers<[1], [0], [0], [1], [0, 0, 1, 1], [], []>} : vector<32x32xf32>, vector<32x96xf32>, vector<32x96xf32> -> vector<32x96xf32>
    %c0_8 = arith.constant 0 : index
    %c0_9 = arith.constant 0 : index
    %c0_10 = arith.constant 0 : index
    %8 = vector.load %arg5[%c0_8, %c0_9, %c0_10] : memref<1x1x96xf32, #tpu.memory_space<vmem>>, vector<1x1x96xf32>
    %9 = vector.shape_cast %8 : vector<1x1x96xf32> to vector<1x96xf32>
    %10 = vector.broadcast %9 : vector<1x96xf32> to vector<32x96xf32>
    %11 = arith.addf %7, %10 : vector<32x96xf32>
    %12 = vector.shape_cast %11 : vector<32x96xf32> to vector<4x8x96xf32>
    %13 = vector.extract_strided_slice %12 {offsets = [0, 0, 0], sizes = [4, 8, 4], strides = [1, 1, 1]} : vector<4x8x96xf32> to vector<4x8x4xf32>
    %14 = vector.extract_strided_slice %12 {offsets = [0, 0, 32], sizes = [4, 8, 4], strides = [1, 1, 1]} : vector<4x8x96xf32> to vector<4x8x4xf32>
    %15 = vector.extract_strided_slice %12 {offsets = [0, 0, 64], sizes = [4, 8, 4], strides = [1, 1, 1]} : vector<4x8x96xf32> to vector<4x8x4xf32>
    "tpu.trace_start"() <{level = 10 : i32, message = "bqd,bkd->bqk"}> : () -> ()
    %cst_11 = arith.constant dense<0.000000e+00> : vector<4x8x8xf32>
    %16 = tpu.matmul %13, %14, %cst_11 {dimension_numbers = #tpu.dot_dimension_numbers<[2], [2], [1], [1], [0, 0, 0, 1, 1, 1], [0], [0]>} : vector<4x8x4xf32>, vector<4x8x4xf32>, vector<4x8x8xf32> -> vector<4x8x8xf32>
    "tpu.trace_stop"() : () -> ()
    %cst_12 = arith.constant 5.000000e-01 : f32
    %17 = vector.broadcast %cst_12 : f32 to vector<4x8x8xf32>
    %18 = arith.mulf %16, %17 : vector<4x8x8xf32>
    %19 = vector.broadcast %4 : vector<4x1x8xf32> to vector<4x8x8xf32>
    %20 = arith.addf %18, %19 : vector<4x8x8xf32>
    %cst_13 = arith.constant dense<0xFF800000> : vector<4x8xf32>
    %21 = vector.multi_reduction <maximumf>, %20, %cst_13 [2] : vector<4x8x8xf32> to vector<4x8xf32>
    %22 = vector.shape_cast %21 : vector<4x8xf32> to vector<4x8x1xf32>
    %23 = vector.broadcast %22 : vector<4x8x1xf32> to vector<4x8x8xf32>
    %24 = arith.subf %20, %23 : vector<4x8x8xf32>
    %25 = math.exp %24 : vector<4x8x8xf32>
    %cst_14 = arith.constant dense<0.000000e+00> : vector<4x8xf32>
    %26 = vector.multi_reduction <add>, %25, %cst_14 [2] : vector<4x8x8xf32> to vector<4x8xf32>
    %27 = vector.shape_cast %26 : vector<4x8xf32> to vector<4x8x1xf32>
    %28 = tpu.reciprocal %27 : vector<4x8x1xf32> -> vector<4x8x1xf32>
    %29 = vector.broadcast %28 : vector<4x8x1xf32> to vector<4x8x8xf32>
    %30 = arith.mulf %25, %29 : vector<4x8x8xf32>
    "tpu.trace_start"() <{level = 10 : i32, message = "bqk,bkd->bqd"}> : () -> ()
    %cst_15 = arith.constant dense<0.000000e+00> : vector<4x8x4xf32>
    %31 = tpu.matmul %30, %15, %cst_15 {dimension_numbers = #tpu.dot_dimension_numbers<[2], [1], [1], [2], [0, 0, 0, 1, 1, 2], [0], [0]>} : vector<4x8x8xf32>, vector<4x8x4xf32>, vector<4x8x4xf32> -> vector<4x8x4xf32>
    "tpu.trace_stop"() : () -> ()
    %32 = vector.extract_strided_slice %12 {offsets = [0, 0, 4], sizes = [4, 8, 4], strides = [1, 1, 1]} : vector<4x8x96xf32> to vector<4x8x4xf32>
    %33 = vector.extract_strided_slice %12 {offsets = [0, 0, 36], sizes = [4, 8, 4], strides = [1, 1, 1]} : vector<4x8x96xf32> to vector<4x8x4xf32>
    %34 = vector.extract_strided_slice %12 {offsets = [0, 0, 68], sizes = [4, 8, 4], strides = [1, 1, 1]} : vector<4x8x96xf32> to vector<4x8x4xf32>
    "tpu.trace_start"() <{level = 10 : i32, message = "bqd,bkd->bqk"}> : () -> ()
    %cst_16 = arith.constant dense<0.000000e+00> : vector<4x8x8xf32>
    %35 = tpu.matmul %32, %33, %cst_16 {dimension_numbers = #tpu.dot_dimension_numbers<[2], [2], [1], [1], [0, 0, 0, 1, 1, 1], [0], [0]>} : vector<4x8x4xf32>, vector<4x8x4xf32>, vector<4x8x8xf32> -> vector<4x8x8xf32>
    "tpu.trace_stop"() : () -> ()
    %cst_17 = arith.constant 5.000000e-01 : f32
    %36 = vector.broadcast %cst_17 : f32 to vector<4x8x8xf32>
    %37 = arith.mulf %35, %36 : vector<4x8x8xf32>
    %38 = vector.broadcast %4 : vector<4x1x8xf32> to vector<4x8x8xf32>
    %39 = arith.addf %37, %38 : vector<4x8x8xf32>
    %cst_18 = arith.constant dense<0xFF800000> : vector<4x8xf32>
    %40 = vector.multi_reduction <maximumf>, %39, %cst_18 [2] : vector<4x8x8xf32> to vector<4x8xf32>
    %41 = vector.shape_cast %40 : vector<4x8xf32> to vector<4x8x1xf32>
    %42 = vector.broadcast %41 : vector<4x8x1xf32> to vector<4x8x8xf32>
    %43 = arith.subf %39, %42 : vector<4x8x8xf32>
    %44 = math.exp %43 : vector<4x8x8xf32>
    %cst_19 = arith.constant dense<0.000000e+00> : vector<4x8xf32>
    %45 = vector.multi_reduction <add>, %44, %cst_19 [2] : vector<4x8x8xf32> to vector<4x8xf32>
    %46 = vector.shape_cast %45 : vector<4x8xf32> to vector<4x8x1xf32>
    %47 = tpu.reciprocal %46 : vector<4x8x1xf32> -> vector<4x8x1xf32>
    %48 = vector.broadcast %47 : vector<4x8x1xf32> to vector<4x8x8xf32>
    %49 = arith.mulf %44, %48 : vector<4x8x8xf32>
    "tpu.trace_start"() <{level = 10 : i32, message = "bqk,bkd->bqd"}> : () -> ()
    %cst_20 = arith.constant dense<0.000000e+00> : vector<4x8x4xf32>
    %50 = tpu.matmul %49, %34, %cst_20 {dimension_numbers = #tpu.dot_dimension_numbers<[2], [1], [1], [2], [0, 0, 0, 1, 1, 2], [0], [0]>} : vector<4x8x8xf32>, vector<4x8x4xf32>, vector<4x8x4xf32> -> vector<4x8x4xf32>
    "tpu.trace_stop"() : () -> ()
    %51 = vector.extract_strided_slice %12 {offsets = [0, 0, 8], sizes = [4, 8, 4], strides = [1, 1, 1]} : vector<4x8x96xf32> to vector<4x8x4xf32>
    %52 = vector.extract_strided_slice %12 {offsets = [0, 0, 40], sizes = [4, 8, 4], strides = [1, 1, 1]} : vector<4x8x96xf32> to vector<4x8x4xf32>
    %53 = vector.extract_strided_slice %12 {offsets = [0, 0, 72], sizes = [4, 8, 4], strides = [1, 1, 1]} : vector<4x8x96xf32> to vector<4x8x4xf32>
    "tpu.trace_start"() <{level = 10 : i32, message = "bqd,bkd->bqk"}> : () -> ()
    %cst_21 = arith.constant dense<0.000000e+00> : vector<4x8x8xf32>
    %54 = tpu.matmul %51, %52, %cst_21 {dimension_numbers = #tpu.dot_dimension_numbers<[2], [2], [1], [1], [0, 0, 0, 1, 1, 1], [0], [0]>} : vector<4x8x4xf32>, vector<4x8x4xf32>, vector<4x8x8xf32> -> vector<4x8x8xf32>
    "tpu.trace_stop"() : () -> ()
    %cst_22 = arith.constant 5.000000e-01 : f32
    %55 = vector.broadcast %cst_22 : f32 to vector<4x8x8xf32>
    %56 = arith.mulf %54, %55 : vector<4x8x8xf32>
    %57 = vector.broadcast %4 : vector<4x1x8xf32> to vector<4x8x8xf32>
    %58 = arith.addf %56, %57 : vector<4x8x8xf32>
    %cst_23 = arith.constant dense<0xFF800000> : vector<4x8xf32>
    %59 = vector.multi_reduction <maximumf>, %58, %cst_23 [2] : vector<4x8x8xf32> to vector<4x8xf32>
    %60 = vector.shape_cast %59 : vector<4x8xf32> to vector<4x8x1xf32>
    %61 = vector.broadcast %60 : vector<4x8x1xf32> to vector<4x8x8xf32>
    %62 = arith.subf %58, %61 : vector<4x8x8xf32>
    %63 = math.exp %62 : vector<4x8x8xf32>
    %cst_24 = arith.constant dense<0.000000e+00> : vector<4x8xf32>
    %64 = vector.multi_reduction <add>, %63, %cst_24 [2] : vector<4x8x8xf32> to vector<4x8xf32>
    %65 = vector.shape_cast %64 : vector<4x8xf32> to vector<4x8x1xf32>
    %66 = tpu.reciprocal %65 : vector<4x8x1xf32> -> vector<4x8x1xf32>
    %67 = vector.broadcast %66 : vector<4x8x1xf32> to vector<4x8x8xf32>
    %68 = arith.mulf %63, %67 : vector<4x8x8xf32>
    "tpu.trace_start"() <{level = 10 : i32, message = "bqk,bkd->bqd"}> : () -> ()
    %cst_25 = arith.constant dense<0.000000e+00> : vector<4x8x4xf32>
    %69 = tpu.matmul %68, %53, %cst_25 {dimension_numbers = #tpu.dot_dimension_numbers<[2], [1], [1], [2], [0, 0, 0, 1, 1, 2], [0], [0]>} : vector<4x8x8xf32>, vector<4x8x4xf32>, vector<4x8x4xf32> -> vector<4x8x4xf32>
    "tpu.trace_stop"() : () -> ()
    %70 = vector.extract_strided_slice %12 {offsets = [0, 0, 12], sizes = [4, 8, 4], strides = [1, 1, 1]} : vector<4x8x96xf32> to vector<4x8x4xf32>
    %71 = vector.extract_strided_slice %12 {offsets = [0, 0, 44], sizes = [4, 8, 4], strides = [1, 1, 1]} : vector<4x8x96xf32> to vector<4x8x4xf32>
    %72 = vector.extract_strided_slice %12 {offsets = [0, 0, 76], sizes = [4, 8, 4], strides = [1, 1, 1]} : vector<4x8x96xf32> to vector<4x8x4xf32>
    "tpu.trace_start"() <{level = 10 : i32, message = "bqd,bkd->bqk"}> : () -> ()
    %cst_26 = arith.constant dense<0.000000e+00> : vector<4x8x8xf32>
    %73 = tpu.matmul %70, %71, %cst_26 {dimension_numbers = #tpu.dot_dimension_numbers<[2], [2], [1], [1], [0, 0, 0, 1, 1, 1], [0], [0]>} : vector<4x8x4xf32>, vector<4x8x4xf32>, vector<4x8x8xf32> -> vector<4x8x8xf32>
    "tpu.trace_stop"() : () -> ()
    %cst_27 = arith.constant 5.000000e-01 : f32
    %74 = vector.broadcast %cst_27 : f32 to vector<4x8x8xf32>
    %75 = arith.mulf %73, %74 : vector<4x8x8xf32>
    %76 = vector.broadcast %4 : vector<4x1x8xf32> to vector<4x8x8xf32>
    %77 = arith.addf %75, %76 : vector<4x8x8xf32>
    %cst_28 = arith.constant dense<0xFF800000> : vector<4x8xf32>
    %78 = vector.multi_reduction <maximumf>, %77, %cst_28 [2] : vector<4x8x8xf32> to vector<4x8xf32>
    %79 = vector.shape_cast %78 : vector<4x8xf32> to vector<4x8x1xf32>
    %80 = vector.broadcast %79 : vector<4x8x1xf32> to vector<4x8x8xf32>
    %81 = arith.subf %77, %80 : vector<4x8x8xf32>
    %82 = math.exp %81 : vector<4x8x8xf32>
    %cst_29 = arith.constant dense<0.000000e+00> : vector<4x8xf32>
    %83 = vector.multi_reduction <add>, %82, %cst_29 [2] : vector<4x8x8xf32> to vector<4x8xf32>
    %84 = vector.shape_cast %83 : vector<4x8xf32> to vector<4x8x1xf32>
    %85 = tpu.reciprocal %84 : vector<4x8x1xf32> -> vector<4x8x1xf32>
    %86 = vector.broadcast %85 : vector<4x8x1xf32> to vector<4x8x8xf32>
    %87 = arith.mulf %82, %86 : vector<4x8x8xf32>
    "tpu.trace_start"() <{level = 10 : i32, message = "bqk,bkd->bqd"}> : () -> ()
    %cst_30 = arith.constant dense<0.000000e+00> : vector<4x8x4xf32>
    %88 = tpu.matmul %87, %72, %cst_30 {dimension_numbers = #tpu.dot_dimension_numbers<[2], [1], [1], [2], [0, 0, 0, 1, 1, 2], [0], [0]>} : vector<4x8x8xf32>, vector<4x8x4xf32>, vector<4x8x4xf32> -> vector<4x8x4xf32>
    "tpu.trace_stop"() : () -> ()
    %89 = vector.extract_strided_slice %12 {offsets = [0, 0, 16], sizes = [4, 8, 4], strides = [1, 1, 1]} : vector<4x8x96xf32> to vector<4x8x4xf32>
    %90 = vector.extract_strided_slice %12 {offsets = [0, 0, 48], sizes = [4, 8, 4], strides = [1, 1, 1]} : vector<4x8x96xf32> to vector<4x8x4xf32>
    %91 = vector.extract_strided_slice %12 {offsets = [0, 0, 80], sizes = [4, 8, 4], strides = [1, 1, 1]} : vector<4x8x96xf32> to vector<4x8x4xf32>
    "tpu.trace_start"() <{level = 10 : i32, message = "bqd,bkd->bqk"}> : () -> ()
    %cst_31 = arith.constant dense<0.000000e+00> : vector<4x8x8xf32>
    %92 = tpu.matmul %89, %90, %cst_31 {dimension_numbers = #tpu.dot_dimension_numbers<[2], [2], [1], [1], [0, 0, 0, 1, 1, 1], [0], [0]>} : vector<4x8x4xf32>, vector<4x8x4xf32>, vector<4x8x8xf32> -> vector<4x8x8xf32>
    "tpu.trace_stop"() : () -> ()
    %cst_32 = arith.constant 5.000000e-01 : f32
    %93 = vector.broadcast %cst_32 : f32 to vector<4x8x8xf32>
    %94 = arith.mulf %92, %93 : vector<4x8x8xf32>
    %95 = vector.broadcast %4 : vector<4x1x8xf32> to vector<4x8x8xf32>
    %96 = arith.addf %94, %95 : vector<4x8x8xf32>
    %cst_33 = arith.constant dense<0xFF800000> : vector<4x8xf32>
    %97 = vector.multi_reduction <maximumf>, %96, %cst_33 [2] : vector<4x8x8xf32> to vector<4x8xf32>
    %98 = vector.shape_cast %97 : vector<4x8xf32> to vector<4x8x1xf32>
    %99 = vector.broadcast %98 : vector<4x8x1xf32> to vector<4x8x8xf32>
    %100 = arith.subf %96, %99 : vector<4x8x8xf32>
    %101 = math.exp %100 : vector<4x8x8xf32>
    %cst_34 = arith.constant dense<0.000000e+00> : vector<4x8xf32>
    %102 = vector.multi_reduction <add>, %101, %cst_34 [2] : vector<4x8x8xf32> to vector<4x8xf32>
    %103 = vector.shape_cast %102 : vector<4x8xf32> to vector<4x8x1xf32>
    %104 = tpu.reciprocal %103 : vector<4x8x1xf32> -> vector<4x8x1xf32>
    %105 = vector.broadcast %104 : vector<4x8x1xf32> to vector<4x8x8xf32>
    %106 = arith.mulf %101, %105 : vector<4x8x8xf32>
    "tpu.trace_start"() <{level = 10 : i32, message = "bqk,bkd->bqd"}> : () -> ()
    %cst_35 = arith.constant dense<0.000000e+00> : vector<4x8x4xf32>
    %107 = tpu.matmul %106, %91, %cst_35 {dimension_numbers = #tpu.dot_dimension_numbers<[2], [1], [1], [2], [0, 0, 0, 1, 1, 2], [0], [0]>} : vector<4x8x8xf32>, vector<4x8x4xf32>, vector<4x8x4xf32> -> vector<4x8x4xf32>
    "tpu.trace_stop"() : () -> ()
    %108 = vector.extract_strided_slice %12 {offsets = [0, 0, 20], sizes = [4, 8, 4], strides = [1, 1, 1]} : vector<4x8x96xf32> to vector<4x8x4xf32>
    %109 = vector.extract_strided_slice %12 {offsets = [0, 0, 52], sizes = [4, 8, 4], strides = [1, 1, 1]} : vector<4x8x96xf32> to vector<4x8x4xf32>
    %110 = vector.extract_strided_slice %12 {offsets = [0, 0, 84], sizes = [4, 8, 4], strides = [1, 1, 1]} : vector<4x8x96xf32> to vector<4x8x4xf32>
    "tpu.trace_start"() <{level = 10 : i32, message = "bqd,bkd->bqk"}> : () -> ()
    %cst_36 = arith.constant dense<0.000000e+00> : vector<4x8x8xf32>
    %111 = tpu.matmul %108, %109, %cst_36 {dimension_numbers = #tpu.dot_dimension_numbers<[2], [2], [1], [1], [0, 0, 0, 1, 1, 1], [0], [0]>} : vector<4x8x4xf32>, vector<4x8x4xf32>, vector<4x8x8xf32> -> vector<4x8x8xf32>
    "tpu.trace_stop"() : () -> ()
    %cst_37 = arith.constant 5.000000e-01 : f32
    %112 = vector.broadcast %cst_37 : f32 to vector<4x8x8xf32>
    %113 = arith.mulf %111, %112 : vector<4x8x8xf32>
    %114 = vector.broadcast %4 : vector<4x1x8xf32> to vector<4x8x8xf32>
    %115 = arith.addf %113, %114 : vector<4x8x8xf32>
    %cst_38 = arith.constant dense<0xFF800000> : vector<4x8xf32>
    %116 = vector.multi_reduction <maximumf>, %115, %cst_38 [2] : vector<4x8x8xf32> to vector<4x8xf32>
    %117 = vector.shape_cast %116 : vector<4x8xf32> to vector<4x8x1xf32>
    %118 = vector.broadcast %117 : vector<4x8x1xf32> to vector<4x8x8xf32>
    %119 = arith.subf %115, %118 : vector<4x8x8xf32>
    %120 = math.exp %119 : vector<4x8x8xf32>
    %cst_39 = arith.constant dense<0.000000e+00> : vector<4x8xf32>
    %121 = vector.multi_reduction <add>, %120, %cst_39 [2] : vector<4x8x8xf32> to vector<4x8xf32>
    %122 = vector.shape_cast %121 : vector<4x8xf32> to vector<4x8x1xf32>
    %123 = tpu.reciprocal %122 : vector<4x8x1xf32> -> vector<4x8x1xf32>
    %124 = vector.broadcast %123 : vector<4x8x1xf32> to vector<4x8x8xf32>
    %125 = arith.mulf %120, %124 : vector<4x8x8xf32>
    "tpu.trace_start"() <{level = 10 : i32, message = "bqk,bkd->bqd"}> : () -> ()
    %cst_40 = arith.constant dense<0.000000e+00> : vector<4x8x4xf32>
    %126 = tpu.matmul %125, %110, %cst_40 {dimension_numbers = #tpu.dot_dimension_numbers<[2], [1], [1], [2], [0, 0, 0, 1, 1, 2], [0], [0]>} : vector<4x8x8xf32>, vector<4x8x4xf32>, vector<4x8x4xf32> -> vector<4x8x4xf32>
    "tpu.trace_stop"() : () -> ()
    %127 = vector.extract_strided_slice %12 {offsets = [0, 0, 24], sizes = [4, 8, 4], strides = [1, 1, 1]} : vector<4x8x96xf32> to vector<4x8x4xf32>
    %128 = vector.extract_strided_slice %12 {offsets = [0, 0, 56], sizes = [4, 8, 4], strides = [1, 1, 1]} : vector<4x8x96xf32> to vector<4x8x4xf32>
    %129 = vector.extract_strided_slice %12 {offsets = [0, 0, 88], sizes = [4, 8, 4], strides = [1, 1, 1]} : vector<4x8x96xf32> to vector<4x8x4xf32>
    "tpu.trace_start"() <{level = 10 : i32, message = "bqd,bkd->bqk"}> : () -> ()
    %cst_41 = arith.constant dense<0.000000e+00> : vector<4x8x8xf32>
    %130 = tpu.matmul %127, %128, %cst_41 {dimension_numbers = #tpu.dot_dimension_numbers<[2], [2], [1], [1], [0, 0, 0, 1, 1, 1], [0], [0]>} : vector<4x8x4xf32>, vector<4x8x4xf32>, vector<4x8x8xf32> -> vector<4x8x8xf32>
    "tpu.trace_stop"() : () -> ()
    %cst_42 = arith.constant 5.000000e-01 : f32
    %131 = vector.broadcast %cst_42 : f32 to vector<4x8x8xf32>
    %132 = arith.mulf %130, %131 : vector<4x8x8xf32>
    %133 = vector.broadcast %4 : vector<4x1x8xf32> to vector<4x8x8xf32>
    %134 = arith.addf %132, %133 : vector<4x8x8xf32>
    %cst_43 = arith.constant dense<0xFF800000> : vector<4x8xf32>
    %135 = vector.multi_reduction <maximumf>, %134, %cst_43 [2] : vector<4x8x8xf32> to vector<4x8xf32>
    %136 = vector.shape_cast %135 : vector<4x8xf32> to vector<4x8x1xf32>
    %137 = vector.broadcast %136 : vector<4x8x1xf32> to vector<4x8x8xf32>
    %138 = arith.subf %134, %137 : vector<4x8x8xf32>
    %139 = math.exp %138 : vector<4x8x8xf32>
    %cst_44 = arith.constant dense<0.000000e+00> : vector<4x8xf32>
    %140 = vector.multi_reduction <add>, %139, %cst_44 [2] : vector<4x8x8xf32> to vector<4x8xf32>
    %141 = vector.shape_cast %140 : vector<4x8xf32> to vector<4x8x1xf32>
    %142 = tpu.reciprocal %141 : vector<4x8x1xf32> -> vector<4x8x1xf32>
    %143 = vector.broadcast %142 : vector<4x8x1xf32> to vector<4x8x8xf32>
    %144 = arith.mulf %139, %143 : vector<4x8x8xf32>
    "tpu.trace_start"() <{level = 10 : i32, message = "bqk,bkd->bqd"}> : () -> ()
    %cst_45 = arith.constant dense<0.000000e+00> : vector<4x8x4xf32>
    %145 = tpu.matmul %144, %129, %cst_45 {dimension_numbers = #tpu.dot_dimension_numbers<[2], [1], [1], [2], [0, 0, 0, 1, 1, 2], [0], [0]>} : vector<4x8x8xf32>, vector<4x8x4xf32>, vector<4x8x4xf32> -> vector<4x8x4xf32>
    "tpu.trace_stop"() : () -> ()
    %146 = vector.extract_strided_slice %12 {offsets = [0, 0, 28], sizes = [4, 8, 4], strides = [1, 1, 1]} : vector<4x8x96xf32> to vector<4x8x4xf32>
    %147 = vector.extract_strided_slice %12 {offsets = [0, 0, 60], sizes = [4, 8, 4], strides = [1, 1, 1]} : vector<4x8x96xf32> to vector<4x8x4xf32>
    %148 = vector.extract_strided_slice %12 {offsets = [0, 0, 92], sizes = [4, 8, 4], strides = [1, 1, 1]} : vector<4x8x96xf32> to vector<4x8x4xf32>
    "tpu.trace_start"() <{level = 10 : i32, message = "bqd,bkd->bqk"}> : () -> ()
    %cst_46 = arith.constant dense<0.000000e+00> : vector<4x8x8xf32>
    %149 = tpu.matmul %146, %147, %cst_46 {dimension_numbers = #tpu.dot_dimension_numbers<[2], [2], [1], [1], [0, 0, 0, 1, 1, 1], [0], [0]>} : vector<4x8x4xf32>, vector<4x8x4xf32>, vector<4x8x8xf32> -> vector<4x8x8xf32>
    "tpu.trace_stop"() : () -> ()
    %cst_47 = arith.constant 5.000000e-01 : f32
    %150 = vector.broadcast %cst_47 : f32 to vector<4x8x8xf32>
    %151 = arith.mulf %149, %150 : vector<4x8x8xf32>
    %152 = vector.broadcast %4 : vector<4x1x8xf32> to vector<4x8x8xf32>
    %153 = arith.addf %151, %152 : vector<4x8x8xf32>
    %cst_48 = arith.constant dense<0xFF800000> : vector<4x8xf32>
    %154 = vector.multi_reduction <maximumf>, %153, %cst_48 [2] : vector<4x8x8xf32> to vector<4x8xf32>
    %155 = vector.shape_cast %154 : vector<4x8xf32> to vector<4x8x1xf32>
    %156 = vector.broadcast %155 : vector<4x8x1xf32> to vector<4x8x8xf32>
    %157 = arith.subf %153, %156 : vector<4x8x8xf32>
    %158 = math.exp %157 : vector<4x8x8xf32>
    %cst_49 = arith.constant dense<0.000000e+00> : vector<4x8xf32>
    %159 = vector.multi_reduction <add>, %158, %cst_49 [2] : vector<4x8x8xf32> to vector<4x8xf32>
    %160 = vector.shape_cast %159 : vector<4x8xf32> to vector<4x8x1xf32>
    %161 = tpu.reciprocal %160 : vector<4x8x1xf32> -> vector<4x8x1xf32>
    %162 = vector.broadcast %161 : vector<4x8x1xf32> to vector<4x8x8xf32>
    %163 = arith.mulf %158, %162 : vector<4x8x8xf32>
    "tpu.trace_start"() <{level = 10 : i32, message = "bqk,bkd->bqd"}> : () -> ()
    %cst_50 = arith.constant dense<0.000000e+00> : vector<4x8x4xf32>
    %164 = tpu.matmul %163, %148, %cst_50 {dimension_numbers = #tpu.dot_dimension_numbers<[2], [1], [1], [2], [0, 0, 0, 1, 1, 2], [0], [0]>} : vector<4x8x8xf32>, vector<4x8x4xf32>, vector<4x8x4xf32> -> vector<4x8x4xf32>
    "tpu.trace_stop"() : () -> ()
    %165 = tpu.concatenate %31, %50, %69, %88, %107, %126, %145, %164 in 2 : vector<4x8x4xf32>, vector<4x8x4xf32>, vector<4x8x4xf32>, vector<4x8x4xf32>, vector<4x8x4xf32>, vector<4x8x4xf32>, vector<4x8x4xf32>, vector<4x8x4xf32> -> vector<4x8x32xf32>
    %166 = vector.shape_cast %165 : vector<4x8x32xf32> to vector<32x32xf32>
    %c0_51 = arith.constant 0 : index
    %c0_52 = arith.constant 0 : index
    %c0_53 = arith.constant 0 : index
    %167 = vector.load %arg6[%c0_51, %c0_52, %c0_53] : memref<1x32x32xf32, #tpu.memory_space<vmem>>, vector<1x32x32xf32>
    %168 = vector.shape_cast %167 : vector<1x32x32xf32> to vector<32x32xf32>
    %cst_54 = arith.constant dense<0.000000e+00> : vector<32x32xf32>
    %169 = tpu.matmul %166, %168, %cst_54 {dimension_numbers = #tpu.dot_dimension_numbers<[1], [0], [0], [1], [0, 0, 1, 1], [], []>} : vector<32x32xf32>, vector<32x32xf32>, vector<32x32xf32> -> vector<32x32xf32>
    %c0_55 = arith.constant 0 : index
    %c0_56 = arith.constant 0 : index
    %c0_57 = arith.constant 0 : index
    %170 = vector.load %arg7[%c0_55, %c0_56, %c0_57] : memref<1x1x32xf32, #tpu.memory_space<vmem>>, vector<1x1x32xf32>
    %171 = vector.shape_cast %170 : vector<1x1x32xf32> to vector<1x32xf32>
    %172 = vector.broadcast %171 : vector<1x32xf32> to vector<32x32xf32>
    %173 = arith.addf %169, %172 : vector<32x32xf32>
    %174 = arith.addf %3, %173 : vector<32x32xf32>
    %c0_58 = arith.constant 0 : index
    %c0_59 = arith.constant 0 : index
    %c0_60 = arith.constant 0 : index
    %175 = vector.load %arg8[%c0_58, %c0_59, %c0_60] : memref<1x1x32xf32, #tpu.memory_space<vmem>>, vector<1x1x32xf32>
    %176 = vector.shape_cast %175 : vector<1x1x32xf32> to vector<1x32xf32>
    %c0_61 = arith.constant 0 : index
    %c0_62 = arith.constant 0 : index
    %c0_63 = arith.constant 0 : index
    %177 = vector.load %arg9[%c0_61, %c0_62, %c0_63] : memref<1x1x32xf32, #tpu.memory_space<vmem>>, vector<1x1x32xf32>
    %178 = vector.shape_cast %177 : vector<1x1x32xf32> to vector<1x32xf32>
    %cst_64 = arith.constant dense<0.000000e+00> : vector<32xf32>
    %179 = vector.multi_reduction <add>, %174, %cst_64 [1] : vector<32x32xf32> to vector<32xf32>
    %180 = vector.shape_cast %179 : vector<32xf32> to vector<32x1xf32>
    %cst_65 = arith.constant 3.200000e+01 : f32
    %181 = vector.broadcast %cst_65 : f32 to vector<32x1xf32>
    %182 = arith.divf %180, %181 : vector<32x1xf32>
    %183 = vector.broadcast %182 : vector<32x1xf32> to vector<32x32xf32>
    %184 = arith.subf %174, %183 : vector<32x32xf32>
    %185 = arith.mulf %184, %184 : vector<32x32xf32>
    %cst_66 = arith.constant dense<0.000000e+00> : vector<32xf32>
    %186 = vector.multi_reduction <add>, %185, %cst_66 [1] : vector<32x32xf32> to vector<32xf32>
    %187 = vector.shape_cast %186 : vector<32xf32> to vector<32x1xf32>
    %cst_67 = arith.constant 3.200000e+01 : f32
    %188 = vector.broadcast %cst_67 : f32 to vector<32x1xf32>
    %189 = arith.divf %187, %188 : vector<32x1xf32>
    %cst_68 = arith.constant 9.99999974E-6 : f32
    %190 = vector.broadcast %cst_68 : f32 to vector<32x1xf32>
    %191 = arith.addf %189, %190 : vector<32x1xf32>
    %192 = math.rsqrt %191 : vector<32x1xf32>
    %193 = vector.broadcast %192 : vector<32x1xf32> to vector<32x32xf32>
    %194 = arith.mulf %184, %193 : vector<32x32xf32>
    %195 = vector.broadcast %176 : vector<1x32xf32> to vector<32x32xf32>
    %196 = arith.mulf %194, %195 : vector<32x32xf32>
    %197 = vector.broadcast %178 : vector<1x32xf32> to vector<32x32xf32>
    %198 = arith.addf %196, %197 : vector<32x32xf32>
    %c0_69 = arith.constant 0 : index
    %c0_70 = arith.constant 0 : index
    %c0_71 = arith.constant 0 : index
    %199 = vector.load %arg10[%c0_69, %c0_70, %c0_71] : memref<1x32x2048xf32, #tpu.memory_space<vmem>>, vector<1x32x2048xf32>
    %200 = vector.shape_cast %199 : vector<1x32x2048xf32> to vector<32x2048xf32>
    %cst_72 = arith.constant dense<0.000000e+00> : vector<32x2048xf32>
    %201 = tpu.matmul %198, %200, %cst_72 {dimension_numbers = #tpu.dot_dimension_numbers<[1], [0], [0], [1], [0, 0, 1, 1], [], []>} : vector<32x32xf32>, vector<32x2048xf32>, vector<32x2048xf32> -> vector<32x2048xf32>
    %c0_73 = arith.constant 0 : index
    %c0_74 = arith.constant 0 : index
    %c0_75 = arith.constant 0 : index
    %202 = vector.load %arg11[%c0_73, %c0_74, %c0_75] : memref<1x1x2048xf32, #tpu.memory_space<vmem>>, vector<1x1x2048xf32>
    %203 = vector.shape_cast %202 : vector<1x1x2048xf32> to vector<1x2048xf32>
    %204 = vector.broadcast %203 : vector<1x2048xf32> to vector<32x2048xf32>
    %205 = arith.addf %201, %204 : vector<32x2048xf32>
    %cst_76 = arith.constant 0.000000e+00 : f32
    %206 = vector.broadcast %cst_76 : f32 to vector<32x2048xf32>
    %207 = arith.maximumf %205, %206 : vector<32x2048xf32>
    %c0_77 = arith.constant 0 : index
    %c0_78 = arith.constant 0 : index
    %c0_79 = arith.constant 0 : index
    %208 = vector.load %arg12[%c0_77, %c0_78, %c0_79] : memref<1x2048x32xf32, #tpu.memory_space<vmem>>, vector<1x2048x32xf32>
    %209 = vector.shape_cast %208 : vector<1x2048x32xf32> to vector<2048x32xf32>
    %cst_80 = arith.constant dense<0.000000e+00> : vector<32x32xf32>
    %210 = tpu.matmul %207, %209, %cst_80 {dimension_numbers = #tpu.dot_dimension_numbers<[1], [0], [0], [1], [0, 0, 1, 1], [], []>} : vector<32x2048xf32>, vector<2048x32xf32>, vector<32x32xf32> -> vector<32x32xf32>
    %c0_81 = arith.constant 0 : index
    %c0_82 = arith.constant 0 : index
    %c0_83 = arith.constant 0 : index
    %211 = vector.load %arg13[%c0_81, %c0_82, %c0_83] : memref<1x1x32xf32, #tpu.memory_space<vmem>>, vector<1x1x32xf32>
    %212 = vector.shape_cast %211 : vector<1x1x32xf32> to vector<1x32xf32>
    %213 = vector.broadcast %212 : vector<1x32xf32> to vector<32x32xf32>
    %214 = arith.addf %210, %213 : vector<32x32xf32>
    %215 = arith.addf %198, %214 : vector<32x32xf32>
    %c0_84 = arith.constant 0 : index
    %c0_85 = arith.constant 0 : index
    %c0_86 = arith.constant 0 : index
    %216 = vector.load %arg14[%c0_84, %c0_85, %c0_86] : memref<1x1x32xf32, #tpu.memory_space<vmem>>, vector<1x1x32xf32>
    %217 = vector.shape_cast %216 : vector<1x1x32xf32> to vector<1x32xf32>
    %c0_87 = arith.constant 0 : index
    %c0_88 = arith.constant 0 : index
    %c0_89 = arith.constant 0 : index
    %218 = vector.load %arg15[%c0_87, %c0_88, %c0_89] : memref<1x1x32xf32, #tpu.memory_space<vmem>>, vector<1x1x32xf32>
    %219 = vector.shape_cast %218 : vector<1x1x32xf32> to vector<1x32xf32>
    %cst_90 = arith.constant dense<0.000000e+00> : vector<32xf32>
    %220 = vector.multi_reduction <add>, %215, %cst_90 [1] : vector<32x32xf32> to vector<32xf32>
    %221 = vector.shape_cast %220 : vector<32xf32> to vector<32x1xf32>
    %cst_91 = arith.constant 3.200000e+01 : f32
    %222 = vector.broadcast %cst_91 : f32 to vector<32x1xf32>
    %223 = arith.divf %221, %222 : vector<32x1xf32>
    %224 = vector.broadcast %223 : vector<32x1xf32> to vector<32x32xf32>
    %225 = arith.subf %215, %224 : vector<32x32xf32>
    %226 = arith.mulf %225, %225 : vector<32x32xf32>
    %cst_92 = arith.constant dense<0.000000e+00> : vector<32xf32>
    %227 = vector.multi_reduction <add>, %226, %cst_92 [1] : vector<32x32xf32> to vector<32xf32>
    %228 = vector.shape_cast %227 : vector<32xf32> to vector<32x1xf32>
    %cst_93 = arith.constant 3.200000e+01 : f32
    %229 = vector.broadcast %cst_93 : f32 to vector<32x1xf32>
    %230 = arith.divf %228, %229 : vector<32x1xf32>
    %cst_94 = arith.constant 9.99999974E-6 : f32
    %231 = vector.broadcast %cst_94 : f32 to vector<32x1xf32>
    %232 = arith.addf %230, %231 : vector<32x1xf32>
    %233 = math.rsqrt %232 : vector<32x1xf32>
    %234 = vector.broadcast %233 : vector<32x1xf32> to vector<32x32xf32>
    %235 = arith.mulf %225, %234 : vector<32x32xf32>
    %236 = vector.broadcast %217 : vector<1x32xf32> to vector<32x32xf32>
    %237 = arith.mulf %235, %236 : vector<32x32xf32>
    %238 = vector.broadcast %219 : vector<1x32xf32> to vector<32x32xf32>
    %239 = arith.addf %237, %238 : vector<32x32xf32>
    %c0_95 = arith.constant 0 : index
    %c0_96 = arith.constant 0 : index
    %240 = vector.load %arg21[%c0_95, %c0_96] : memref<32x32xf32, #tpu.memory_space<vmem>>, vector<32x32xf32>
    tpu.vector_store %arg21[%c0_95, %c0_96], %239 {strides = array<i32>} : memref<32x32xf32, #tpu.memory_space<vmem>>, vector<32x32xf32>,
    %c1_i32 = arith.constant 1 : i32
    %241 = arith.cmpi eq, %arg1, %c1_i32 : i32
    %242 = arith.extui %241 : i1 to i32
    %c0_i32_97 = arith.constant 0 : i32
    %243 = arith.cmpi ne, %242, %c0_i32_97 : i32
    scf.if %243 {
      %244 = vector.shape_cast %239 : vector<32x32xf32> to vector<4x8x32xf32>
      %cst_98 = arith.constant dense<0.000000e+00> : vector<4x32xf32>
      %245 = vector.multi_reduction <add>, %244, %cst_98 [1] : vector<4x8x32xf32> to vector<4x32xf32>
      %c0_99 = arith.constant 0 : index
      %c0_100 = arith.constant 0 : index
      %246 = vector.load %arg16[%c0_99, %c0_100] : memref<32x32xf32, #tpu.memory_space<vmem>>, vector<32x32xf32>
      %cst_101 = arith.constant dense<0.000000e+00> : vector<4x32xf32>
      %247 = tpu.matmul %245, %246, %cst_101 {dimension_numbers = #tpu.dot_dimension_numbers<[1], [0], [0], [1], [0, 0, 1, 1], [], []>} : vector<4x32xf32>, vector<32x32xf32>, vector<4x32xf32> -> vector<4x32xf32>
      %c0_102 = arith.constant 0 : index
      %c0_103 = arith.constant 0 : index
      %248 = vector.load %arg17[%c0_102, %c0_103] : memref<1x32xf32, #tpu.memory_space<vmem>>, vector<1x32xf32>
      %249 = vector.broadcast %248 : vector<1x32xf32> to vector<4x32xf32>
      %250 = arith.addf %247, %249 : vector<4x32xf32>
      %cst_104 = arith.constant 0.000000e+00 : f32
      %251 = vector.broadcast %cst_104 : f32 to vector<4x32xf32>
      %252 = arith.maximumf %250, %251 : vector<4x32xf32>
      %c0_105 = arith.constant 0 : index
      %c0_106 = arith.constant 0 : index
      %253 = vector.load %arg18[%c0_105, %c0_106] : memref<1x32xf32, #tpu.memory_space<vmem>>, vector<1x32xf32>
      %254 = vector.broadcast %253 : vector<1x32xf32> to vector<4x32xf32>
      %255 = arith.mulf %252, %254 : vector<4x32xf32>
      %cst_107 = arith.constant dense<0.000000e+00> : vector<4xf32>
      %256 = vector.multi_reduction <add>, %255, %cst_107 [1] : vector<4x32xf32> to vector<4xf32>
      %257 = vector.shape_cast %256 : vector<4xf32> to vector<4x1xf32>
      %c0_108 = arith.constant 0 : index
      %c0_109 = arith.constant 0 : index
      %258 = vector.load %arg19[%c0_108, %c0_109] : memref<1x1xf32, #tpu.memory_space<vmem>>, vector<1x1xf32>
      %259 = vector.broadcast %258 : vector<1x1xf32> to vector<4x1xf32>
      %260 = arith.addf %257, %259 : vector<4x1xf32>
      %261 = vector.shape_cast %260 : vector<4x1xf32> to vector<1x4x1xf32>
      %262 = vector.shape_cast %261 : vector<1x4x1xf32> to vector<1x4x1xf32>
      %263 = vector.broadcast %262 : vector<1x4x1xf32> to vector<1x4x128xf32>
      %c0_110 = arith.constant 0 : index
      %c0_111 = arith.constant 0 : index
      %c0_112 = arith.constant 0 : index
      %264 = vector.load %arg20[%c0_110, %c0_111, %c0_112] : memref<1x4x128xf32, #tpu.memory_space<vmem>>, vector<1x4x128xf32>
      tpu.vector_store %arg20[%c0_110, %c0_111, %c0_112], %263 {strides = array<i32>} : memref<1x4x128xf32, #tpu.memory_space<vmem>>, vector<1x4x128xf32>,
    } else {
    }
    return
  }
  func.func @transform_0(%arg0: i32, %arg1: i32) -> (i32, i32) {
    %c0_i32 = arith.constant 0 : i32
    %c0_i32_0 = arith.constant 0 : i32
    return %arg0, %c0_i32 : i32, i32
  }
  func.func @transform_1(%arg0: i32, %arg1: i32) -> (i32, i32, i32) {
    %c0_i32 = arith.constant 0 : i32
    %c0_i32_0 = arith.constant 0 : i32
    %c0_i32_1 = arith.constant 0 : i32
    return %arg0, %c0_i32, %c0_i32_0 : i32, i32, i32
  }
  func.func @transform_2(%arg0: i32, %arg1: i32) -> (i32, i32, i32) {
    %c0_i32 = arith.constant 0 : i32
    %c0_i32_0 = arith.constant 0 : i32
    %c0_i32_1 = arith.constant 0 : i32
    return %arg1, %c0_i32, %c0_i32_0 : i32, i32, i32
  }
  func.func @transform_3(%arg0: i32, %arg1: i32) -> (i32, i32, i32) {
    %c0_i32 = arith.constant 0 : i32
    %c0_i32_0 = arith.constant 0 : i32
    %c0_i32_1 = arith.constant 0 : i32
    return %arg1, %c0_i32, %c0_i32_0 : i32, i32, i32
  }
  func.func @transform_4(%arg0: i32, %arg1: i32) -> (i32, i32, i32) {
    %c0_i32 = arith.constant 0 : i32
    %c0_i32_0 = arith.constant 0 : i32
    %c0_i32_1 = arith.constant 0 : i32
    return %arg1, %c0_i32, %c0_i32_0 : i32, i32, i32
  }
  func.func @transform_5(%arg0: i32, %arg1: i32) -> (i32, i32, i32) {
    %c0_i32 = arith.constant 0 : i32
    %c0_i32_0 = arith.constant 0 : i32
    %c0_i32_1 = arith.constant 0 : i32
    return %arg1, %c0_i32, %c0_i32_0 : i32, i32, i32
  }
  func.func @transform_6(%arg0: i32, %arg1: i32) -> (i32, i32, i32) {
    %c0_i32 = arith.constant 0 : i32
    %c0_i32_0 = arith.constant 0 : i32
    %c0_i32_1 = arith.constant 0 : i32
    return %arg1, %c0_i32, %c0_i32_0 : i32, i32, i32
  }
  func.func @transform_7(%arg0: i32, %arg1: i32) -> (i32, i32, i32) {
    %c0_i32 = arith.constant 0 : i32
    %c0_i32_0 = arith.constant 0 : i32
    %c0_i32_1 = arith.constant 0 : i32
    return %arg1, %c0_i32, %c0_i32_0 : i32, i32, i32
  }
  func.func @transform_8(%arg0: i32, %arg1: i32) -> (i32, i32, i32) {
    %c0_i32 = arith.constant 0 : i32
    %c0_i32_0 = arith.constant 0 : i32
    %c0_i32_1 = arith.constant 0 : i32
    return %arg1, %c0_i32, %c0_i32_0 : i32, i32, i32
  }
  func.func @transform_9(%arg0: i32, %arg1: i32) -> (i32, i32, i32) {
    %c0_i32 = arith.constant 0 : i32
    %c0_i32_0 = arith.constant 0 : i32
    %c0_i32_1 = arith.constant 0 : i32
    return %arg1, %c0_i32, %c0_i32_0 : i32, i32, i32
  }
  func.func @transform_10(%arg0: i32, %arg1: i32) -> (i32, i32, i32) {
    %c0_i32 = arith.constant 0 : i32
    %c0_i32_0 = arith.constant 0 : i32
    %c0_i32_1 = arith.constant 0 : i32
    return %arg1, %c0_i32, %c0_i32_0 : i32, i32, i32
  }
  func.func @transform_11(%arg0: i32, %arg1: i32) -> (i32, i32, i32) {
    %c0_i32 = arith.constant 0 : i32
    %c0_i32_0 = arith.constant 0 : i32
    %c0_i32_1 = arith.constant 0 : i32
    return %arg1, %c0_i32, %c0_i32_0 : i32, i32, i32
  }
  func.func @transform_12(%arg0: i32, %arg1: i32) -> (i32, i32, i32) {
    %c0_i32 = arith.constant 0 : i32
    %c0_i32_0 = arith.constant 0 : i32
    %c0_i32_1 = arith.constant 0 : i32
    return %arg1, %c0_i32, %c0_i32_0 : i32, i32, i32
  }
  func.func @transform_13(%arg0: i32, %arg1: i32) -> (i32, i32, i32) {
    %c0_i32 = arith.constant 0 : i32
    %c0_i32_0 = arith.constant 0 : i32
    %c0_i32_1 = arith.constant 0 : i32
    return %arg1, %c0_i32, %c0_i32_0 : i32, i32, i32
  }
  func.func @transform_14(%arg0: i32, %arg1: i32) -> (i32, i32) {
    %c0_i32 = arith.constant 0 : i32
    %c0_i32_0 = arith.constant 0 : i32
    %c0_i32_1 = arith.constant 0 : i32
    return %c0_i32, %c0_i32_0 : i32, i32
  }
  func.func @transform_15(%arg0: i32, %arg1: i32) -> (i32, i32) {
    %c0_i32 = arith.constant 0 : i32
    %c0_i32_0 = arith.constant 0 : i32
    %c0_i32_1 = arith.constant 0 : i32
    return %c0_i32, %c0_i32_0 : i32, i32
  }
  func.func @transform_16(%arg0: i32, %arg1: i32) -> (i32, i32) {
    %c0_i32 = arith.constant 0 : i32
    %c0_i32_0 = arith.constant 0 : i32
    %c0_i32_1 = arith.constant 0 : i32
    return %c0_i32, %c0_i32_0 : i32, i32
  }
  func.func @transform_17(%arg0: i32, %arg1: i32) -> (i32, i32) {
    %c0_i32 = arith.constant 0 : i32
    %c0_i32_0 = arith.constant 0 : i32
    %c0_i32_1 = arith.constant 0 : i32
    return %c0_i32, %c0_i32_0 : i32, i32
  }
  func.func @transform_18(%arg0: i32, %arg1: i32) -> (i32, i32, i32) {
    %c0_i32 = arith.constant 0 : i32
    %c0_i32_0 = arith.constant 0 : i32
    %c0_i32_1 = arith.constant 0 : i32
    return %arg0, %c0_i32, %c0_i32_0 : i32, i32, i32
  }
}

</mosaic_0001>

<bundles_post_ra>
// kernel: transformer_forward.1
= control target key start
LH: loop header
LB: loop body
LE: loop exit
PB: predicated region body
PF: predicated region fallthrough
CT: control target
= control target key end

     0   :  { %s10346_s29 = smov 0   ;;  %s10348_s30 = smov 0   ;;  %s11920_s0 = inlined_call_operand.vmem [shape: f32[32,32], index: 0, kind: input, shape index: {}]   ;;  %s11921_s1 = inlined_call_operand.vmem [shape: f32[4,1,8], index: 1, kind: input, shape index: {}]   ;;  %s11922_s2 = inlined_call_operand.vmem [shape: f32[2,32,96], index: 2, kind: input, shape index: {}]   ;;  %s11923_s3 = inlined_call_operand.vmem [shape: f32[2,1,96], index: 3, kind: input, shape index: {}]   ;;  %s11924_s4 = inlined_call_operand.vmem [shape: f32[2,32,32], index: 4, kind: input, shape index: {}]   ;;  %s11925_s5 = inlined_call_operand.vmem [shape: f32[2,1,32], index: 5, kind: input, shape index: {}]   ;;  %s11926_s6 = inlined_call_operand.vmem [shape: f32[2,1,32], index: 6, kind: input, shape index: {}]   ;;  %s11927_s7 = inlined_call_operand.vmem [shape: f32[2,1,32], index: 7, kind: input, shape index: {}]   ;;  %s11928_s8 = inlined_call_operand.vmem [shape: f32[2,32,2048], index: 8, kind: input, shape index: {}]   ;;  %s11929_s9 = inlined_call_operand.vmem [shape: f32[2,1,2048], index: 9, kind: input, shape index: {}]   ;;  %s11930_s10 = inlined_call_operand.vmem [shape: f32[2,2048,32], index: 10, kind: input, shape index: {}]   ;;  %s11931_s11 = inlined_call_operand.vmem [shape: f32[2,1,32], index: 11, kind: input, shape index: {}]   ;;  %s11932_s12 = inlined_call_operand.vmem [shape: f32[2,1,32], index: 12, kind: input, shape index: {}]   ;;  %s11933_s13 = inlined_call_operand.vmem [shape: f32[2,1,32], index: 13, kind: input, shape index: {}]   ;;  %s11934_s14 = inlined_call_operand.vmem [shape: f32[32,32], index: 14, kind: input, shape index: {}]   ;;  %s11935_s15 = inlined_call_operand.vmem [shape: f32[1,32], index: 15, kind: input, shape index: {}]   ;;  %s11936_s16 = inlined_call_operand.vmem [shape: f32[1,32], index: 16, kind: input, shape index: {}]   ;;  %s11937_s17 = inlined_call_operand.<no memory space> [shape: f32[1,1], index: 17, kind: input, shape index: {}]   ;;  %s11938_s18 = inlined_call_operand.vmem [shape: f32[1,4,128], index: 18, kind: output, shape index: {}]  }
   0x1   :  { %11945 = sst [smem:[#allocation8_spill]] %s11920_s0  ;;  %v23_v0 = vstv %s11937_s17  ;;  %s10350_s0 = smov 0  }
   0x2   :  { %11946 = sst [smem:[#allocation9_spill]] %s11921_s1  ;;  %24 = vst [vmem:[#allocation3] sm:$0x1] %v23_v0 }
   0x3   :  { %11947 = sst [smem:[#allocation10_spill]] %s11922_s2 }
   0x4   :  { %11948 = sst [smem:[#allocation11_spill]] %s11924_s4 }
   0x5   :  { %11949 = sst [smem:[#allocation12_spill]] %s11928_s8 }
   0x6   :  { %11950 = sst [smem:[#allocation13_spill]] %s11934_s14 }
   0x7   :  { %11951 = sst [smem:[#allocation14_spill]] %s11935_s15 }
   0x8   :  { %11952 = sst [smem:[#allocation15_spill]] %s11936_s16 }
   0x9   :  { %11953 = sst [smem:[#allocation16_spill]] %s11938_s18 }
   0xa LB: > { %11954 = sst [smem:[#allocation4_spill]] %s10207_s30  ;;  %s39_s17 = sadd.s32 1, %s10207_s30  ;;  %s10211_s0 = sphi %s10350_s0, %s30_s0   ;;  %s10207_s30 = sphi %s10348_s30, %s11976_s30   ;;  %s10203_s29 = sphi %s10346_s29, %s11975_s29  }
   0xb   : > { %11955 = sst [smem:[#allocation5_spill]] %s10211_s0  ;;  %p8947_p0 = scmp.ge.s32.totalorder %s10211_s0, 1 }
   0xc   : > { %p40_p1 = scmp.ge.s32.totalorder %s39_s17, 2  ;;  %p642_p2 = scmp.lt.s32.totalorder %s10211_s0, 3 }
   0xe   : > { %s11978_s17 = smov (%p40_p1, %s39_s17), 0  ;;  %p643_p3 = pnand %p8947_p0, %p642_p2 }
   0xf   : > { %11956 = sst [smem:[#allocation6_spill]] %s11978_s17 }
  0x10   : > { %646 = sbr.rel (%p643_p3) target bundleno = 6707 (0x1a33), region = 92 }
  0x15   : > { %p755_p4 = scmp.lt.s32.totalorder %s10203_s29, 1  ;;  %s11957_s24 = sld [smem:[#allocation10_spill]] }
  0x16   : > { %s11958_s4 = sld [smem:[#allocation11_spill]]  ;;  %p8957_p5 = scmp.ne.s32.totalorder %s10203_s29, 0 }
  0x17   : > { %s10368_s19 = scalar_select %p755_p4, %s10203_s29, 1 }
  0x18   : > { %s11959_s8 = sld [smem:[#allocation12_spill]] }
  0x19   : > { %s9113_s1 = sshll.u32 %s10368_s19, 5  ;;  %s9115_s2 = sshll.u32 %s10368_s19, 9 }
  0x1a   : > { %s9116_s17 = sshll.u32 %s10368_s19, 11  ;;  %s793_s22 = scalar_lea.vmem %s11931_s11, %s10368_s19 }
  0x1b   : > { %s10378_s25 = scalar_lea.vmem %s11957_s24, %s9113_s1  ;;  %s10413_s18 = scalar_lea.vmem %s11930_s10, %s9116_s17 }
  0x1c   : > { %s10383_s28 = scalar_lea.vmem %s11958_s4, %s9113_s1  ;;  %s8954_s1 = sshll.u32 %s10368_s19, 4 }
  0x1d   : > { %s10407_s30 = scalar_lea.vmem %s11929_s9, %s8954_s1  ;;  %s799_s26 = scalar_lea.vmem %s11933_s13, %s10368_s19 }
  0x1e   : > { %s10401_s14 = scalar_lea.vmem %s11959_s8, %s9115_s2  ;;  %s796_s2 = scalar_lea.vmem %s11932_s12, %s10368_s19 }
  0x1f   : > { %807 = sbr.rel (%p8957_p5) target bundleno = 41 (0x29), region = 96  ;;  %s11960_s0 = sld [smem:[#allocation8_spill]] (!%p8957_p5) }
  0x24   : > { %vm812_vm0 = vcmask 261120  }
  0x25   : > { %s11961_s16 = smov %s11960_s0  ;;  %v808_v1 = vld [vmem:[%s11960_s0] sm:$0xff] }
  0x26   : > { %v809_v2 = vld [vmem:[%s11961_s16 + $0x8] sm:$0xff]  ;;  %v810_v3 = vld [vmem:[%s11961_s16 + $0x10] sm:$0xff]  ;;  %813 = vst.msk [vmem:[#allocation2] sm:$0xff] %vm812_vm0, %v808_v1  ;;  %v811_v4 = vld [vmem:[%s11961_s16 + $0x18] sm:$0xff] }
  0x27   : > { %814 = vst.msk [vmem:[#allocation2 + $0x8] sm:$0xff] %vm812_vm0, %v809_v2  ;;  %815 = vst.msk [vmem:[#allocation2 + $0x10] sm:$0xff] %vm812_vm0, %v810_v3 }
  0x28   : > { %816 = vst.msk [vmem:[#allocation2 + $0x18] sm:$0xff] %vm812_vm0, %v811_v4 }
  0x29 PF: > { %v828_v5 = vld [vmem:[%s10378_s25 + $0x18] sm:$0xff]  ;;  %v827_v6 = vld [vmem:[%s10378_s25 + $0x10] sm:$0xff]  ;;  %vm836_vm1 = vcmask 261120   ;;  %v826_v8 = vld [vmem:[%s10378_s25 + $0x8] sm:$0xff]  ;;  %v10213_v13 = vmov 0.0   ;;  %vm10214_vm2 = vmmov 0   ;;  %s11962_s23 = scalar_lea.vmem %s11923_s3, %s10368_s19 }
  0x2a   : > { %9618 = vmatprep.subr.mxu0 %v828_v5  ;;  %v825_v9 = vld [vmem:[%s10378_s25] sm:$0xff]  ;;  %9632 = vmatprep.subr.mxu1 %v10213_v13  ;;  %s10215_s24 = smov 96   ;;  %vm937_vm3 = vcmask 31744   ;;  %s11963_s0 = sld [smem:[#allocation9_spill]]  ;;  %vm1275_vm4 = vcmask 64512   ;;  %vm6420_vm5 = vcmask 97280  }
  0x2b   : > { %9619 = vmatpush3.msra.mxu0 %v828_v5  ;;  %9634 = vmatprep.mubr.msk.f32.mxu1 %vm10214_vm2, %v10213_v13  ;;  %v8958_v15 = vld [vmem:[%s11962_s23] ss:$0 sm:$0xff]  ;;  %s10216_s23 = smov 64   ;;  %s10218_s1 = smov 124   ;;  %vm6425_vm6 = vcmask 130048   ;;  %vm6430_vm7 = vcmask 162816  }
  0x2c   : > { %9620 = vmatprep.subr.mxu0 %v827_v6  ;;  %s10219_s27 = smov 60   ;;  %s10221_s20 = smov 120   ;;  %vm6435_vm8 = vcmask 195584   ;;  %vm6440_vm9 = vcmask 228352  }
  0x2d   : > { %v817_v7 = vld [vmem:[#allocation2] sm:$0xff]  ;;  %9621 = vmatpush3.msra.mxu0 %v827_v6  ;;  %s10222_s21 = smov 56   ;;  %s10223_s4 = smov 84  }
  0x2e   : > { %9626 = vmatprep.mubr.msk.f32.mxu0 %vm836_vm1, %v817_v7  ;;  %9622 = vmatprep.subr.mxu0 %v826_v8  ;;  %v818_v10 = vld [vmem:[#allocation2 + $0x8] sm:$0xff]  ;;  %v819_v11 = vld [vmem:[#allocation2 + $0x10] sm:$0xff]  ;;  %s10224_s15 = smov 116   ;;  %s10225_s8 = smov 52  }
  0x2f   : > { %9623 = vmatpush3.msra.mxu0 %v826_v8  ;;  %v820_v12 = vld [vmem:[#allocation2 + $0x18] sm:$0xff]  ;;  %s10226_s25 = smov 80   ;;  %p9105_p6 = scmp.ne.s32.totalorder %s10203_s29, 1 }
  0x30   : > { %9624 = vmatprep.subr.mxu0 %v825_v9  ;;  %s11964_s17 = smov %s11963_s0  ;;  %v10498_v28 = vld [vmem:[%s11963_s0] ss:$0 sm:$0xff]  ;;  %s10220_s0 = smov 88  }
  0x31   : > { %9625 = vmatpush3.msra.mxu0 %v825_v9  ;;  %v10504_v33 = vld [vmem:[%s11964_s17 + $0x1] ss:$0 sm:$0xff]  ;;  %v10511_v40 = vld [vmem:[%s11964_s17 + $0x2] ss:$0 sm:$0xff]  ;;  %v10517_v46 = vld [vmem:[%s11964_s17 + $0x3] ss:$0 sm:$0xff] }
  0x32   : > { %9627 = vmatmul.mubr.msk.f32.vlgmr.msra.gmra.mxu0 %vm836_vm1, %v818_v10  ;;  %9647 = vmatprep.subr.mxu0 %v10213_v13 }
  0x33   : > { %9629 = vmatprep.mubr.msk.f32.mxu0 %vm836_vm1, %v819_v11 }
  0x36   : > { %9630 = vmatmul.mubr.msk.f32.gmra.mxu0 %vm836_vm1, %v820_v12 }
  0x37   : > { %9649 = vmatprep.mubr.msk.f32.mxu0 %vm10214_vm2, %v10213_v13 }
  0xf2   : > { %v9628_v14 = vpop.f32.mrf.mxu0 }
  0xf3   : > { %v10462_v20 = vadd.f32 %v9628_v14, %v8958_v15 }
  0xf4   : > { %v915_v16 = vpop.f32.mrf.mxu0 }
  0xf5   : > { %v10459_v17 = vadd.f32 %v8958_v15, %v915_v16 }
  0xf6   : > { %v9631_v18 = vpop.f32.mrf.mxu0 }
  0xf7   : > { %935 = vrot.lane.b32.xlu0 %v10459_v17, %s10215_s24  ;;  %v10466_v22 = vadd.f32 %v9631_v18, %v8958_v15 }
  0xf8   : > { %v925_v19 = vpop.f32.mrf.mxu0 }
  0xf9   : > { %v10464_v21 = vadd.f32 %v8958_v15, %v925_v19 }
  0xfb   : > { %1090 = vrot.lane.b32.xlu1 %v10464_v21, %s10215_s24  ;;  %1013 = vrot.lane.b32.xlu0 %v10462_v20, %s10215_s24 }
  0xff   : > { %1167 = vrot.lane.b32.xlu1 %v10466_v22, %s10215_s24  ;;  %s10217_s24 = smov 92  }
 0x169   : > { %v936_v23 = vpop.permute.xlu0 %935 }
 0x16a   : > { %9633 = vmatpush3.xpose.msk.msra.mxu1 %vm937_vm3, %v936_v23 }
 0x16b   : > { %9637 = vmatprep.subr.mxu1 %v10213_v13 }
 0x16d   : > { %v1091_v24 = vpop.permute.xlu1 %1090  ;;  %9635 = vmatmul.mubr.msk.f32.vlgmr.msra.gmra.mxu1 %vm937_vm3, %v10459_v17  ;;  %v1014_v25 = vpop.permute.xlu0 %1013 }
 0x16e   : > { %9638 = vmatpush3.xpose.msk.msra.mxu1 %vm937_vm3, %v1014_v25  ;;  %9639 = vmatprep.mubr.msk.f32.mxu1 %vm10214_vm2, %v10213_v13 }
 0x16f   : > { %9642 = vmatprep.subr.mxu1 %v10213_v13 }
 0x171   : > { %v1168_v26 = vpop.permute.xlu1 %1167  ;;  %9640 = vmatmul.mubr.msk.f32.vlgmr.msra.gmra.mxu1 %vm937_vm3, %v10462_v20 }
 0x172   : > { %9643 = vmatpush3.xpose.msk.msra.mxu1 %vm937_vm3, %v1091_v24  ;;  %9648 = vmatpush3.xpose.msk.msra.mxu0 %vm937_vm3, %v1168_v26 }
 0x173   : > { %9644 = vmatprep.mubr.msk.f32.mxu1 %vm10214_vm2, %v10213_v13  ;;  %9652 = vmatprep.subr.mxu1 %v10213_v13 }
 0x174   : > { %9657 = vmatprep.subr.mxu0 %v10213_v13 }
 0x175   : > { %9645 = vmatmul.mubr.msk.f32.vlgmr.msra.gmra.mxu1 %vm937_vm3, %v10464_v21  ;;  %9650 = vmatmul.mubr.msk.f32.vlgmr.msra.gmra.mxu0 %vm937_vm3, %v10466_v22 }
 0x176   : > { %9654 = vmatprep.mubr.msk.f32.mxu1 %vm10214_vm2, %v10213_v13  ;;  %9659 = vmatprep.mubr.msk.f32.mxu0 %vm10214_vm2, %v10213_v13 }
 0x22d   : > { %v1008_v27 = vpop.f32.mrf.mxu1 }
 0x22e   : > { %v1243_v29 = vmul.f32 0.5, %v1008_v27 }
 0x22f   : > { %v9636_v30 = vpop.f32.mrf.mxu1 }
 0x230   : > { %v1271_v31 = vadd.f32 %v10498_v28, %v1243_v29 }
 0x231   : > { %v1085_v32 = vpop.f32.mrf.mxu1 }
 0x232   : > { %v1244_v34 = vmul.f32 0.5, %v1085_v32  ;;  %v1276_v35 = vsel %vm1275_vm4, %v1271_v31, -inf }
 0x233   : > { %1277 = vmax.xlane.f32.xlu0 %v1276_v35  ;;  %v9641_v36 = vpop.f32.mrf.mxu1 }
 0x234   : > { %v1272_v37 = vadd.f32 %v10504_v33, %v1244_v34 }
 0x235   : > { %v1162_v38 = vpop.f32.mrf.mxu1  ;;  %v1239_v39 = vpop.f32.mrf.mxu0 }
 0x236   : > { %v1245_v41 = vmul.f32 0.5, %v1162_v38  ;;  %v1246_v42 = vmul.f32 0.5, %v1239_v39  ;;  %v1279_v43 = vsel %vm1275_vm4, %v1272_v37, -inf }
 0x237   : > { %v9651_v44 = vpop.f32.mrf.mxu0  ;;  %1280 = vmax.xlane.f32.xlu1 %v1279_v43  ;;  %v9646_v45 = vpop.f32.mrf.mxu1 }
 0x238   : > { %v1273_v47 = vadd.f32 %v10511_v40, %v1245_v41  ;;  %v1274_v49 = vadd.f32 %v10517_v46, %v1246_v42 }
 0x23a   : > { %v1282_v48 = vsel %vm1275_vm4, %v1273_v47, -inf  ;;  %v1285_v50 = vsel %vm1275_vm4, %v1274_v49, -inf }
 0x23b   : > { %1283 = vmax.xlane.f32.xlu0 %v1282_v48 }
 0x23f   : > { %1286 = vmax.xlane.f32.xlu0 %v1285_v50 }
 0x248   : > { %1320 = vrot.lane.b32.xlu1 %v10459_v17, %s10216_s23 }
 0x24c   : > { %1472 = vrot.lane.b32.xlu1 %v10464_v21, %s10216_s23 }
 0x250   : > { %1548 = vrot.lane.b32.xlu1 %v10466_v22, %s10216_s23 }
 0x254   : > { %1704 = vrot.lane.b32.xlu1 %v10462_v20, %s10217_s24 }
 0x255   : > { %1396 = vrot.lane.b32.xlu0 %v10462_v20, %s10216_s23  ;;  %s10227_s23 = smov 112  }
 0x259   : > { %1626 = vrot.lane.b32.xlu0 %v10459_v17, %s10217_s24 }
 0x2bc   : > { %v1278_v51 = vpop.xlane.xlu0 %1277 }
 0x2bd   : > { %v1288_v52 = vsub.f32 %v1271_v31, %v1278_v51 }
 0x2bf   : > { %v1292_v53 = vmul.f32 1.442695, %v1288_v52 }
 0x2c0   : > { %v1281_v54 = vpop.xlane.xlu1 %1280 }
 0x2c1   : > { %10036 = vpow2.f32 %v1292_v53  ;;  %v1289_v57 = vsub.f32 %v1272_v37, %v1281_v54 }
 0x2c3   : > { %v1294_v60 = vmul.f32 1.442695, %v1289_v57 }
 0x2c4   : > { %v1321_v55 = vpop.permute.xlu1 %1320  ;;  %v1284_v56 = vpop.xlane.xlu0 %1283 }
 0x2c5   : > { %9653 = vmatpush3.msra.mxu1 %v1321_v55  ;;  %v1290_v5 = vsub.f32 %v1273_v47, %v1284_v56 }
 0x2c6   : > { %9662 = vmatprep.subr.mxu1 %v10213_v13 }
 0x2c7   : > { %v1296_v6 = vmul.f32 1.442695, %v1290_v5 }
 0x2c8   : > { %v1287_v58 = vpop.xlane.xlu0 %1286  ;;  %v1473_v9 = vpop.permute.xlu1 %1472 }
 0x2c9   : > { %v1291_v59 = vsub.f32 %v1274_v49, %v1287_v58 }
 0x2cb   : > { %v1298_v61 = vmul.f32 1.442695, %v1291_v59 }
 0x2cc   : > { %v1397_v62 = vpop.permute.xlu0 %1396  ;;  %v1549_v10 = vpop.permute.xlu1 %1548 }
 0x2cd   : > { %10038 = vpow2.f32 %v1298_v61  ;;  %9658 = vmatpush3.msra.mxu0 %v1397_v62 }
 0x2ce   : > { %v10037_v63 = vpop.eup %10036  ;;  %9667 = vmatprep.subr.mxu0 %v10213_v13  ;;  %10040 = vpow2.f32 %v1294_v60 }
 0x2cf   : > { %v1300_v0 = vsel %vm1275_vm4, %v10037_v63, 0.0  ;;  %10042 = vpow2.f32 %v1296_v6 }
 0x2d0   : > { %1301 = vadd.xlane.f32.xlu1 %v1300_v0  ;;  %v1705_v11 = vpop.permute.xlu1 %1704  ;;  %v1627_v14 = vpop.permute.xlu0 %1626 }
 0x2da   : > { %v10039_v1 = vpop.eup %10038 }
 0x2db   : > { %v1309_v2 = vsel %vm1275_vm4, %v10039_v1, 0.0  ;;  %v10041_v3 = vpop.eup %10040 }
 0x2dc   : > { %1310 = vadd.xlane.f32.xlu0 %v1309_v2  ;;  %v1303_v4 = vsel %vm1275_vm4, %v10041_v3, 0.0  ;;  %v10043_v7 = vpop.eup %10042 }
 0x2dd   : > { %v1306_v8 = vsel %vm1275_vm4, %v10043_v7, 0.0 }
 0x2e0   : > { %1304 = vadd.xlane.f32.xlu0 %v1303_v4 }
 0x2e1   : > { %1702 = vrot.lane.b32.xlu1 %v10462_v20, %s10218_s1 }
 0x2f6   : > { %1624 = vrot.lane.b32.xlu0 %v10459_v17, %s10218_s1 }
 0x2fa   : > { %1782 = vrot.lane.b32.xlu0 %v10464_v21, %s10217_s24 }
 0x2fe   : > { %1780 = vrot.lane.b32.xlu0 %v10464_v21, %s10218_s1 }
 0x305   : > { %1307 = vadd.xlane.f32.xlu1 %v1306_v8 }
 0x316   : > { %1860 = vrot.lane.b32.xlu1 %v10466_v22, %s10217_s24  ;;  %s10231_s24 = smov 44  }
 0x31a   : > { %1858 = vrot.lane.b32.xlu1 %v10466_v22, %s10218_s1  ;;  %s10232_s1 = smov 72  }
 0x359   : > { %v1302_v12 = vpop.xlane.xlu1 %1301 }
 0x35a   : > { %10044 = vrcp.f32 %v1302_v12 }
 0x35d   : > { %v1703_v27 = vpop.permute.xlu1 %1702 }
 0x365   : > { %v1311_v15 = vpop.xlane.xlu0 %1310 }
 0x367   : > { %v10045_v16 = vpop.eup %10044 }
 0x368   : > { %v1316_v18 = vmul.f32 %v10045_v16, %v10037_v63 }
 0x369   : > { %v1305_v19 = vpop.xlane.xlu0 %1304 }
 0x36a   : > { %10046 = vrcp.f32 %v1305_v19  ;;  %9655 = vmatmul.mubr.msk.f32.vlgmr.msra.gmra.mxu1 %vm1275_vm4, %v1316_v18 }
 0x36b   : > { %9663 = vmatpush3.msra.mxu1 %v1473_v9  ;;  %9664 = vmatprep.mubr.msk.f32.mxu1 %vm10214_vm2, %v10213_v13  ;;  %10048 = vrcp.f32 %v1311_v15 }
 0x36c   : > { %9672 = vmatprep.subr.mxu1 %v10213_v13 }
 0x36d   : > { %v1625_v32 = vpop.permute.xlu0 %1624 }
 0x371   : > { %v1783_v36 = vpop.permute.xlu0 %1782 }
 0x375   : > { %v1781_v37 = vpop.permute.xlu0 %1780 }
 0x377   : > { %v10047_v23 = vpop.eup %10046 }
 0x378   : > { %v1317_v24 = vmul.f32 %v10047_v23, %v10041_v3  ;;  %v10049_v25 = vpop.eup %10048 }
 0x379   : > { %v1319_v26 = vmul.f32 %v10049_v25, %v10039_v1 }
 0x37a   : > { %9660 = vmatmul.mubr.msk.f32.vlgmr.msra.gmra.mxu0 %vm1275_vm4, %v1317_v24 }
 0x37b   : > { %9668 = vmatpush3.msra.mxu0 %v1549_v10  ;;  %9669 = vmatprep.mubr.msk.f32.mxu0 %vm10214_vm2, %v10213_v13 }
 0x37c   : > { %9677 = vmatprep.subr.mxu0 %v10213_v13 }
 0x37e   : > { %9670 = vmatmul.mubr.msk.f32.vlgmr.msra.gmra.mxu0 %vm1275_vm4, %v1319_v26 }
 0x37f   : > { %9678 = vmatpush3.xpose.msk.msra.mxu0 %vm937_vm3, %v1705_v11  ;;  %9679 = vmatprep.mubr.msk.f32.mxu0 %vm10214_vm2, %v10213_v13 }
 0x380   : > { %9687 = vmatprep.subr.mxu0 %v10213_v13 }
 0x382   : > { %9680 = vmatmul.mubr.msk.f32.vlgmr.msra.gmra.mxu0 %vm937_vm3, %v1703_v27 }
 0x383   : > { %9689 = vmatprep.mubr.msk.f32.mxu0 %vm10214_vm2, %v10213_v13 }
 0x38e   : > { %v1308_v29 = vpop.xlane.xlu1 %1307 }
 0x38f   : > { %10050 = vrcp.f32 %v1308_v29 }
 0x392   : > { %v1861_v30 = vpop.permute.xlu1 %1860 }
 0x393   : > { %9688 = vmatpush3.xpose.msk.msra.mxu0 %vm937_vm3, %v1861_v30 }
 0x394   : > { %9697 = vmatprep.subr.mxu0 %v10213_v13 }
 0x396   : > { %v1859_v31 = vpop.permute.xlu1 %1858 }
 0x397   : > { %9690 = vmatmul.mubr.msk.f32.vlgmr.msra.gmra.mxu0 %vm937_vm3, %v1859_v31 }
 0x398   : > { %9699 = vmatprep.mubr.msk.f32.mxu0 %vm10214_vm2, %v10213_v13 }
 0x39c   : > { %v10051_v34 = vpop.eup %10050 }
 0x39d   : > { %v1318_v35 = vmul.f32 %v10051_v34, %v10043_v7 }
 0x39f   : > { %9665 = vmatmul.mubr.msk.f32.vlgmr.msra.gmra.mxu1 %vm1275_vm4, %v1318_v35 }
 0x3a0   : > { %9673 = vmatpush3.xpose.msk.msra.mxu1 %vm937_vm3, %v1627_v14  ;;  %9674 = vmatprep.mubr.msk.f32.mxu1 %vm10214_vm2, %v10213_v13 }
 0x3a1   : > { %9682 = vmatprep.subr.mxu1 %v10213_v13 }
 0x3a3   : > { %9675 = vmatmul.mubr.msk.f32.vlgmr.msra.gmra.mxu1 %vm937_vm3, %v1625_v32 }
 0x3a4   : > { %9683 = vmatpush3.xpose.msk.msra.mxu1 %vm937_vm3, %v1783_v36  ;;  %9684 = vmatprep.mubr.msk.f32.mxu1 %vm10214_vm2, %v10213_v13 }
 0x3a5   : > { %9692 = vmatprep.subr.mxu1 %v10213_v13 }
 0x3a7   : > { %9685 = vmatmul.mubr.msk.f32.vlgmr.msra.gmra.mxu1 %vm937_vm3, %v1781_v37 }
 0x3a8   : > { %9694 = vmatprep.mubr.msk.f32.mxu1 %vm10214_vm2, %v10213_v13 }
 0x42a   : > { %v10579_v38 = vpop.f32.mrf.mxu1 }
 0x42c   : > { %v9656_v39 = vpop.f32.mrf.mxu1 }
 0x43a   : > { %v10581_v41 = vpop.f32.mrf.mxu0 }
 0x43c   : > { %v9661_v42 = vpop.f32.mrf.mxu0 }
 0x43e   : > { %v10583_v43 = vpop.f32.mrf.mxu0 }
 0x440   : > { %v9671_v44 = vpop.f32.mrf.mxu0 }
 0x442   : > { %v1776_v45 = vpop.f32.mrf.mxu0 }
 0x443   : > { %v1937_v47 = vmul.f32 0.5, %v1776_v45 }
 0x444   : > { %v9681_v48 = vpop.f32.mrf.mxu0 }
 0x445   : > { %v1941_v49 = vadd.f32 %v10504_v33, %v1937_v47 }
 0x447   : > { %v1947_v50 = vsel %vm1275_vm4, %v1941_v49, -inf }
 0x448   : > { %1948 = vmax.xlane.f32.xlu1 %v1947_v50 }
 0x457   : > { %v1932_v51 = vpop.f32.mrf.mxu0 }
 0x458   : > { %v1939_v60 = vmul.f32 0.5, %v1932_v51 }
 0x459   : > { %1988 = vrot.lane.b32.xlu1 %v10459_v17, %s10219_s27  ;;  %v9691_v52 = vpop.f32.mrf.mxu0 }
 0x45a   : > { %v1943_v2 = vadd.f32 %v10517_v46, %v1939_v60 }
 0x45c   : > { %v1953_v3 = vsel %vm1275_vm4, %v1943_v2, -inf }
 0x45d   : > { %2140 = vrot.lane.b32.xlu1 %v10464_v21, %s10219_s27 }
 0x45f   : > { %v10589_v53 = vpop.f32.mrf.mxu1 }
 0x461   : > { %v9666_v54 = vpop.f32.mrf.mxu1  ;;  %2216 = vrot.lane.b32.xlu1 %v10466_v22, %s10219_s27 }
 0x463   : > { %v1698_v55 = vpop.f32.mrf.mxu1 }
 0x464   : > { %v1936_v56 = vmul.f32 0.5, %v1698_v55 }
 0x465   : > { %2372 = vrot.lane.b32.xlu1 %v10462_v20, %s10220_s0  ;;  %v9676_v57 = vpop.f32.mrf.mxu1 }
 0x466   : > { %v1940_v58 = vadd.f32 %v10498_v28, %v1936_v56 }
 0x467   : > { %v1854_v59 = vpop.f32.mrf.mxu1 }
 0x468   : > { %v1938_v61 = vmul.f32 0.5, %v1854_v59  ;;  %v1944_v62 = vsel %vm1275_vm4, %v1940_v58, -inf }
 0x469   : > { %2370 = vrot.lane.b32.xlu1 %v10462_v20, %s10221_s20  ;;  %1945 = vmax.xlane.f32.xlu0 %v1944_v62  ;;  %v9686_v63 = vpop.f32.mrf.mxu1 }
 0x46a   : > { %v1942_v0 = vadd.f32 %v10511_v40, %v1938_v61 }
 0x46c   : > { %v1950_v1 = vsel %vm1275_vm4, %v1942_v0, -inf }
 0x46d   : > { %1951 = vmax.xlane.f32.xlu0 %v1950_v1 }
 0x471   : > { %1954 = vmax.xlane.f32.xlu0 %v1953_v3 }
 0x487   : > { %2064 = vrot.lane.b32.xlu0 %v10462_v20, %s10219_s27  ;;  %s10233_s27 = smov 104  }
 0x48b   : > { %2294 = vrot.lane.b32.xlu0 %v10459_v17, %s10220_s0 }
 0x48f   : > { %2292 = vrot.lane.b32.xlu0 %v10459_v17, %s10221_s20 }
 0x4d1   : > { %v1949_v4 = vpop.xlane.xlu1 %1948 }
 0x4d2   : > { %v1957_v5 = vsub.f32 %v1941_v49, %v1949_v4 }
 0x4d4   : > { %v1962_v6 = vmul.f32 1.442695, %v1957_v5 }
 0x4d5   : > { %v1989_v7 = vpop.permute.xlu1 %1988 }
 0x4d6   : > { %10052 = vpow2.f32 %v1962_v6  ;;  %9693 = vmatpush3.msra.mxu1 %v1989_v7 }
 0x4d7   : > { %9702 = vmatprep.subr.mxu1 %v10213_v13 }
 0x4d9   : > { %v2141_v36 = vpop.permute.xlu1 %2140 }
 0x4dd   : > { %v2217_v42 = vpop.permute.xlu1 %2216 }
 0x4e1   : > { %v2373_v44 = vpop.permute.xlu1 %2372 }
 0x4e3   : > { %v10053_v8 = vpop.eup %10052 }
 0x4e4   : > { %v1971_v9 = vsel %vm1275_vm4, %v10053_v8, 0.0 }
 0x4e5   : > { %1972 = vadd.xlane.f32.xlu0 %v1971_v9  ;;  %v2371_v45 = vpop.permute.xlu1 %2370 }
 0x4f2   : > { %v1946_v10 = vpop.xlane.xlu0 %1945 }
 0x4f3   : > { %v1956_v11 = vsub.f32 %v1940_v58, %v1946_v10 }
 0x4f5   : > { %v1960_v12 = vmul.f32 1.442695, %v1956_v11 }
 0x4f6   : > { %v1952_v14 = vpop.xlane.xlu0 %1951 }
 0x4f7   : > { %10054 = vpow2.f32 %v1960_v12  ;;  %v1958_v15 = vsub.f32 %v1942_v0, %v1952_v14 }
 0x4f9   : > { %v1964_v16 = vmul.f32 1.442695, %v1958_v15 }
 0x4fa   : > { %v1955_v18 = vpop.xlane.xlu0 %1954 }
 0x4fb   : > { %10056 = vpow2.f32 %v1964_v16  ;;  %v1959_v19 = vsub.f32 %v1943_v2, %v1955_v18 }
 0x4fd   : > { %v1966_v23 = vmul.f32 1.442695, %v1959_v19 }
 0x4fe   : > { %v2065_v24 = vpop.permute.xlu0 %2064 }
 0x4ff   : > { %10058 = vpow2.f32 %v1966_v23  ;;  %9698 = vmatpush3.msra.mxu0 %v2065_v24 }
 0x500   : > { %9707 = vmatprep.subr.mxu0 %v10213_v13 }
 0x502   : > { %v2295_v32 = vpop.permute.xlu0 %2294 }
 0x504   : > { %v10055_v25 = vpop.eup %10054 }
 0x505   : > { %v1968_v26 = vsel %vm1275_vm4, %v10055_v25, 0.0 }
 0x506   : > { %1969 = vadd.xlane.f32.xlu1 %v1968_v26  ;;  %v2293_v34 = vpop.permute.xlu0 %2292 }
 0x508   : > { %v10057_v27 = vpop.eup %10056 }
 0x509   : > { %v1974_v29 = vsel %vm1275_vm4, %v10057_v27, 0.0 }
 0x50a   : > { %1975 = vadd.xlane.f32.xlu1 %v1974_v29 }
 0x50c   : > { %v10059_v30 = vpop.eup %10058 }
 0x50d   : > { %v1977_v31 = vsel %vm1275_vm4, %v10059_v30, 0.0 }
 0x50e   : > { %1978 = vadd.xlane.f32.xlu0 %v1977_v31 }
 0x51b   : > { %2528 = vrot.lane.b32.xlu1 %v10466_v22, %s10220_s0 }
 0x51f   : > { %2526 = vrot.lane.b32.xlu1 %v10466_v22, %s10221_s20 }
 0x524   : > { %2450 = vrot.lane.b32.xlu0 %v10464_v21, %s10220_s0  ;;  %s10234_s0 = smov 40  }
 0x528   : > { %2448 = vrot.lane.b32.xlu0 %v10464_v21, %s10221_s20  ;;  %s10235_s20 = smov 68  }
 0x56e   : > { %v1973_v35 = vpop.xlane.xlu0 %1972 }
 0x56f   : > { %10060 = vrcp.f32 %v1973_v35 }
 0x57c   : > { %v10061_v37 = vpop.eup %10060 }
 0x57d   : > { %v1985_v39 = vmul.f32 %v10061_v37, %v10053_v8 }
 0x57f   : > { %9700 = vmatmul.mubr.msk.f32.vlgmr.msra.gmra.mxu0 %vm1275_vm4, %v1985_v39 }
 0x580   : > { %9708 = vmatpush3.msra.mxu0 %v2217_v42  ;;  %9709 = vmatprep.mubr.msk.f32.mxu0 %vm10214_vm2, %v10213_v13 }
 0x581   : > { %9717 = vmatprep.subr.mxu0 %v10213_v13 }
 0x58f   : > { %v1970_v47 = vpop.xlane.xlu1 %1969 }
 0x590   : > { %10062 = vrcp.f32 %v1970_v47 }
 0x593   : > { %v1976_v48 = vpop.xlane.xlu1 %1975 }
 0x594   : > { %10064 = vrcp.f32 %v1976_v48 }
 0x597   : > { %v1979_v49 = vpop.xlane.xlu0 %1978  ;;  %v2529_v58 = vpop.permute.xlu1 %2528 }
 0x598   : > { %10066 = vrcp.f32 %v1979_v49 }
 0x59b   : > { %v2451_v56 = vpop.permute.xlu0 %2450  ;;  %v2527_v60 = vpop.permute.xlu1 %2526 }
 0x59d   : > { %v10063_v50 = vpop.eup %10062 }
 0x59e   : > { %v1984_v51 = vmul.f32 %v10063_v50, %v10055_v25 }
 0x59f   : > { %v2449_v59 = vpop.permute.xlu0 %2448 }
 0x5a0   : > { %9695 = vmatmul.mubr.msk.f32.vlgmr.msra.gmra.mxu1 %vm1275_vm4, %v1984_v51 }
 0x5a1   : > { %v10065_v52 = vpop.eup %10064  ;;  %9703 = vmatpush3.msra.mxu1 %v2141_v36  ;;  %9704 = vmatprep.mubr.msk.f32.mxu1 %vm10214_vm2, %v10213_v13 }
 0x5a2   : > { %9712 = vmatprep.subr.mxu1 %v10213_v13  ;;  %v1986_v54 = vmul.f32 %v10065_v52, %v10057_v27 }
 0x5a4   : > { %9705 = vmatmul.mubr.msk.f32.vlgmr.msra.gmra.mxu1 %vm1275_vm4, %v1986_v54 }
 0x5a5   : > { %v10067_v55 = vpop.eup %10066  ;;  %9713 = vmatpush3.xpose.msk.msra.mxu1 %vm937_vm3, %v2295_v32  ;;  %9714 = vmatprep.mubr.msk.f32.mxu1 %vm10214_vm2, %v10213_v13 }
 0x5a6   : > { %9722 = vmatprep.subr.mxu1 %v10213_v13  ;;  %v1987_v57 = vmul.f32 %v10067_v55, %v10059_v30 }
 0x5a8   : > { %9710 = vmatmul.mubr.msk.f32.vlgmr.msra.gmra.mxu0 %vm1275_vm4, %v1987_v57  ;;  %9715 = vmatmul.mubr.msk.f32.vlgmr.msra.gmra.mxu1 %vm937_vm3, %v2293_v34 }
 0x5a9   : > { %9718 = vmatpush3.xpose.msk.msra.mxu0 %vm937_vm3, %v2373_v44  ;;  %9723 = vmatpush3.xpose.msk.msra.mxu1 %vm937_vm3, %v2451_v56 }
 0x5aa   : > { %9719 = vmatprep.mubr.msk.f32.mxu0 %vm10214_vm2, %v10213_v13  ;;  %9724 = vmatprep.mubr.msk.f32.mxu1 %vm10214_vm2, %v10213_v13 }
 0x5ab   : > { %9727 = vmatprep.subr.mxu0 %v10213_v13  ;;  %9732 = vmatprep.subr.mxu1 %v10213_v13 }
 0x5ac   : > { %9720 = vmatmul.mubr.msk.f32.vlgmr.msra.gmra.mxu0 %vm937_vm3, %v2371_v45  ;;  %9725 = vmatmul.mubr.msk.f32.vlgmr.msra.gmra.mxu1 %vm937_vm3, %v2449_v59 }
 0x5ad   : > { %9728 = vmatpush3.xpose.msk.msra.mxu0 %vm937_vm3, %v2529_v58  ;;  %9729 = vmatprep.mubr.msk.f32.mxu0 %vm10214_vm2, %v10213_v13 }
 0x5ae   : > { %9737 = vmatprep.subr.mxu0 %v10213_v13  ;;  %9734 = vmatprep.mubr.msk.f32.mxu1 %vm10214_vm2, %v10213_v13 }
 0x5b0   : > { %9730 = vmatmul.mubr.msk.f32.vlgmr.msra.gmra.mxu0 %vm937_vm3, %v2527_v60 }
 0x5b1   : > { %9739 = vmatprep.mubr.msk.f32.mxu0 %vm10214_vm2, %v10213_v13 }
 0x63f   : > { %v10655_v61 = vpop.f32.mrf.mxu0 }
 0x641   : > { %v9701_v62 = vpop.f32.mrf.mxu0 }
 0x660   : > { %v10657_v63 = vpop.f32.mrf.mxu1 }
 0x662   : > { %v9696_v0 = vpop.f32.mrf.mxu1 }
 0x664   : > { %v10659_v1 = vpop.f32.mrf.mxu1 }
 0x666   : > { %v9706_v2 = vpop.f32.mrf.mxu1 }
 0x668   : > { %v10661_v3 = vpop.f32.mrf.mxu0  ;;  %v2366_v4 = vpop.f32.mrf.mxu1 }
 0x669   : > { %v2604_v5 = vmul.f32 0.5, %v2366_v4 }
 0x66a   : > { %v9711_v6 = vpop.f32.mrf.mxu0  ;;  %v9716_v7 = vpop.f32.mrf.mxu1 }
 0x66b   : > { %v2608_v8 = vadd.f32 %v10498_v28, %v2604_v5 }
 0x66c   : > { %v2444_v9 = vpop.f32.mrf.mxu0  ;;  %v2522_v10 = vpop.f32.mrf.mxu1 }
 0x66d   : > { %v2605_v11 = vmul.f32 0.5, %v2444_v9  ;;  %v2606_v12 = vmul.f32 0.5, %v2522_v10  ;;  %v2612_v14 = vsel %vm1275_vm4, %v2608_v8, -inf }
 0x66e   : > { %2613 = vmax.xlane.f32.xlu0 %v2612_v14  ;;  %v9721_v15 = vpop.f32.mrf.mxu0  ;;  %v9726_v16 = vpop.f32.mrf.mxu1 }
 0x66f   : > { %v2609_v18 = vadd.f32 %v10504_v33, %v2605_v11  ;;  %v2610_v19 = vadd.f32 %v10511_v40, %v2606_v12 }
 0x670   : > { %v2600_v23 = vpop.f32.mrf.mxu0 }
 0x671   : > { %v2607_v24 = vmul.f32 0.5, %v2600_v23  ;;  %v2615_v25 = vsel %vm1275_vm4, %v2609_v18, -inf  ;;  %v2618_v26 = vsel %vm1275_vm4, %v2610_v19, -inf }
 0x672   : > { %2616 = vmax.xlane.f32.xlu1 %v2615_v25  ;;  %v9731_v27 = vpop.f32.mrf.mxu0  ;;  %2619 = vmax.xlane.f32.xlu0 %v2618_v26 }
 0x673   : > { %v2611_v29 = vadd.f32 %v10517_v46, %v2607_v24 }
 0x675   : > { %v2621_v30 = vsel %vm1275_vm4, %v2611_v29, -inf }
 0x676   : > { %2622 = vmax.xlane.f32.xlu0 %v2621_v30 }
 0x683   : > { %2656 = vrot.lane.b32.xlu1 %v10459_v17, %s10222_s21 }
 0x687   : > { %2808 = vrot.lane.b32.xlu1 %v10464_v21, %s10222_s21 }
 0x68b   : > { %2884 = vrot.lane.b32.xlu1 %v10466_v22, %s10222_s21 }
 0x68c   : > { %2732 = vrot.lane.b32.xlu0 %v10462_v20, %s10222_s21  ;;  %s10236_s21 = smov 100  }
 0x68f   : > { %3040 = vrot.lane.b32.xlu1 %v10462_v20, %s10223_s4 }
 0x690   : > { %2962 = vrot.lane.b32.xlu0 %v10459_v17, %s10223_s4 }
 0x693   : > { %3038 = vrot.lane.b32.xlu1 %v10462_v20, %s10224_s15 }
 0x694   : > { %2960 = vrot.lane.b32.xlu0 %v10459_v17, %s10224_s15 }
 0x6f7   : > { %v2614_v31 = vpop.xlane.xlu0 %2613 }
 0x6f8   : > { %v2624_v32 = vsub.f32 %v2608_v8, %v2614_v31 }
 0x6fa   : > { %v2628_v34 = vmul.f32 1.442695, %v2624_v32 }
 0x6fb   : > { %v2617_v35 = vpop.xlane.xlu1 %2616  ;;  %v2620_v36 = vpop.xlane.xlu0 %2619 }
 0x6fc   : > { %10068 = vpow2.f32 %v2628_v34  ;;  %v2625_v37 = vsub.f32 %v2609_v18, %v2617_v35  ;;  %v2626_v39 = vsub.f32 %v2610_v19, %v2620_v36 }
 0x6fe   : > { %v2630_v42 = vmul.f32 1.442695, %v2625_v37  ;;  %v2632_v44 = vmul.f32 1.442695, %v2626_v39 }
 0x6ff   : > { %v2657_v45 = vpop.permute.xlu1 %2656  ;;  %v2623_v47 = vpop.xlane.xlu0 %2622 }
 0x700   : > { %10070 = vpow2.f32 %v2630_v42  ;;  %v2627_v48 = vsub.f32 %v2611_v29, %v2623_v47  ;;  %9733 = vmatpush3.msra.mxu1 %v2657_v45 }
 0x701   : > { %10072 = vpow2.f32 %v2632_v44  ;;  %9742 = vmatprep.subr.mxu1 %v10213_v13 }
 0x702   : > { %v2634_v49 = vmul.f32 1.442695, %v2627_v48 }
 0x703   : > { %v2733_v50 = vpop.permute.xlu0 %2732  ;;  %v2809_v60 = vpop.permute.xlu1 %2808 }
 0x704   : > { %10074 = vpow2.f32 %v2634_v49  ;;  %9738 = vmatpush3.msra.mxu0 %v2733_v50 }
 0x705   : > { %9747 = vmatprep.subr.mxu0 %v10213_v13 }
 0x707   : > { %v2885_v62 = vpop.permute.xlu1 %2884  ;;  %v2963_v2 = vpop.permute.xlu0 %2962 }
 0x709   : > { %v10069_v51 = vpop.eup %10068 }
 0x70a   : > { %v2636_v52 = vsel %vm1275_vm4, %v10069_v51, 0.0 }
 0x70b   : > { %2637 = vadd.xlane.f32.xlu1 %v2636_v52  ;;  %v3041_v0 = vpop.permute.xlu1 %3040  ;;  %v2961_v5 = vpop.permute.xlu0 %2960 }
 0x70d   : > { %v10071_v54 = vpop.eup %10070 }
 0x70e   : > { %v10073_v55 = vpop.eup %10072  ;;  %v2639_v56 = vsel %vm1275_vm4, %v10071_v54, 0.0 }
 0x70f   : > { %2640 = vadd.xlane.f32.xlu0 %v2639_v56  ;;  %v2642_v57 = vsel %vm1275_vm4, %v10073_v55, 0.0  ;;  %v3039_v4 = vpop.permute.xlu1 %3038 }
 0x710   : > { %2643 = vadd.xlane.f32.xlu1 %v2642_v57 }
 0x711   : > { %v10075_v58 = vpop.eup %10074 }
 0x712   : > { %v2645_v59 = vsel %vm1275_vm4, %v10075_v58, 0.0 }
 0x713   : > { %2646 = vadd.xlane.f32.xlu0 %v2645_v59 }
 0x721   : > { %3196 = vrot.lane.b32.xlu1 %v10466_v22, %s10223_s4 }
 0x725   : > { %3194 = vrot.lane.b32.xlu1 %v10466_v22, %s10224_s15 }
 0x729   : > { %3118 = vrot.lane.b32.xlu0 %v10464_v21, %s10223_s4  ;;  %s10237_s4 = smov 36  }
 0x72d   : > { %3116 = vrot.lane.b32.xlu0 %v10464_v21, %s10224_s15  ;;  %s10238_s15 = smov 4  }
 0x794   : > { %v2638_v6 = vpop.xlane.xlu1 %2637 }
 0x795   : > { %10076 = vrcp.f32 %v2638_v6 }
 0x798   : > { %v2641_v7 = vpop.xlane.xlu0 %2640 }
 0x799   : > { %v2644_v8 = vpop.xlane.xlu1 %2643  ;;  %10078 = vrcp.f32 %v2641_v7 }
 0x79a   : > { %10080 = vrcp.f32 %v2644_v8 }
 0x79c   : > { %v2647_v9 = vpop.xlane.xlu0 %2646 }
 0x79d   : > { %10082 = vrcp.f32 %v2647_v9  ;;  %v3197_v24 = vpop.permute.xlu1 %3196 }
 0x7a0   : > { %v3119_v19 = vpop.permute.xlu0 %3118 }
 0x7a1   : > { %v3195_v26 = vpop.permute.xlu1 %3194 }
 0x7a2   : > { %v10077_v10 = vpop.eup %10076 }
 0x7a3   : > { %v2652_v11 = vmul.f32 %v10077_v10, %v10069_v51 }
 0x7a4   : > { %v3117_v25 = vpop.permute.xlu0 %3116 }
 0x7a5   : > { %9735 = vmatmul.mubr.msk.f32.vlgmr.msra.gmra.mxu1 %vm1275_vm4, %v2652_v11 }
 0x7a6   : > { %v10079_v12 = vpop.eup %10078  ;;  %9743 = vmatpush3.msra.mxu1 %v2809_v60  ;;  %9744 = vmatprep.mubr.msk.f32.mxu1 %vm10214_vm2, %v10213_v13 }
 0x7a7   : > { %v10081_v14 = vpop.eup %10080  ;;  %9752 = vmatprep.subr.mxu1 %v10213_v13  ;;  %v2653_v15 = vmul.f32 %v10079_v12, %v10071_v54 }
 0x7a8   : > { %v2654_v16 = vmul.f32 %v10081_v14, %v10073_v55 }
 0x7a9   : > { %9740 = vmatmul.mubr.msk.f32.vlgmr.msra.gmra.mxu0 %vm1275_vm4, %v2653_v15 }
 0x7aa   : > { %v10083_v18 = vpop.eup %10082  ;;  %9745 = vmatmul.mubr.msk.f32.vlgmr.msra.gmra.mxu1 %vm1275_vm4, %v2654_v16  ;;  %9748 = vmatpush3.msra.mxu0 %v2885_v62 }
 0x7ab   : > { %9753 = vmatpush3.xpose.msk.msra.mxu1 %vm937_vm3, %v2963_v2  ;;  %9749 = vmatprep.mubr.msk.f32.mxu0 %vm10214_vm2, %v10213_v13  ;;  %v2655_v23 = vmul.f32 %v10083_v18, %v10075_v58 }
 0x7ac   : > { %9754 = vmatprep.mubr.msk.f32.mxu1 %vm10214_vm2, %v10213_v13  ;;  %9757 = vmatprep.subr.mxu0 %v10213_v13 }
 0x7ad   : > { %9762 = vmatprep.subr.mxu1 %v10213_v13  ;;  %9750 = vmatmul.mubr.msk.f32.vlgmr.msra.gmra.mxu0 %vm1275_vm4, %v2655_v23 }
 0x7ae   : > { %9755 = vmatmul.mubr.msk.f32.vlgmr.msra.gmra.mxu1 %vm937_vm3, %v2961_v5  ;;  %9758 = vmatpush3.xpose.msk.msra.mxu0 %vm937_vm3, %v3041_v0 }
 0x7af   : > { %9763 = vmatpush3.xpose.msk.msra.mxu1 %vm937_vm3, %v3119_v19  ;;  %9759 = vmatprep.mubr.msk.f32.mxu0 %vm10214_vm2, %v10213_v13 }
 0x7b0   : > { %9764 = vmatprep.mubr.msk.f32.mxu1 %vm10214_vm2, %v10213_v13  ;;  %9767 = vmatprep.subr.mxu0 %v10213_v13 }
 0x7b1   : > { %9760 = vmatmul.mubr.msk.f32.vlgmr.msra.gmra.mxu0 %vm937_vm3, %v3039_v4  ;;  %9772 = vmatprep.subr.mxu1 %v10213_v13 }
 0x7b2   : > { %9765 = vmatmul.mubr.msk.f32.vlgmr.msra.gmra.mxu1 %vm937_vm3, %v3117_v25  ;;  %9768 = vmatpush3.xpose.msk.msra.mxu0 %vm937_vm3, %v3197_v24 }
 0x7b3   : > { %9769 = vmatprep.mubr.msk.f32.mxu0 %vm10214_vm2, %v10213_v13  ;;  %9777 = vmatprep.subr.mxu0 %v10213_v13 }
 0x7b4   : > { %9774 = vmatprep.mubr.msk.f32.mxu1 %vm10214_vm2, %v10213_v13 }
 0x7b5   : > { %9770 = vmatmul.mubr.msk.f32.vlgmr.msra.gmra.mxu0 %vm937_vm3, %v3195_v26 }
 0x7b6   : > { %9779 = vmatprep.mubr.msk.f32.mxu0 %vm10214_vm2, %v10213_v13 }
 0x865   : > { %v10731_v27 = vpop.f32.mrf.mxu1 }
 0x867   : > { %v9736_v29 = vpop.f32.mrf.mxu1 }
 0x869   : > { %v10733_v30 = vpop.f32.mrf.mxu0 }
 0x86a   : > { %v10735_v31 = vpop.f32.mrf.mxu1 }
 0x86b   : > { %v9741_v32 = vpop.f32.mrf.mxu0 }
 0x86c   : > { %v9746_v34 = vpop.f32.mrf.mxu1 }
 0x86d   : > { %v10737_v35 = vpop.f32.mrf.mxu0 }
 0x86e   : > { %v3034_v36 = vpop.f32.mrf.mxu1 }
 0x86f   : > { %v3272_v37 = vmul.f32 0.5, %v3034_v36  ;;  %v9751_v39 = vpop.f32.mrf.mxu0 }
 0x870   : > { %v9756_v42 = vpop.f32.mrf.mxu1 }
 0x871   : > { %v3112_v44 = vpop.f32.mrf.mxu0  ;;  %v3276_v45 = vadd.f32 %v10498_v28, %v3272_v37 }
 0x872   : > { %v3273_v47 = vmul.f32 0.5, %v3112_v44  ;;  %v3190_v48 = vpop.f32.mrf.mxu1 }
 0x873   : > { %v3274_v49 = vmul.f32 0.5, %v3190_v48  ;;  %v3280_v50 = vsel %vm1275_vm4, %v3276_v45, -inf  ;;  %v9761_v51 = vpop.f32.mrf.mxu0 }
 0x874   : > { %3281 = vmax.xlane.f32.xlu0 %v3280_v50  ;;  %v9766_v52 = vpop.f32.mrf.mxu1  ;;  %v3277_v54 = vadd.f32 %v10504_v33, %v3273_v47 }
 0x875   : > { %v3268_v55 = vpop.f32.mrf.mxu0  ;;  %v3278_v56 = vadd.f32 %v10511_v40, %v3274_v49 }
 0x876   : > { %v3275_v57 = vmul.f32 0.5, %v3268_v55  ;;  %v3283_v58 = vsel %vm1275_vm4, %v3277_v54, -inf }
 0x877   : > { %3284 = vmax.xlane.f32.xlu1 %v3283_v58  ;;  %v9771_v59 = vpop.f32.mrf.mxu0  ;;  %v3286_v28 = vsel %vm1275_vm4, %v3278_v56, -inf }
 0x878   : > { %3287 = vmax.xlane.f32.xlu0 %v3286_v28  ;;  %v3279_v60 = vadd.f32 %v10517_v46, %v3275_v57 }
 0x87a   : > { %v3289_v62 = vsel %vm1275_vm4, %v3279_v60, -inf }
 0x87c   : > { %3290 = vmax.xlane.f32.xlu0 %v3289_v62 }
 0x888   : > { %3324 = vrot.lane.b32.xlu1 %v10459_v17, %s10225_s8 }
 0x88c   : > { %3476 = vrot.lane.b32.xlu1 %v10464_v21, %s10225_s8 }
 0x890   : > { %3552 = vrot.lane.b32.xlu1 %v10466_v22, %s10225_s8 }
 0x892   : > { %3400 = vrot.lane.b32.xlu0 %v10462_v20, %s10225_s8  ;;  %s10228_s8 = smov 48  }
 0x894   : > { %3708 = vrot.lane.b32.xlu1 %v10462_v20, %s10226_s25 }
 0x896   : > { %3630 = vrot.lane.b32.xlu0 %v10459_v17, %s10226_s25 }
 0x898   : > { %3706 = vrot.lane.b32.xlu1 %v10462_v20, %s10227_s23 }
 0x89a   : > { %3628 = vrot.lane.b32.xlu0 %v10459_v17, %s10227_s23 }
 0x8fd   : > { %v3282_v33 = vpop.xlane.xlu0 %3281 }
 0x8fe   : > { %v3292_v40 = vsub.f32 %v3276_v45, %v3282_v33 }
 0x900   : > { %v3296_v46 = vmul.f32 1.442695, %v3292_v40  ;;  %v3285_v0 = vpop.xlane.xlu1 %3284 }
 0x901   : > { %v3293_v2 = vsub.f32 %v3277_v54, %v3285_v0  ;;  %v3288_v4 = vpop.xlane.xlu0 %3287 }
 0x902   : > { %10084 = vpow2.f32 %v3296_v46  ;;  %v3294_v5 = vsub.f32 %v3278_v56, %v3288_v4 }
 0x903   : > { %v3298_v6 = vmul.f32 1.442695, %v3293_v2 }
 0x904   : > { %v3300_v7 = vmul.f32 1.442695, %v3294_v5  ;;  %v3325_v8 = vpop.permute.xlu1 %3324 }
 0x905   : > { %10086 = vpow2.f32 %v3298_v6  ;;  %v3291_v9 = vpop.xlane.xlu0 %3290  ;;  %9773 = vmatpush3.msra.mxu1 %v3325_v8 }
 0x906   : > { %10088 = vpow2.f32 %v3300_v7  ;;  %v3295_v10 = vsub.f32 %v3279_v60, %v3291_v9  ;;  %9782 = vmatprep.subr.mxu1 %v10213_v13  ;;  %v10818_v7 = vld [vmem:[%s11964_s17] ss:$0 sm:$0xff] }
 0x908   : > { %v3302_v11 = vmul.f32 1.442695, %v3295_v10  ;;  %v3477_v26 = vpop.permute.xlu1 %3476 }
 0x909   : > { %v3401_v12 = vpop.permute.xlu0 %3400 }
 0x90a   : > { %10090 = vpow2.f32 %v3302_v11  ;;  %9778 = vmatpush3.msra.mxu0 %v3401_v12 }
 0x90b   : > { %9787 = vmatprep.subr.mxu0 %v10213_v13 }
 0x90c   : > { %v3553_v29 = vpop.permute.xlu1 %3552 }
 0x90d   : > { %v3631_v34 = vpop.permute.xlu0 %3630 }
 0x90f   : > { %v10085_v14 = vpop.eup %10084 }
 0x910   : > { %v3304_v15 = vsel %vm1275_vm4, %v10085_v14, 0.0  ;;  %v3709_v32 = vpop.permute.xlu1 %3708 }
 0x911   : > { %3305 = vadd.xlane.f32.xlu1 %v3304_v15  ;;  %v3629_v37 = vpop.permute.xlu0 %3628 }
 0x912   : > { %v10087_v16 = vpop.eup %10086 }
 0x913   : > { %v10089_v18 = vpop.eup %10088  ;;  %v3307_v19 = vsel %vm1275_vm4, %v10087_v16, 0.0 }
 0x914   : > { %3308 = vadd.xlane.f32.xlu0 %v3307_v19  ;;  %v3310_v23 = vsel %vm1275_vm4, %v10089_v18, 0.0  ;;  %v3707_v36 = vpop.permute.xlu1 %3706 }
 0x915   : > { %3311 = vadd.xlane.f32.xlu1 %v3310_v23  ;;  %v10831_v23 = vld [vmem:[%s11964_s17 + $0x2] ss:$0 sm:$0xff] }
 0x917   : > { %v10091_v24 = vpop.eup %10090 }
 0x918   : > { %v3313_v25 = vsel %vm1275_vm4, %v10091_v24, 0.0 }
 0x919   : > { %3314 = vadd.xlane.f32.xlu0 %v3313_v25 }
 0x926   : > { %3864 = vrot.lane.b32.xlu1 %v10466_v22, %s10226_s25 }
 0x92a   : > { %3862 = vrot.lane.b32.xlu1 %v10466_v22, %s10227_s23 }
 0x92f   : > { %3786 = vrot.lane.b32.xlu0 %v10464_v21, %s10226_s25  ;;  %s10229_s25 = smov 76  }
 0x933   : > { %3784 = vrot.lane.b32.xlu0 %v10464_v21, %s10227_s23  ;;  %s10230_s23 = smov 108  }
 0x99a   : > { %v3306_v39 = vpop.xlane.xlu1 %3305 }
 0x99b   : > { %10092 = vrcp.f32 %v3306_v39 }
 0x99d   : > { %v3309_v42 = vpop.xlane.xlu0 %3308 }
 0x99e   : > { %v3312_v44 = vpop.xlane.xlu1 %3311  ;;  %10094 = vrcp.f32 %v3309_v42 }
 0x99f   : > { %10096 = vrcp.f32 %v3312_v44 }
 0x9a2   : > { %v3315_v45 = vpop.xlane.xlu0 %3314  ;;  %v3865_v57 = vpop.permute.xlu1 %3864 }
 0x9a3   : > { %10098 = vrcp.f32 %v3315_v45 }
 0x9a6   : > { %v3787_v55 = vpop.permute.xlu0 %3786  ;;  %v3863_v59 = vpop.permute.xlu1 %3862 }
 0x9a8   : > { %v10093_v47 = vpop.eup %10092 }
 0x9a9   : > { %v3320_v48 = vmul.f32 %v10093_v47, %v10085_v14 }
 0x9aa   : > { %v3785_v58 = vpop.permute.xlu0 %3784 }
 0x9ab   : > { %v10095_v49 = vpop.eup %10094  ;;  %9775 = vmatmul.mubr.msk.f32.vlgmr.msra.gmra.mxu1 %vm1275_vm4, %v3320_v48 }
 0x9ac   : > { %v10097_v50 = vpop.eup %10096  ;;  %9783 = vmatpush3.msra.mxu1 %v3477_v26  ;;  %9784 = vmatprep.mubr.msk.f32.mxu1 %vm10214_vm2, %v10213_v13  ;;  %v3321_v51 = vmul.f32 %v10095_v49, %v10087_v16 }
 0x9ad   : > { %9792 = vmatprep.subr.mxu1 %v10213_v13  ;;  %v3322_v52 = vmul.f32 %v10097_v50, %v10089_v18  ;;  %v10825_v18 = vld [vmem:[%s11964_s17 + $0x1] ss:$0 sm:$0xff] }
 0x9ae   : > { %9780 = vmatmul.mubr.msk.f32.vlgmr.msra.gmra.mxu0 %vm1275_vm4, %v3321_v51 }
 0x9af   : > { %9785 = vmatmul.mubr.msk.f32.vlgmr.msra.gmra.mxu1 %vm1275_vm4, %v3322_v52  ;;  %9788 = vmatpush3.msra.mxu0 %v3553_v29 }
 0x9b0   : > { %v10099_v54 = vpop.eup %10098  ;;  %9793 = vmatpush3.xpose.msk.msra.mxu1 %vm937_vm3, %v3631_v34  ;;  %9789 = vmatprep.mubr.msk.f32.mxu0 %vm10214_vm2, %v10213_v13 }
 0x9b1   : > { %9794 = vmatprep.mubr.msk.f32.mxu1 %vm10214_vm2, %v10213_v13  ;;  %9797 = vmatprep.subr.mxu0 %v10213_v13  ;;  %v3323_v56 = vmul.f32 %v10099_v54, %v10091_v24 }
 0x9b2   : > { %9802 = vmatprep.subr.mxu1 %v10213_v13 }
 0x9b3   : > { %9790 = vmatmul.mubr.msk.f32.vlgmr.msra.gmra.mxu0 %vm1275_vm4, %v3323_v56  ;;  %9795 = vmatmul.mubr.msk.f32.vlgmr.msra.gmra.mxu1 %vm937_vm3, %v3629_v37 }
 0x9b4   : > { %9798 = vmatpush3.xpose.msk.msra.mxu0 %vm937_vm3, %v3709_v32  ;;  %9803 = vmatpush3.xpose.msk.msra.mxu1 %vm937_vm3, %v3787_v55 }
 0x9b5   : > { %9799 = vmatprep.mubr.msk.f32.mxu0 %vm10214_vm2, %v10213_v13  ;;  %9804 = vmatprep.mubr.msk.f32.mxu1 %vm10214_vm2, %v10213_v13 }
 0x9b6   : > { %9807 = vmatprep.subr.mxu0 %v10213_v13  ;;  %9812 = vmatprep.subr.mxu1 %v10213_v13 }
 0x9b7   : > { %9800 = vmatmul.mubr.msk.f32.vlgmr.msra.gmra.mxu0 %vm937_vm3, %v3707_v36  ;;  %9805 = vmatmul.mubr.msk.f32.vlgmr.msra.gmra.mxu1 %vm937_vm3, %v3785_v58  ;;  %v10839_v36 = vld [vmem:[%s11964_s17 + $0x3] ss:$0 sm:$0xff] }
 0x9b8   : > { %9808 = vmatpush3.xpose.msk.msra.mxu0 %vm937_vm3, %v3865_v57  ;;  %9809 = vmatprep.mubr.msk.f32.mxu0 %vm10214_vm2, %v10213_v13 }
 0x9b9   : > { %9817 = vmatprep.subr.mxu0 %v10213_v13  ;;  %9814 = vmatprep.mubr.msk.f32.mxu1 %vm10214_vm2, %v10213_v13 }
 0x9bb   : > { %9810 = vmatmul.mubr.msk.f32.vlgmr.msra.gmra.mxu0 %vm937_vm3, %v3863_v59 }
 0x9bc   : > { %9819 = vmatprep.mubr.msk.f32.mxu0 %vm10214_vm2, %v10213_v13 }
 0xa6b   : > { %v10807_v28 = vpop.f32.mrf.mxu1 }
 0xa6d   : > { %v9776_v60 = vpop.f32.mrf.mxu1 }
 0xa6e   : > { %v10809_v62 = vpop.f32.mrf.mxu0 }
 0xa6f   : > { %v10811_v33 = vpop.f32.mrf.mxu1 }
 0xa70   : > { %v9781_v40 = vpop.f32.mrf.mxu0 }
 0xa71   : > { %v9786_v46 = vpop.f32.mrf.mxu1 }
 0xa73   : > { %v10813_v0 = vpop.f32.mrf.mxu0  ;;  %v3702_v2 = vpop.f32.mrf.mxu1 }
 0xa74   : > { %v3940_v4 = vmul.f32 0.5, %v3702_v2 }
 0xa75   : > { %v9791_v5 = vpop.f32.mrf.mxu0  ;;  %v9796_v6 = vpop.f32.mrf.mxu1 }
 0xa76   : > { %v3944_v8 = vadd.f32 %v10818_v7, %v3940_v4 }
 0xa77   : > { %v3780_v9 = vpop.f32.mrf.mxu0  ;;  %v3858_v10 = vpop.f32.mrf.mxu1 }
 0xa78   : > { %v3941_v11 = vmul.f32 0.5, %v3780_v9  ;;  %v3942_v12 = vmul.f32 0.5, %v3858_v10  ;;  %v3948_v14 = vsel %vm1275_vm4, %v3944_v8, -inf }
 0xa79   : > { %3949 = vmax.xlane.f32.xlu0 %v3948_v14  ;;  %v9801_v15 = vpop.f32.mrf.mxu0  ;;  %v9806_v16 = vpop.f32.mrf.mxu1 }
 0xa7a   : > { %v3945_v19 = vadd.f32 %v10825_v18, %v3941_v11  ;;  %v3946_v24 = vadd.f32 %v10831_v23, %v3942_v12 }
 0xa7b   : > { %v3936_v25 = vpop.f32.mrf.mxu0 }
 0xa7c   : > { %v3943_v26 = vmul.f32 0.5, %v3936_v25  ;;  %v3951_v29 = vsel %vm1275_vm4, %v3945_v19, -inf  ;;  %v3954_v32 = vsel %vm1275_vm4, %v3946_v24, -inf }
 0xa7d   : > { %3952 = vmax.xlane.f32.xlu1 %v3951_v29  ;;  %v9811_v34 = vpop.f32.mrf.mxu0  ;;  %3955 = vmax.xlane.f32.xlu0 %v3954_v32 }
 0xa7e   : > { %v3947_v37 = vadd.f32 %v10839_v36, %v3943_v26 }
 0xa80   : > { %v3957_v39 = vsel %vm1275_vm4, %v3947_v37, -inf }
 0xa81   : > { %3958 = vmax.xlane.f32.xlu0 %v3957_v39 }
 0xa8e   : > { %3992 = vrot.lane.b32.xlu1 %v10459_v17, %s10228_s8 }
 0xa92   : > { %4144 = vrot.lane.b32.xlu1 %v10464_v21, %s10228_s8 }
 0xa96   : > { %4220 = vrot.lane.b32.xlu1 %v10466_v22, %s10228_s8 }
 0xa97   : > { %4068 = vrot.lane.b32.xlu0 %v10462_v20, %s10228_s8  ;;  %s10239_s8 = smov 8  }
 0xa9a   : > { %4376 = vrot.lane.b32.xlu1 %v10462_v20, %s10229_s25 }
 0xa9b   : > { %4298 = vrot.lane.b32.xlu0 %v10459_v17, %s10229_s25 }
 0xa9e   : > { %4374 = vrot.lane.b32.xlu1 %v10462_v20, %s10230_s23 }
 0xa9f   : > { %4296 = vrot.lane.b32.xlu0 %v10459_v17, %s10230_s23 }
 0xb02   : > { %v3950_v42 = vpop.xlane.xlu0 %3949 }
 0xb03   : > { %v3960_v44 = vsub.f32 %v3944_v8, %v3950_v42 }
 0xb05   : > { %v3964_v45 = vmul.f32 1.442695, %v3960_v44 }
 0xb06   : > { %v3953_v47 = vpop.xlane.xlu1 %3952  ;;  %v3956_v48 = vpop.xlane.xlu0 %3955 }
 0xb07   : > { %10100 = vpow2.f32 %v3964_v45  ;;  %v3961_v49 = vsub.f32 %v3945_v19, %v3953_v47  ;;  %v3962_v50 = vsub.f32 %v3946_v24, %v3956_v48 }
 0xb09   : > { %v3966_v51 = vmul.f32 1.442695, %v3961_v49  ;;  %v3968_v52 = vmul.f32 1.442695, %v3962_v50 }
 0xb0a   : > { %v3993_v54 = vpop.permute.xlu1 %3992  ;;  %v3959_v55 = vpop.xlane.xlu0 %3958 }
 0xb0b   : > { %10102 = vpow2.f32 %v3966_v51  ;;  %v3963_v56 = vsub.f32 %v3947_v37, %v3959_v55  ;;  %9813 = vmatpush3.msra.mxu1 %v3993_v54 }
 0xb0c   : > { %10104 = vpow2.f32 %v3968_v52  ;;  %9822 = vmatprep.subr.mxu1 %v10213_v13 }
 0xb0d   : > { %v3970_v57 = vmul.f32 1.442695, %v3963_v56 }
 0xb0e   : > { %v4069_v58 = vpop.permute.xlu0 %4068  ;;  %v4145_v8 = vpop.permute.xlu1 %4144 }
 0xb0f   : > { %10106 = vpow2.f32 %v3970_v57  ;;  %9818 = vmatpush3.msra.mxu0 %v4069_v58 }
 0xb10   : > { %9827 = vmatprep.subr.mxu0 %v10213_v13 }
 0xb12   : > { %v4221_v9 = vpop.permute.xlu1 %4220  ;;  %v4299_v11 = vpop.permute.xlu0 %4298 }
 0xb14   : > { %v10101_v59 = vpop.eup %10100 }
 0xb15   : > { %v3972_v60 = vsel %vm1275_vm4, %v10101_v59, 0.0 }
 0xb16   : > { %3973 = vadd.xlane.f32.xlu1 %v3972_v60  ;;  %v4377_v10 = vpop.permute.xlu1 %4376  ;;  %v4297_v14 = vpop.permute.xlu0 %4296 }
 0xb18   : > { %v10103_v40 = vpop.eup %10102 }
 0xb19   : > { %v10105_v46 = vpop.eup %10104  ;;  %v3975_v2 = vsel %vm1275_vm4, %v10103_v40, 0.0 }
 0xb1a   : > { %3976 = vadd.xlane.f32.xlu0 %v3975_v2  ;;  %v3978_v4 = vsel %vm1275_vm4, %v10105_v46, 0.0  ;;  %v4375_v12 = vpop.permute.xlu1 %4374 }
 0xb1b   : > { %3979 = vadd.xlane.f32.xlu1 %v3978_v4 }
 0xb1c   : > { %v10107_v5 = vpop.eup %10106 }
 0xb1d   : > { %v3981_v6 = vsel %vm1275_vm4, %v10107_v5, 0.0 }
 0xb1e   : > { %3982 = vadd.xlane.f32.xlu0 %v3981_v6 }
 0xb2c   : > { %4532 = vrot.lane.b32.xlu1 %v10466_v22, %s10229_s25 }
 0xb30   : > { %4530 = vrot.lane.b32.xlu1 %v10466_v22, %s10230_s23 }
 0xb34   : > { %4454 = vrot.lane.b32.xlu0 %v10464_v21, %s10229_s25  ;;  %s10240_s25 = smov 12  }
 0xb38   : > { %4452 = vrot.lane.b32.xlu0 %v10464_v21, %s10230_s23  ;;  %s10241_s23 = smov 16  }
 0xb9f   : > { %v3974_v15 = vpop.xlane.xlu1 %3973 }
 0xba0   : > { %10108 = vrcp.f32 %v3974_v15 }
 0xba3   : > { %v3977_v16 = vpop.xlane.xlu0 %3976 }
 0xba4   : > { %v3980_v19 = vpop.xlane.xlu1 %3979  ;;  %10110 = vrcp.f32 %v3977_v16 }
 0xba5   : > { %10112 = vrcp.f32 %v3980_v19 }
 0xba7   : > { %v3983_v24 = vpop.xlane.xlu0 %3982 }
 0xba8   : > { %10114 = vrcp.f32 %v3983_v24  ;;  %v4533_v45 = vpop.permute.xlu1 %4532 }
 0xbab   : > { %v4455_v42 = vpop.permute.xlu0 %4454 }
 0xbac   : > { %v4531_v48 = vpop.permute.xlu1 %4530 }
 0xbad   : > { %v10109_v25 = vpop.eup %10108 }
 0xbae   : > { %v3988_v26 = vmul.f32 %v10109_v25, %v10101_v59 }
 0xbaf   : > { %v4453_v47 = vpop.permute.xlu0 %4452 }
 0xbb0   : > { %9815 = vmatmul.mubr.msk.f32.vlgmr.msra.gmra.mxu1 %vm1275_vm4, %v3988_v26 }
 0xbb1   : > { %v10111_v29 = vpop.eup %10110  ;;  %9823 = vmatpush3.msra.mxu1 %v4145_v8  ;;  %9824 = vmatprep.mubr.msk.f32.mxu1 %vm10214_vm2, %v10213_v13 }
 0xbb2   : > { %v10113_v32 = vpop.eup %10112  ;;  %9832 = vmatprep.subr.mxu1 %v10213_v13  ;;  %v3989_v34 = vmul.f32 %v10111_v29, %v10103_v40 }
 0xbb3   : > { %v3990_v37 = vmul.f32 %v10113_v32, %v10105_v46 }
 0xbb4   : > { %9820 = vmatmul.mubr.msk.f32.vlgmr.msra.gmra.mxu0 %vm1275_vm4, %v3989_v34 }
 0xbb5   : > { %v10115_v39 = vpop.eup %10114  ;;  %9825 = vmatmul.mubr.msk.f32.vlgmr.msra.gmra.mxu1 %vm1275_vm4, %v3990_v37  ;;  %9828 = vmatpush3.msra.mxu0 %v4221_v9 }
 0xbb6   : > { %9833 = vmatpush3.xpose.msk.msra.mxu1 %vm937_vm3, %v4299_v11  ;;  %9829 = vmatprep.mubr.msk.f32.mxu0 %vm10214_vm2, %v10213_v13  ;;  %v3991_v44 = vmul.f32 %v10115_v39, %v10107_v5 }
 0xbb7   : > { %9834 = vmatprep.mubr.msk.f32.mxu1 %vm10214_vm2, %v10213_v13  ;;  %9837 = vmatprep.subr.mxu0 %v10213_v13 }
 0xbb8   : > { %9842 = vmatprep.subr.mxu1 %v10213_v13  ;;  %9830 = vmatmul.mubr.msk.f32.vlgmr.msra.gmra.mxu0 %vm1275_vm4, %v3991_v44 }
 0xbb9   : > { %9835 = vmatmul.mubr.msk.f32.vlgmr.msra.gmra.mxu1 %vm937_vm3, %v4297_v14  ;;  %9838 = vmatpush3.xpose.msk.msra.mxu0 %vm937_vm3, %v4377_v10 }
 0xbba   : > { %9843 = vmatpush3.xpose.msk.msra.mxu1 %vm937_vm3, %v4455_v42  ;;  %9839 = vmatprep.mubr.msk.f32.mxu0 %vm10214_vm2, %v10213_v13 }
 0xbbb   : > { %9844 = vmatprep.mubr.msk.f32.mxu1 %vm10214_vm2, %v10213_v13  ;;  %9847 = vmatprep.subr.mxu0 %v10213_v13 }
 0xbbc   : > { %9840 = vmatmul.mubr.msk.f32.vlgmr.msra.gmra.mxu0 %vm937_vm3, %v4375_v12  ;;  %9852 = vmatprep.subr.mxu1 %v10213_v13 }
 0xbbd   : > { %9845 = vmatmul.mubr.msk.f32.vlgmr.msra.gmra.mxu1 %vm937_vm3, %v4453_v47  ;;  %9848 = vmatpush3.xpose.msk.msra.mxu0 %vm937_vm3, %v4533_v45 }
 0xbbe   : > { %9849 = vmatprep.mubr.msk.f32.mxu0 %vm10214_vm2, %v10213_v13  ;;  %9857 = vmatprep.subr.mxu0 %v10213_v13 }
 0xbbf   : > { %9854 = vmatprep.mubr.msk.f32.mxu1 %vm10214_vm2, %v10213_v13 }
 0xbc0   : > { %9850 = vmatmul.mubr.msk.f32.vlgmr.msra.gmra.mxu0 %vm937_vm3, %v4531_v48 }
 0xbc1   : > { %9859 = vmatprep.mubr.msk.f32.mxu0 %vm10214_vm2, %v10213_v13 }
 0xc70   : > { %v10903_v49 = vpop.f32.mrf.mxu1 }
 0xc72   : > { %v9816_v50 = vpop.f32.mrf.mxu1 }
 0xc74   : > { %v10905_v51 = vpop.f32.mrf.mxu0 }
 0xc75   : > { %v10907_v52 = vpop.f32.mrf.mxu1 }
 0xc76   : > { %v9821_v54 = vpop.f32.mrf.mxu0 }
 0xc77   : > { %v9826_v55 = vpop.f32.mrf.mxu1 }
 0xc78   : > { %v10909_v56 = vpop.f32.mrf.mxu0 }
 0xc79   : > { %v4370_v57 = vpop.f32.mrf.mxu1 }
 0xc7a   : > { %v4608_v58 = vmul.f32 0.5, %v4370_v57  ;;  %v9831_v59 = vpop.f32.mrf.mxu0 }
 0xc7b   : > { %v9836_v60 = vpop.f32.mrf.mxu1 }
 0xc7c   : > { %v4612_v40 = vadd.f32 %v10818_v7, %v4608_v58  ;;  %v4448_v46 = vpop.f32.mrf.mxu0 }
 0xc7d   : > { %v4609_v2 = vmul.f32 0.5, %v4448_v46  ;;  %v4526_v4 = vpop.f32.mrf.mxu1 }
 0xc7e   : > { %v4610_v5 = vmul.f32 0.5, %v4526_v4  ;;  %v4616_v6 = vsel %vm1275_vm4, %v4612_v40, -inf  ;;  %v9841_v8 = vpop.f32.mrf.mxu0 }
 0xc7f   : > { %v4613_v9 = vadd.f32 %v10825_v18, %v4609_v2  ;;  %4617 = vmax.xlane.f32.xlu0 %v4616_v6  ;;  %v9846_v10 = vpop.f32.mrf.mxu1 }
 0xc80   : > { %v4614_v11 = vadd.f32 %v10831_v23, %v4610_v5  ;;  %v4604_v12 = vpop.f32.mrf.mxu0 }
 0xc81   : > { %v4611_v14 = vmul.f32 0.5, %v4604_v12  ;;  %v4619_v15 = vsel %vm1275_vm4, %v4613_v9, -inf }
 0xc82   : > { %4620 = vmax.xlane.f32.xlu1 %v4619_v15  ;;  %v9851_v16 = vpop.f32.mrf.mxu0  ;;  %v4622_v19 = vsel %vm1275_vm4, %v4614_v11, -inf }
 0xc83   : > { %v4615_v24 = vadd.f32 %v10839_v36, %v4611_v14  ;;  %4623 = vmax.xlane.f32.xlu0 %v4622_v19 }
 0xc85   : > { %v4625_v25 = vsel %vm1275_vm4, %v4615_v24, -inf }
 0xc87   : > { %4626 = vmax.xlane.f32.xlu0 %v4625_v25 }
 0xc93   : > { %4660 = vrot.lane.b32.xlu1 %v10459_v17, %s10231_s24 }
 0xc97   : > { %4812 = vrot.lane.b32.xlu1 %v10464_v21, %s10231_s24 }
 0xc9b   : > { %4888 = vrot.lane.b32.xlu1 %v10466_v22, %s10231_s24 }
 0xc9d   : > { %4736 = vrot.lane.b32.xlu0 %v10462_v20, %s10231_s24  ;;  %s10242_s24 = smov 20  }
 0xc9f   : > { %5044 = vrot.lane.b32.xlu1 %v10462_v20, %s10232_s1 }
 0xca1   : > { %4966 = vrot.lane.b32.xlu0 %v10459_v17, %s10232_s1 }
 0xca3   : > { %5042 = vrot.lane.b32.xlu1 %v10462_v20, %s10233_s27 }
 0xca5   : > { %4964 = vrot.lane.b32.xlu0 %v10459_v17, %s10233_s27 }
 0xd08   : > { %v4618_v26 = vpop.xlane.xlu0 %4617 }
 0xd09   : > { %v4628_v29 = vsub.f32 %v4612_v40, %v4618_v26 }
 0xd0b   : > { %v4632_v32 = vmul.f32 1.442695, %v4628_v29  ;;  %v4621_v34 = vpop.xlane.xlu1 %4620 }
 0xd0c   : > { %v4629_v37 = vsub.f32 %v4613_v9, %v4621_v34  ;;  %v4624_v39 = vpop.xlane.xlu0 %4623 }
 0xd0d   : > { %10116 = vpow2.f32 %v4632_v32  ;;  %v4630_v42 = vsub.f32 %v4614_v11, %v4624_v39 }
 0xd0e   : > { %v4634_v44 = vmul.f32 1.442695, %v4629_v37 }
 0xd0f   : > { %v4636_v45 = vmul.f32 1.442695, %v4630_v42  ;;  %v4661_v47 = vpop.permute.xlu1 %4660 }
 0xd10   : > { %10118 = vpow2.f32 %v4634_v44  ;;  %v4627_v48 = vpop.xlane.xlu0 %4626  ;;  %9853 = vmatpush3.msra.mxu1 %v4661_v47 }
 0xd11   : > { %10120 = vpow2.f32 %v4636_v45  ;;  %v4631_v50 = vsub.f32 %v4615_v24, %v4627_v48  ;;  %9862 = vmatprep.subr.mxu1 %v10213_v13 }
 0xd13   : > { %v4638_v54 = vmul.f32 1.442695, %v4631_v50  ;;  %v4813_v5 = vpop.permute.xlu1 %4812 }
 0xd14   : > { %v4737_v55 = vpop.permute.xlu0 %4736 }
 0xd15   : > { %10122 = vpow2.f32 %v4638_v54  ;;  %9858 = vmatpush3.msra.mxu0 %v4737_v55 }
 0xd16   : > { %9867 = vmatprep.subr.mxu0 %v10213_v13 }
 0xd17   : > { %v4889_v6 = vpop.permute.xlu1 %4888 }
 0xd18   : > { %v4967_v9 = vpop.permute.xlu0 %4966 }
 0xd1a   : > { %v10117_v57 = vpop.eup %10116 }
 0xd1b   : > { %v4640_v58 = vsel %vm1275_vm4, %v10117_v57, 0.0  ;;  %v5045_v8 = vpop.permute.xlu1 %5044 }
 0xd1c   : > { %4641 = vadd.xlane.f32.xlu1 %v4640_v58  ;;  %v4965_v11 = vpop.permute.xlu0 %4964 }
 0xd1d   : > { %v10119_v59 = vpop.eup %10118 }
 0xd1e   : > { %v10121_v60 = vpop.eup %10120  ;;  %v4643_v40 = vsel %vm1275_vm4, %v10119_v59, 0.0 }
 0xd1f   : > { %4644 = vadd.xlane.f32.xlu0 %v4643_v40  ;;  %v4646_v46 = vsel %vm1275_vm4, %v10121_v60, 0.0  ;;  %v5043_v10 = vpop.permute.xlu1 %5042 }
 0xd20   : > { %4647 = vadd.xlane.f32.xlu1 %v4646_v46 }
 0xd22   : > { %v10123_v2 = vpop.eup %10122 }
 0xd23   : > { %v4649_v4 = vsel %vm1275_vm4, %v10123_v2, 0.0 }
 0xd24   : > { %4650 = vadd.xlane.f32.xlu0 %v4649_v4 }
 0xd31   : > { %5200 = vrot.lane.b32.xlu1 %v10466_v22, %s10232_s1 }
 0xd35   : > { %5198 = vrot.lane.b32.xlu1 %v10466_v22, %s10233_s27 }
 0xd3a   : > { %5122 = vrot.lane.b32.xlu0 %v10464_v21, %s10232_s1  ;;  %s10243_s1 = smov 24  }
 0xd3e   : > { %5120 = vrot.lane.b32.xlu0 %v10464_v21, %s10233_s27  ;;  %s10244_s27 = smov 28  }
 0xda5   : > { %v4642_v12 = vpop.xlane.xlu1 %4641 }
 0xda6   : > { %10124 = vrcp.f32 %v4642_v12 }
 0xda8   : > { %v4645_v14 = vpop.xlane.xlu0 %4644 }
 0xda9   : > { %v4648_v15 = vpop.xlane.xlu1 %4647  ;;  %10126 = vrcp.f32 %v4645_v14 }
 0xdaa   : > { %10128 = vrcp.f32 %v4648_v15 }
 0xdad   : > { %v4651_v16 = vpop.xlane.xlu0 %4650  ;;  %v5201_v42 = vpop.permute.xlu1 %5200 }
 0xdae   : > { %10130 = vrcp.f32 %v4651_v16 }
 0xdb1   : > { %v5123_v37 = vpop.permute.xlu0 %5122  ;;  %v5199_v45 = vpop.permute.xlu1 %5198 }
 0xdb3   : > { %v10125_v19 = vpop.eup %10124 }
 0xdb4   : > { %v4656_v24 = vmul.f32 %v10125_v19, %v10117_v57 }
 0xdb5   : > { %v5121_v44 = vpop.permute.xlu0 %5120 }
 0xdb6   : > { %v10127_v25 = vpop.eup %10126  ;;  %9855 = vmatmul.mubr.msk.f32.vlgmr.msra.gmra.mxu1 %vm1275_vm4, %v4656_v24 }
 0xdb7   : > { %v10129_v26 = vpop.eup %10128  ;;  %9863 = vmatpush3.msra.mxu1 %v4813_v5  ;;  %9864 = vmatprep.mubr.msk.f32.mxu1 %vm10214_vm2, %v10213_v13  ;;  %v4657_v29 = vmul.f32 %v10127_v25, %v10119_v59 }
 0xdb8   : > { %9872 = vmatprep.subr.mxu1 %v10213_v13  ;;  %v4658_v32 = vmul.f32 %v10129_v26, %v10121_v60 }
 0xdb9   : > { %9860 = vmatmul.mubr.msk.f32.vlgmr.msra.gmra.mxu0 %vm1275_vm4, %v4657_v29 }
 0xdba   : > { %9865 = vmatmul.mubr.msk.f32.vlgmr.msra.gmra.mxu1 %vm1275_vm4, %v4658_v32  ;;  %9868 = vmatpush3.msra.mxu0 %v4889_v6 }
 0xdbb   : > { %v10131_v34 = vpop.eup %10130  ;;  %9873 = vmatpush3.xpose.msk.msra.mxu1 %vm937_vm3, %v4967_v9  ;;  %9869 = vmatprep.mubr.msk.f32.mxu0 %vm10214_vm2, %v10213_v13 }
 0xdbc   : > { %9874 = vmatprep.mubr.msk.f32.mxu1 %vm10214_vm2, %v10213_v13  ;;  %9877 = vmatprep.subr.mxu0 %v10213_v13  ;;  %v4659_v39 = vmul.f32 %v10131_v34, %v10123_v2 }
 0xdbd   : > { %9882 = vmatprep.subr.mxu1 %v10213_v13 }
 0xdbe   : > { %9870 = vmatmul.mubr.msk.f32.vlgmr.msra.gmra.mxu0 %vm1275_vm4, %v4659_v39  ;;  %9875 = vmatmul.mubr.msk.f32.vlgmr.msra.gmra.mxu1 %vm937_vm3, %v4965_v11 }
 0xdbf   : > { %9878 = vmatpush3.xpose.msk.msra.mxu0 %vm937_vm3, %v5045_v8  ;;  %9883 = vmatpush3.xpose.msk.msra.mxu1 %vm937_vm3, %v5123_v37 }
 0xdc0   : > { %9879 = vmatprep.mubr.msk.f32.mxu0 %vm10214_vm2, %v10213_v13  ;;  %9884 = vmatprep.mubr.msk.f32.mxu1 %vm10214_vm2, %v10213_v13 }
 0xdc1   : > { %9887 = vmatprep.subr.mxu0 %v10213_v13  ;;  %9892 = vmatprep.subr.mxu1 %v10213_v13 }
 0xdc2   : > { %9880 = vmatmul.mubr.msk.f32.vlgmr.msra.gmra.mxu0 %vm937_vm3, %v5043_v10  ;;  %9885 = vmatmul.mubr.msk.f32.vlgmr.msra.gmra.mxu1 %vm937_vm3, %v5121_v44 }
 0xdc3   : > { %9888 = vmatpush3.xpose.msk.msra.mxu0 %vm937_vm3, %v5201_v42  ;;  %9889 = vmatprep.mubr.msk.f32.mxu0 %vm10214_vm2, %v10213_v13 }
 0xdc4   : > { %9897 = vmatprep.subr.mxu0 %v10213_v13  ;;  %9894 = vmatprep.mubr.msk.f32.mxu1 %vm10214_vm2, %v10213_v13 }
 0xdc6   : > { %9890 = vmatmul.mubr.msk.f32.vlgmr.msra.gmra.mxu0 %vm937_vm3, %v5199_v45 }
 0xdc7   : > { %9899 = vmatprep.mubr.msk.f32.mxu0 %vm10214_vm2, %v10213_v13 }
 0xe76   : > { %v10979_v47 = vpop.f32.mrf.mxu1 }
 0xe78   : > { %v9856_v48 = vpop.f32.mrf.mxu1 }
 0xe79   : > { %v10981_v50 = vpop.f32.mrf.mxu0 }
 0xe7a   : > { %v10983_v54 = vpop.f32.mrf.mxu1 }
 0xe7b   : > { %v9861_v55 = vpop.f32.mrf.mxu0 }
 0xe7c   : > { %v9866_v57 = vpop.f32.mrf.mxu1 }
 0xe7e   : > { %v10985_v58 = vpop.f32.mrf.mxu0  ;;  %v5038_v59 = vpop.f32.mrf.mxu1 }
 0xe7f   : > { %v5276_v60 = vmul.f32 0.5, %v5038_v59 }
 0xe80   : > { %v9871_v40 = vpop.f32.mrf.mxu0  ;;  %v9876_v46 = vpop.f32.mrf.mxu1 }
 0xe81   : > { %v5280_v2 = vadd.f32 %v10818_v7, %v5276_v60 }
 0xe82   : > { %v5116_v4 = vpop.f32.mrf.mxu0  ;;  %v5194_v5 = vpop.f32.mrf.mxu1 }
 0xe83   : > { %v5277_v6 = vmul.f32 0.5, %v5116_v4  ;;  %v5278_v8 = vmul.f32 0.5, %v5194_v5  ;;  %v5284_v9 = vsel %vm1275_vm4, %v5280_v2, -inf }
 0xe84   : > { %5285 = vmax.xlane.f32.xlu0 %v5284_v9  ;;  %v9881_v10 = vpop.f32.mrf.mxu0  ;;  %v9886_v11 = vpop.f32.mrf.mxu1 }
 0xe85   : > { %v5281_v12 = vadd.f32 %v10825_v18, %v5277_v6  ;;  %v5282_v14 = vadd.f32 %v10831_v23, %v5278_v8 }
 0xe86   : > { %v5272_v15 = vpop.f32.mrf.mxu0 }
 0xe87   : > { %v5279_v16 = vmul.f32 0.5, %v5272_v15  ;;  %v5287_v19 = vsel %vm1275_vm4, %v5281_v12, -inf  ;;  %v5290_v24 = vsel %vm1275_vm4, %v5282_v14, -inf }
 0xe88   : > { %5288 = vmax.xlane.f32.xlu1 %v5287_v19  ;;  %v9891_v25 = vpop.f32.mrf.mxu0  ;;  %5291 = vmax.xlane.f32.xlu0 %v5290_v24 }
 0xe89   : > { %v5283_v26 = vadd.f32 %v10839_v36, %v5279_v16 }
 0xe8b   : > { %v5293_v29 = vsel %vm1275_vm4, %v5283_v26, -inf }
 0xe8c   : > { %5294 = vmax.xlane.f32.xlu0 %v5293_v29 }
 0xe99   : > { %5328 = vrot.lane.b32.xlu1 %v10459_v17, %s10234_s0 }
 0xe9d   : > { %5480 = vrot.lane.b32.xlu1 %v10464_v21, %s10234_s0 }
 0xea1   : > { %5556 = vrot.lane.b32.xlu1 %v10466_v22, %s10234_s0 }
 0xea2   : > { %5404 = vrot.lane.b32.xlu0 %v10462_v20, %s10234_s0 }
 0xea5   : > { %5712 = vrot.lane.b32.xlu1 %v10462_v20, %s10235_s20 }
 0xea6   : > { %5634 = vrot.lane.b32.xlu0 %v10459_v17, %s10235_s20 }
 0xf0d   : > { %v5286_v32 = vpop.xlane.xlu0 %5285 }
 0xf0e   : > { %v5296_v34 = vsub.f32 %v5280_v2, %v5286_v32 }
 0xf10   : > { %v5300_v37 = vmul.f32 1.442695, %v5296_v34 }
 0xf11   : > { %v5289_v39 = vpop.xlane.xlu1 %5288  ;;  %v5292_v42 = vpop.xlane.xlu0 %5291 }
 0xf12   : > { %10132 = vpow2.f32 %v5300_v37  ;;  %v5297_v44 = vsub.f32 %v5281_v12, %v5289_v39  ;;  %v5298_v45 = vsub.f32 %v5282_v14, %v5292_v42 }
 0xf14   : > { %v5302_v48 = vmul.f32 1.442695, %v5297_v44  ;;  %v5304_v55 = vmul.f32 1.442695, %v5298_v45 }
 0xf15   : > { %v5329_v57 = vpop.permute.xlu1 %5328  ;;  %v5295_v59 = vpop.xlane.xlu0 %5294 }
 0xf16   : > { %10134 = vpow2.f32 %v5302_v48  ;;  %v5299_v60 = vsub.f32 %v5283_v26, %v5295_v59  ;;  %9893 = vmatpush3.msra.mxu1 %v5329_v57 }
 0xf17   : > { %10136 = vpow2.f32 %v5304_v55  ;;  %9902 = vmatprep.subr.mxu1 %v10213_v13 }
 0xf18   : > { %v5306_v40 = vmul.f32 1.442695, %v5299_v60 }
 0xf19   : > { %v5405_v46 = vpop.permute.xlu0 %5404  ;;  %v5481_v12 = vpop.permute.xlu1 %5480 }
 0xf1a   : > { %10138 = vpow2.f32 %v5306_v40  ;;  %9898 = vmatpush3.msra.mxu0 %v5405_v46 }
 0xf1b   : > { %9907 = vmatprep.subr.mxu0 %v10213_v13 }
 0xf1d   : > { %v5557_v14 = vpop.permute.xlu1 %5556  ;;  %v5635_v16 = vpop.permute.xlu0 %5634 }
 0xf1f   : > { %v10133_v2 = vpop.eup %10132 }
 0xf20   : > { %v5308_v4 = vsel %vm1275_vm4, %v10133_v2, 0.0 }
 0xf21   : > { %5309 = vadd.xlane.f32.xlu1 %v5308_v4  ;;  %v5713_v15 = vpop.permute.xlu1 %5712 }
 0xf23   : > { %v10135_v5 = vpop.eup %10134 }
 0xf24   : > { %v10137_v6 = vpop.eup %10136  ;;  %v5311_v8 = vsel %vm1275_vm4, %v10135_v5, 0.0 }
 0xf25   : > { %5312 = vadd.xlane.f32.xlu0 %v5311_v8  ;;  %v5314_v9 = vsel %vm1275_vm4, %v10137_v6, 0.0 }
 0xf26   : > { %5315 = vadd.xlane.f32.xlu1 %v5314_v9 }
 0xf27   : > { %v10139_v10 = vpop.eup %10138 }
 0xf28   : > { %v5317_v11 = vsel %vm1275_vm4, %v10139_v10, 0.0 }
 0xf29   : > { %5318 = vadd.xlane.f32.xlu0 %v5317_v11 }
 0xf37   : > { %5710 = vrot.lane.b32.xlu1 %v10462_v20, %s10236_s21 }
 0xf3b   : > { %5868 = vrot.lane.b32.xlu1 %v10466_v22, %s10235_s20 }
 0xf3f   : > { %5866 = vrot.lane.b32.xlu1 %v10466_v22, %s10236_s21  ;;  %5632 = vrot.lane.b32.xlu0 %v10459_v17, %s10236_s21 }
 0xf43   : > { %5790 = vrot.lane.b32.xlu0 %v10464_v21, %s10235_s20  ;;  %s11965_s20 = scalar_lea.vmem %s11925_s5, %s10368_s19 }
 0xf47   : > { %5788 = vrot.lane.b32.xlu0 %v10464_v21, %s10236_s21 }
 0xfaa   : > { %v5310_v19 = vpop.xlane.xlu1 %5309 }
 0xfab   : > { %10140 = vrcp.f32 %v5310_v19 }
 0xfae   : > { %v5313_v24 = vpop.xlane.xlu0 %5312 }
 0xfaf   : > { %v5316_v25 = vpop.xlane.xlu1 %5315  ;;  %10142 = vrcp.f32 %v5313_v24 }
 0xfb0   : > { %10144 = vrcp.f32 %v5316_v25 }
 0xfb2   : > { %v5319_v26 = vpop.xlane.xlu0 %5318 }
 0xfb3   : > { %10146 = vrcp.f32 %v5319_v26  ;;  %v5711_v44 = vpop.permute.xlu1 %5710 }
 0xfb6   : > { %v5633_v34 = vpop.permute.xlu0 %5632 }
 0xfb7   : > { %v5869_v59 = vpop.permute.xlu1 %5868 }
 0xfb8   : > { %v10141_v29 = vpop.eup %10140 }
 0xfb9   : > { %v5324_v32 = vmul.f32 %v10141_v29, %v10133_v2 }
 0xfba   : > { %v5791_v55 = vpop.permute.xlu0 %5790 }
 0xfbb   : > { %9895 = vmatmul.mubr.msk.f32.vlgmr.msra.gmra.mxu1 %vm1275_vm4, %v5324_v32  ;;  %v5867_v40 = vpop.permute.xlu1 %5866 }
 0xfbc   : > { %v10143_v37 = vpop.eup %10142  ;;  %9903 = vmatpush3.msra.mxu1 %v5481_v12  ;;  %9904 = vmatprep.mubr.msk.f32.mxu1 %vm10214_vm2, %v10213_v13 }
 0xfbd   : > { %v10145_v39 = vpop.eup %10144  ;;  %9912 = vmatprep.subr.mxu1 %v10213_v13  ;;  %v5325_v42 = vmul.f32 %v10143_v37, %v10135_v5 }
 0xfbe   : > { %v5326_v45 = vmul.f32 %v10145_v39, %v10137_v6  ;;  %v5789_v60 = vpop.permute.xlu0 %5788 }
 0xfbf   : > { %9900 = vmatmul.mubr.msk.f32.vlgmr.msra.gmra.mxu0 %vm1275_vm4, %v5325_v42 }
 0xfc0   : > { %v10147_v48 = vpop.eup %10146  ;;  %9905 = vmatmul.mubr.msk.f32.vlgmr.msra.gmra.mxu1 %vm1275_vm4, %v5326_v45  ;;  %9908 = vmatpush3.msra.mxu0 %v5557_v14 }
 0xfc1   : > { %9913 = vmatpush3.xpose.msk.msra.mxu1 %vm937_vm3, %v5635_v16  ;;  %9909 = vmatprep.mubr.msk.f32.mxu0 %vm10214_vm2, %v10213_v13  ;;  %v5327_v57 = vmul.f32 %v10147_v48, %v10139_v10 }
 0xfc2   : > { %9914 = vmatprep.mubr.msk.f32.mxu1 %vm10214_vm2, %v10213_v13  ;;  %9917 = vmatprep.subr.mxu0 %v10213_v13 }
 0xfc3   : > { %9922 = vmatprep.subr.mxu1 %v10213_v13  ;;  %9910 = vmatmul.mubr.msk.f32.vlgmr.msra.gmra.mxu0 %vm1275_vm4, %v5327_v57 }
 0xfc4   : > { %9915 = vmatmul.mubr.msk.f32.vlgmr.msra.gmra.mxu1 %vm937_vm3, %v5633_v34  ;;  %9918 = vmatpush3.xpose.msk.msra.mxu0 %vm937_vm3, %v5713_v15 }
 0xfc5   : > { %9923 = vmatpush3.xpose.msk.msra.mxu1 %vm937_vm3, %v5791_v55  ;;  %9919 = vmatprep.mubr.msk.f32.mxu0 %vm10214_vm2, %v10213_v13 }
 0xfc6   : > { %9924 = vmatprep.mubr.msk.f32.mxu1 %vm10214_vm2, %v10213_v13  ;;  %9927 = vmatprep.subr.mxu0 %v10213_v13 }
 0xfc7   : > { %9920 = vmatmul.mubr.msk.f32.vlgmr.msra.gmra.mxu0 %vm937_vm3, %v5711_v44  ;;  %9932 = vmatprep.subr.mxu1 %v10213_v13 }
 0xfc8   : > { %9925 = vmatmul.mubr.msk.f32.vlgmr.msra.gmra.mxu1 %vm937_vm3, %v5789_v60  ;;  %9928 = vmatpush3.xpose.msk.msra.mxu0 %vm937_vm3, %v5869_v59 }
 0xfc9   : > { %9929 = vmatprep.mubr.msk.f32.mxu0 %vm10214_vm2, %v10213_v13  ;;  %9937 = vmatprep.subr.mxu0 %v10213_v13 }
 0xfca   : > { %9934 = vmatprep.mubr.msk.f32.mxu1 %vm10214_vm2, %v10213_v13 }
 0xfcb   : > { %9930 = vmatmul.mubr.msk.f32.vlgmr.msra.gmra.mxu0 %vm937_vm3, %v5867_v40 }
 0xfcc   : > { %9939 = vmatprep.mubr.msk.f32.mxu0 %vm10214_vm2, %v10213_v13 }
0x107b   : > { %v11051_v46 = vpop.f32.mrf.mxu1 }
0x107d   : > { %v9896_v2 = vpop.f32.mrf.mxu1 }
0x107f   : > { %v11053_v4 = vpop.f32.mrf.mxu0 }
0x1080   : > { %v11055_v5 = vpop.f32.mrf.mxu1 }
0x1081   : > { %v9901_v6 = vpop.f32.mrf.mxu0 }
0x1082   : > { %v9906_v8 = vpop.f32.mrf.mxu1 }
0x1083   : > { %v11057_v9 = vpop.f32.mrf.mxu0 }
0x1084   : > { %v5706_v10 = vpop.f32.mrf.mxu1 }
0x1085   : > { %v5944_v11 = vmul.f32 0.5, %v5706_v10  ;;  %v9911_v12 = vpop.f32.mrf.mxu0 }
0x1086   : > { %v9916_v14 = vpop.f32.mrf.mxu1 }
0x1087   : > { %v5948_v15 = vadd.f32 %v10818_v7, %v5944_v11  ;;  %v5784_v16 = vpop.f32.mrf.mxu0 }
0x1088   : > { %v5945_v19 = vmul.f32 0.5, %v5784_v16  ;;  %v5862_v24 = vpop.f32.mrf.mxu1 }
0x1089   : > { %v5946_v25 = vmul.f32 0.5, %v5862_v24  ;;  %v9921_v26 = vpop.f32.mrf.mxu0  ;;  %v5952_v29 = vsel %vm1275_vm4, %v5948_v15, -inf }
0x108a   : > { %v5949_v32 = vadd.f32 %v10825_v18, %v5945_v19  ;;  %5953 = vmax.xlane.f32.xlu0 %v5952_v29  ;;  %v9926_v34 = vpop.f32.mrf.mxu1  ;;  %v6447_v26 = vld [vmem:[%s10383_s28 + $0x10] sm:$0xff]  ;;  %v6446_v29 = vld [vmem:[%s10383_s28 + $0x8] sm:$0xff] }
0x108b   : > { %v5950_v37 = vadd.f32 %v10831_v23, %v5946_v25  ;;  %v5940_v39 = vpop.f32.mrf.mxu0  ;;  %v6448_v25 = vld [vmem:[%s10383_s28 + $0x18] sm:$0xff] }
0x108c   : > { %v5947_v42 = vmul.f32 0.5, %v5940_v39  ;;  %v5955_v44 = vsel %vm1275_vm4, %v5949_v32, -inf }
0x108d   : > { %5956 = vmax.xlane.f32.xlu1 %v5955_v44  ;;  %v9931_v45 = vpop.f32.mrf.mxu0  ;;  %v5958_v7 = vsel %vm1275_vm4, %v5950_v37, -inf }
0x108e   : > { %v5951_v48 = vadd.f32 %v10839_v36, %v5947_v42  ;;  %5959 = vmax.xlane.f32.xlu0 %v5958_v7 }
0x1090   : > { %v5961_v55 = vsel %vm1275_vm4, %v5951_v48, -inf }
0x1092   : > { %5962 = vmax.xlane.f32.xlu0 %v5961_v55 }
0x1113   : > { %v5954_v57 = vpop.xlane.xlu0 %5953 }
0x1114   : > { %v5964_v18 = vsub.f32 %v5948_v15, %v5954_v57 }
0x1116   : > { %v5968_v59 = vmul.f32 1.442695, %v5964_v18  ;;  %v5957_v60 = vpop.xlane.xlu1 %5956 }
0x1117   : > { %v5965_v40 = vsub.f32 %v5949_v32, %v5957_v60  ;;  %v5960_v23 = vpop.xlane.xlu0 %5959  ;;  %v6445_v32 = vld [vmem:[%s10383_s28] sm:$0xff] }
0x1118   : > { %10148 = vpow2.f32 %v5968_v59  ;;  %v5966_v19 = vsub.f32 %v5950_v37, %v5960_v23 }
0x1119   : > { %v5970_v2 = vmul.f32 1.442695, %v5965_v40 }
0x111a   : > { %v5972_v24 = vmul.f32 1.442695, %v5966_v19 }
0x111b   : > { %10150 = vpow2.f32 %v5970_v2  ;;  %v5963_v6 = vpop.xlane.xlu0 %5962 }
0x111c   : > { %v5967_v8 = vsub.f32 %v5951_v48, %v5963_v6 }
0x111e   : > { %v5974_v10 = vmul.f32 1.442695, %v5967_v8 }
0x1120   : > { %10152 = vpow2.f32 %v5974_v10 }
0x1121   : > { %10154 = vpow2.f32 %v5972_v24 }
0x1125   : > { %v10149_v11 = vpop.eup %10148 }
0x1126   : > { %v5976_v36 = vsel %vm1275_vm4, %v10149_v11, 0.0 }
0x1127   : > { %5977 = vadd.xlane.f32.xlu1 %v5976_v36 }
0x1128   : > { %v10151_v12 = vpop.eup %10150 }
0x1129   : > { %v5979_v14 = vsel %vm1275_vm4, %v10151_v12, 0.0 }
0x112a   : > { %5980 = vadd.xlane.f32.xlu0 %v5979_v14 }
0x112d   : > { %v10153_v15 = vpop.eup %10152 }
0x112e   : > { %v5985_v16 = vsel %vm1275_vm4, %v10153_v15, 0.0 }
0x112f   : > { %5986 = vadd.xlane.f32.xlu0 %v5985_v16 }
0x1138   : > { %5996 = vrot.lane.b32.xlu1 %v10459_v17, %s10237_s4  ;;  %v10155_v17 = vpop.eup %10154 }
0x1145   : > { %6072 = vrot.lane.b32.xlu0 %v10462_v20, %s10237_s4  ;;  %v5982_v20 = vsel %vm1275_vm4, %v10155_v17, 0.0 }
0x1149   : > { %6304 = vrot.lane.b32.xlu0 %v10657_v63, %s10238_s15 }
0x114d   : > { %6320 = vrot.lane.b32.xlu0 %v10731_v27, %s10239_s8 }
0x1151   : > { %6336 = vrot.lane.b32.xlu0 %v10807_v28, %s10240_s25 }
0x1155   : > { %6352 = vrot.lane.b32.xlu0 %v10903_v49, %s10241_s23 }
0x1159   : > { %6368 = vrot.lane.b32.xlu0 %v10979_v47, %s10242_s24 }
0x115c   : > { %5983 = vadd.xlane.f32.xlu1 %v5982_v20 }
0x115d   : > { %6384 = vrot.lane.b32.xlu0 %v11051_v46, %s10243_s1 }
0x1161   : > { %6308 = vrot.lane.b32.xlu0 %v10659_v1, %s10238_s15 }
0x116d   : > { %6148 = vrot.lane.b32.xlu1 %v10464_v21, %s10237_s4 }
0x1171   : > { %6224 = vrot.lane.b32.xlu1 %v10466_v22, %s10237_s4 }
0x1175   : > { %6306 = vrot.lane.b32.xlu1 %v10655_v61, %s10238_s15 }
0x1179   : > { %6322 = vrot.lane.b32.xlu1 %v10733_v30, %s10239_s8 }
0x117d   : > { %6338 = vrot.lane.b32.xlu1 %v10809_v62, %s10240_s25 }
0x1181   : > { %6354 = vrot.lane.b32.xlu1 %v10905_v51, %s10241_s23 }
0x1185   : > { %6370 = vrot.lane.b32.xlu1 %v10981_v50, %s10242_s24 }
0x1189   : > { %6386 = vrot.lane.b32.xlu1 %v11053_v4, %s10243_s1 }
0x118d   : > { %6310 = vrot.lane.b32.xlu1 %v10661_v3, %s10238_s15  ;;  %s11966_s15 = scalar_lea.vmem %s11926_s6, %s10368_s19 }
0x11b0   : > { %v5978_v21 = vpop.xlane.xlu1 %5977 }
0x11b1   : > { %10156 = vrcp.f32 %v5978_v21 }
0x11b3   : > { %v5981_v22 = vpop.xlane.xlu0 %5980 }
0x11b4   : > { %v5997_v61 = vpop.permute.xlu1 %5996  ;;  %10158 = vrcp.f32 %v5981_v22 }
0x11b5   : > { %9933 = vmatpush3.msra.mxu1 %v5997_v61 }
0x11b6   : > { %9942 = vmatprep.subr.mxu1 %v10213_v13 }
0x11b8   : > { %v5987_v63 = vpop.xlane.xlu0 %5986 }
0x11b9   : > { %10160 = vrcp.f32 %v5987_v63 }
0x11bc   : > { %v6073_v1 = vpop.permute.xlu0 %6072 }
0x11bd   : > { %9938 = vmatpush3.msra.mxu0 %v6073_v1 }
0x11be   : > { %v10157_v27 = vpop.eup %10156  ;;  %9947 = vmatprep.subr.mxu0 %v10213_v13 }
0x11bf   : > { %v5992_v30 = vmul.f32 %v10157_v27, %v10149_v11 }
0x11c1   : > { %v10159_v28 = vpop.eup %10158  ;;  %9935 = vmatmul.mubr.msk.f32.vlgmr.msra.gmra.mxu1 %vm1275_vm4, %v5992_v30 }
0x11c2   : > { %v5993_v62 = vmul.f32 %v10159_v28, %v10151_v12  ;;  %9944 = vmatprep.mubr.msk.f32.mxu1 %vm10214_vm2, %v10213_v13 }
0x11c4   : > { %9940 = vmatmul.mubr.msk.f32.vlgmr.msra.gmra.mxu0 %vm1275_vm4, %v5993_v62 }
0x11c5   : > { %9949 = vmatprep.mubr.msk.f32.mxu0 %vm10214_vm2, %v10213_v13 }
0x11c6   : > { %v10161_v51 = vpop.eup %10160 }
0x11c7   : > { %v5995_v50 = vmul.f32 %v10161_v51, %v10153_v15 }
0x11e5   : > { %v5984_v3 = vpop.xlane.xlu1 %5983 }
0x11e6   : > { %10162 = vrcp.f32 %v5984_v3 }
0x11e9   : > { %v6149_v49 = vpop.permute.xlu1 %6148 }
0x11ea   : > { %9943 = vmatpush3.msra.mxu1 %v6149_v49 }
0x11eb   : > { %9952 = vmatprep.subr.mxu1 %v6448_v25 }
0x11ed   : > { %v6225_v47 = vpop.permute.xlu1 %6224 }
0x11ee   : > { %9948 = vmatpush3.msra.mxu0 %v6225_v47 }
0x11ef   : > { %9950 = vmatmul.mubr.msk.f32.vlgmr.msra.gmra.mxu0 %vm1275_vm4, %v5995_v50 }
0x11f0   : > { %6856 = vmatprep.mubr.f32.mxu0 %v10213_v13 }
0x11f3   : > { %v10163_v46 = vpop.eup %10162 }
0x11f4   : > { %v5994_v4 = vmul.f32 %v10163_v46, %v10155_v17 }
0x11f6   : > { %9945 = vmatmul.mubr.msk.f32.vlgmr.msra.gmra.mxu1 %vm1275_vm4, %v5994_v4 }
0x11f7   : > { %9953 = vmatpush3.msra.mxu1 %v6448_v25 }
0x11f8   : > { %9954 = vmatprep.subr.mxu1 %v6447_v26 }
0x11f9   : > { %9955 = vmatpush3.msra.mxu1 %v6447_v26 }
0x11fa   : > { %9956 = vmatprep.subr.mxu1 %v6446_v29 }
0x11fb   : > { %9957 = vmatpush3.msra.mxu1 %v6446_v29 }
0x11fc   : > { %9958 = vmatprep.subr.mxu1 %v6445_v32 }
0x11fd   : > { %9959 = vmatpush3.msra.mxu1 %v6445_v32 }
0x1281   : > { %v6068_v34 = vpop.f32.mrf.mxu1 }
0x1282   : > { %6400 = vrot.lane.b32.xlu0 %v6068_v34, %s10244_s27 }
0x1283   : > { %v9936_v37 = vpop.f32.mrf.mxu1 }
0x1284   : > { %v6144_v39 = vpop.f32.mrf.mxu0  ;;  %v9063_v37 = vld [vmem:[%s11965_s20] ss:$0 sm:$0xff] }
0x1285   : > { %6402 = vrot.lane.b32.xlu1 %v6144_v39, %s10244_s27 }
0x1286   : > { %6324 = vrot.lane.b32.xlu0 %v10735_v31, %s10239_s8  ;;  %v9941_v42 = vpop.f32.mrf.mxu0 }
0x1289   : > { %6326 = vrot.lane.b32.xlu1 %v10737_v35, %s10239_s8  ;;  %s11971_s8 = sld [smem:[#allocation14_spill]] (!%p9105_p6) }
0x128a   : > { %6340 = vrot.lane.b32.xlu0 %v10811_v33, %s10240_s25 }
0x128d   : > { %6342 = vrot.lane.b32.xlu1 %v10813_v0, %s10240_s25 }
0x128e   : > { %6356 = vrot.lane.b32.xlu0 %v10907_v52, %s10241_s23  ;;  %v6305_v52 = vpop.permute.xlu0 %6304 }
0x1291   : > { %6358 = vrot.lane.b32.xlu1 %v10909_v56, %s10241_s23  ;;  %v6307_v56 = vpop.permute.xlu1 %6306  ;;  %s11967_s23 = scalar_lea.vmem %s11927_s7, %s10368_s19 }
0x1292   : > { %6372 = vrot.lane.b32.xlu0 %v10983_v54, %s10242_s24  ;;  %v6321_v44 = vpop.permute.xlu0 %6320  ;;  %v6413_v2 = vsel %vm937_vm3, %v10581_v41, %v6307_v56 }
0x1295   : > { %6374 = vrot.lane.b32.xlu1 %v10985_v58, %s10242_s24  ;;  %v6323_v45 = vpop.permute.xlu1 %6322 }
0x1296   : > { %6388 = vrot.lane.b32.xlu0 %v11055_v5, %s10243_s1  ;;  %v6337_v54 = vpop.permute.xlu0 %6336  ;;  %v6417_v8 = vsel %vm1275_vm4, %v6413_v2, %v6323_v45 }
0x1299   : > { %6390 = vrot.lane.b32.xlu1 %v11057_v9, %s10243_s1  ;;  %v6339_v7 = vpop.permute.xlu1 %6338  ;;  %v6412_v9 = vsel %vm937_vm3, %v10579_v38, %v6305_v52  ;;  %v10185_v52 = vld [vmem:[#allocation2] sm:$0xff] }
0x129a   : > { %v6353_v48 = vpop.permute.xlu0 %6352  ;;  %v6416_v59 = vsel %vm1275_vm4, %v6412_v9, %v6321_v44  ;;  %v6422_v11 = vsel %vm6420_vm5, %v6417_v8, %v6339_v7 }
0x129b   : > { %v6421_v40 = vsel %vm6420_vm5, %v6416_v59, %v6337_v54 }
0x129c   : > { %v6426_v23 = vsel %vm6425_vm6, %v6421_v40, %v6353_v48 }
0x129d   : > { %v6355_v58 = vpop.permute.xlu1 %6354 }
0x129e   : > { %v6369_v55 = vpop.permute.xlu0 %6368  ;;  %v6427_v12 = vsel %vm6425_vm6, %v6422_v11, %v6355_v58 }
0x129f   : > { %v6431_v6 = vsel %vm6430_vm7, %v6426_v23, %v6369_v55  ;;  %v10186_v55 = vld [vmem:[#allocation2 + $0x10] sm:$0xff] }
0x12a1   : > { %v6371_v57 = vpop.permute.xlu1 %6370 }
0x12a2   : > { %v6385_v5 = vpop.permute.xlu0 %6384  ;;  %v6432_v15 = vsel %vm6430_vm7, %v6427_v12, %v6371_v57  ;;  %v6681_v12 = vld [vmem:[%s10401_s14 + $0x188] sm:$0xff] }
0x12a3   : > { %v6436_v38 = vsel %vm6435_vm8, %v6431_v6, %v6385_v5  ;;  %v10187_v5 = vld [vmem:[#allocation2 + $0x18] sm:$0xff]  ;;  %6816 = vmatprep.subr.mxu0 %v6681_v12 }
0x12a5   : > { %v6387_v18 = vpop.permute.xlu1 %6386 }
0x12a6   : > { %v6309_v60 = vpop.permute.xlu0 %6308  ;;  %v6437_v41 = vsel %vm6435_vm8, %v6432_v15, %v6387_v18  ;;  %v6680_v15 = vld [vmem:[%s10401_s14 + $0x180] sm:$0xff] }
0x12a7   : > { %v6414_v27 = vsel %vm937_vm3, %v10589_v53, %v6309_v60  ;;  %6817 = vmatpush1.msra.mxu0 %v6680_v15 }
0x12a9   : > { %v6311_v10 = vpop.permute.xlu1 %6310 }
0x12aa   : > { %v6415_v28 = vsel %vm937_vm3, %v10583_v43, %v6311_v10 }
0x12af   : > { %v6296_v31 = vpop.f32.mrf.mxu0 }
0x12b0   : > { %6406 = vrot.lane.b32.xlu1 %v6296_v31, %s10244_s27 }
0x12b1   : > { %v9951_v35 = vpop.f32.mrf.mxu0 }
0x12b2   : > { %v10184_v35 = vld [vmem:[#allocation2 + $0x8] sm:$0xff] }
0x12b6   : > { %v6220_v33 = vpop.f32.mrf.mxu1 }
0x12b7   : > { %6404 = vrot.lane.b32.xlu0 %v6220_v33, %s10244_s27 }
0x12b8   : > { %v9946_v0 = vpop.f32.mrf.mxu1 }
0x12f4   : > { %v6401_v36 = vpop.permute.xlu0 %6400 }
0x12f5   : > { %v6441_v14 = vsel %vm6440_vm9, %v6436_v38, %v6401_v36 }
0x12f6   : > { %9960 = vmatprep.mubr.msk.f32.mxu1 %vm836_vm1, %v6441_v14  ;;  %v6683_v14 = vld [vmem:[%s10401_s14 + $0x198] sm:$0xff] }
0x12f7   : > { %v6403_v16 = vpop.permute.xlu1 %6402  ;;  %6905 = vmatprep.subr.mxu1 %v6683_v14 }
0x12f8   : > { %v6442_v19 = vsel %vm6440_vm9, %v6437_v41, %v6403_v16  ;;  %v6325_v17 = vpop.permute.xlu0 %6324  ;;  %v6682_v41 = vld [vmem:[%s10401_s14 + $0x190] sm:$0xff]  ;;  %v6665_v16 = vld [vmem:[%s10401_s14 + $0x108] sm:$0xff] }
0x12f9   : > { %9961 = vmatmul.mubr.msk.f32.vlgmr.msra.gmra.mxu1 %vm836_vm1, %v6442_v19  ;;  %v6418_v62 = vsel %vm1275_vm4, %v6414_v27, %v6325_v17  ;;  %v6667_v19 = vld [vmem:[%s10401_s14 + $0x118] sm:$0xff]  ;;  %6818 = vmatprep.subr.mxu0 %v6665_v16  ;;  %v6666_v17 = vld [vmem:[%s10401_s14 + $0x110] sm:$0xff]  ;;  %v6632_v27 = vld [vmem:[%s10401_s14] sm:$0xff] }
0x12fa   : > { %6906 = vmatpush1.msra.mxu1 %v6682_v41 }
0x12fb   : > { %v6327_v24 = vpop.permute.xlu1 %6326  ;;  %6907 = vmatprep.subr.mxu1 %v6667_v19 }
0x12fc   : > { %v6341_v21 = vpop.permute.xlu0 %6340  ;;  %v6419_v49 = vsel %vm1275_vm4, %v6415_v28, %v6327_v24  ;;  %v6664_v24 = vld [vmem:[%s10401_s14 + $0x100] sm:$0xff]  ;;  %6908 = vmatpush1.msra.mxu1 %v6666_v17 }
0x12fd   : > { %v6423_v51 = vsel %vm6420_vm5, %v6418_v62, %v6341_v21  ;;  %6819 = vmatpush1.msra.mxu0 %v6664_v24  ;;  %v6651_v21 = vld [vmem:[%s10401_s14 + $0x98] sm:$0xff] }
0x12fe   : > { %6909 = vmatprep.subr.mxu1 %v6651_v21 }
0x12ff   : > { %v6343_v20 = vpop.permute.xlu1 %6342 }
0x1300   : > { %v6357_v61 = vpop.permute.xlu0 %6356  ;;  %v6424_v47 = vsel %vm6420_vm5, %v6419_v49, %v6343_v20  ;;  %v6649_v20 = vld [vmem:[%s10401_s14 + $0x88] sm:$0xff] }
0x1301   : > { %v6428_v50 = vsel %vm6425_vm6, %v6423_v51, %v6357_v61  ;;  %6820 = vmatprep.subr.mxu0 %v6649_v20  ;;  %v6650_v61 = vld [vmem:[%s10401_s14 + $0x90] sm:$0xff] }
0x1302   : > { %6910 = vmatpush1.msra.mxu1 %v6650_v61  ;;  %v6688_v61 = vld [vmem:[%s10401_s14 + $0x1c0] sm:$0xff] }
0x1303   : > { %v6359_v22 = vpop.permute.xlu1 %6358 }
0x1304   : > { %v6373_v1 = vpop.permute.xlu0 %6372  ;;  %v6429_v46 = vsel %vm6425_vm6, %v6424_v47, %v6359_v22  ;;  %v6648_v22 = vld [vmem:[%s10401_s14 + $0x80] sm:$0xff] }
0x1305   : > { %v6433_v53 = vsel %vm6430_vm7, %v6428_v50, %v6373_v1  ;;  %6821 = vmatpush1.msra.mxu0 %v6648_v22  ;;  %v6635_v1 = vld [vmem:[%s10401_s14 + $0x18] sm:$0xff] }
0x1306   : > { %6911 = vmatprep.subr.mxu1 %v6635_v1  ;;  %v6673_v1 = vld [vmem:[%s10401_s14 + $0x148] sm:$0xff] }
0x1307   : > { %v6375_v63 = vpop.permute.xlu1 %6374 }
0x1308   : > { %v6389_v3 = vpop.permute.xlu0 %6388  ;;  %v6434_v25 = vsel %vm6430_vm7, %v6429_v46, %v6375_v63  ;;  %v6633_v63 = vld [vmem:[%s10401_s14 + $0x8] sm:$0xff] }
0x1309   : > { %v6438_v43 = vsel %vm6435_vm8, %v6433_v53, %v6389_v3  ;;  %6822 = vmatprep.subr.mxu0 %v6633_v63  ;;  %v6690_v63 = vld [vmem:[%s10401_s14 + $0x1d0] sm:$0xff] }
0x130a   : > { %6823 = vmatpush1.msra.mxu0 %v6632_v27  ;;  %v6675_v27 = vld [vmem:[%s10401_s14 + $0x158] sm:$0xff] }
0x130b   : > { %v6391_v30 = vpop.permute.xlu1 %6390 }
0x130c   : > { %v6439_v29 = vsel %vm6435_vm8, %v6434_v25, %v6391_v30  ;;  %v6634_v30 = vld [vmem:[%s10401_s14 + $0x10] sm:$0xff]  ;;  %v6685_v25 = vld [vmem:[%s10401_s14 + $0x1a8] sm:$0xff] }
0x130d   : > { %6912 = vmatpush1.msra.mxu1 %v6634_v30  ;;  %6994 = vmatprep.subr.mxu0 %v6685_v25  ;;  %v6672_v30 = vld [vmem:[%s10401_s14 + $0x140] sm:$0xff]  ;;  %v6695_v25 = vld [vmem:[%s10401_s14 + $0x1f8] sm:$0xff] }
0x1322   : > { %v6407_v4 = vpop.permute.xlu1 %6406 }
0x1323   : > { %v6444_v34 = vsel %vm6440_vm9, %v6439_v29, %v6407_v4 }
0x1329   : > { %v6405_v26 = vpop.permute.xlu0 %6404 }
0x132a   : > { %v6443_v32 = vsel %vm6440_vm9, %v6438_v43, %v6405_v26  ;;  %v6687_v43 = vld [vmem:[%s10401_s14 + $0x1b8] sm:$0xff] }
0x132b   : > { %9963 = vmatprep.mubr.msk.f32.mxu1 %vm836_vm1, %v6443_v32  ;;  %7083 = vmatprep.subr.mxu1 %v6687_v43  ;;  %v6692_v43 = vld [vmem:[%s10401_s14 + $0x1e0] sm:$0xff] }
0x132c   : > { %9964 = vmatmul.mubr.msk.f32.gmra.mxu1 %vm836_vm1, %v6444_v34 }
0x132d   : > { %6945 = vmatprep.mubr.f32.mxu1 %v10213_v13 }
0x13b9   : > { %v9962_v39 = vpop.f32.mrf.mxu1 }
0x13ba   : > { %v6540_v42 = vadd.f32 %v9962_v39, %v9063_v37 }
0x13bb   : > { %v6534_v31 = vpop.f32.mrf.mxu1 }
0x13bc   : > { %v6554_v33 = vadd.f32 %v10184_v35, %v6540_v42  ;;  %v6535_v0 = vadd.f32 %v9063_v37, %v6534_v31 }
0x13be   : > { %v6553_v56 = vadd.f32 %v10185_v52, %v6535_v0  ;;  %v6562_v44 = vsel %vm836_vm1, %v6554_v33, 0.0  ;;  %v9068_v0 = vld [vmem:[%s11966_s15] ss:$0 sm:$0xff] }
0x13bf   : > { %6563 = vadd.xlane.f32.xlu1 %v6562_v44 }
0x13c0   : > { %v6559_v45 = vsel %vm836_vm1, %v6553_v56, 0.0 }
0x13c1   : > { %6560 = vadd.xlane.f32.xlu0 %v6559_v45 }
0x13ec   : > { %v9965_v54 = vpop.f32.mrf.mxu1 }
0x13ed   : > { %v6550_v48 = vadd.f32 %v9965_v54, %v9063_v37  ;;  %v6684_v54 = vld [vmem:[%s10401_s14 + $0x1a0] sm:$0xff] }
0x13ee   : > { %v6544_v7 = vpop.f32.mrf.mxu1 }
0x13ef   : > { %v6545_v58 = vadd.f32 %v9063_v37, %v6544_v7  ;;  %v6556_v18 = vadd.f32 %v10187_v5, %v6550_v48  ;;  %v6686_v7 = vld [vmem:[%s10401_s14 + $0x1b0] sm:$0xff]  ;;  %v6669_v48 = vld [vmem:[%s10401_s14 + $0x128] sm:$0xff] }
0x13f0   : > { %v6670_v5 = vld [vmem:[%s10401_s14 + $0x130] sm:$0xff] }
0x13f1   : > { %v6555_v57 = vadd.f32 %v10186_v55, %v6545_v58  ;;  %v6568_v59 = vsel %vm836_vm1, %v6556_v18, 0.0  ;;  %v6671_v58 = vld [vmem:[%s10401_s14 + $0x138] sm:$0xff] }
0x13f3   : > { %v6565_v9 = vsel %vm836_vm1, %v6555_v57, 0.0 }
0x13f4   : > { %6566 = vadd.xlane.f32.xlu0 %v6565_v9  ;;  %v6655_v9 = vld [vmem:[%s10401_s14 + $0xb8] sm:$0xff] }
0x13f8   : > { %6569 = vadd.xlane.f32.xlu0 %v6568_v59  ;;  %v6652_v59 = vld [vmem:[%s10401_s14 + $0xa0] sm:$0xff] }
0x1448   : > { %v6564_v60 = vpop.xlane.xlu1 %6563 }
0x1449   : > { %v6573_v40 = vmul.f32 0.03125, %v6564_v60  ;;  %v6654_v60 = vld [vmem:[%s10401_s14 + $0xb0] sm:$0xff] }
0x144a   : > { %v6561_v23 = vpop.xlane.xlu0 %6560 }
0x144b   : > { %v11180_v2 = vsub.f32 %v6554_v33, %v6573_v40  ;;  %v6572_v6 = vmul.f32 0.03125, %v6561_v23  ;;  %v6637_v40 = vld [vmem:[%s10401_s14 + $0x28] sm:$0xff]  ;;  %v6639_v23 = vld [vmem:[%s10401_s14 + $0x38] sm:$0xff] }
0x144d   : > { %v11182_v8 = vsub.f32 %v6553_v56, %v6572_v6  ;;  %v6581_v10 = vmul.f32 %v11180_v2, %v11180_v2  ;;  %v11230_v56 = vld [vmem:[%s11967_s23] ss:$0 sm:$0xff]  ;;  %v6638_v6 = vld [vmem:[%s10401_s14 + $0x30] sm:$0xff] }
0x144f   : > { %v6587_v38 = vsel %vm836_vm1, %v6581_v10, 0.0  ;;  %v6580_v11 = vmul.f32 %v11182_v8, %v11182_v8  ;;  %v6691_v10 = vld [vmem:[%s10401_s14 + $0x1d8] sm:$0xff] }
0x1450   : > { %6588 = vadd.xlane.f32.xlu0 %v6587_v38 }
0x1451   : > { %v6584_v36 = vsel %vm836_vm1, %v6580_v11, 0.0 }
0x1452   : > { %6585 = vadd.xlane.f32.xlu1 %v6584_v36 }
0x147d   : > { %v6567_v28 = vpop.xlane.xlu0 %6566 }
0x147e   : > { %v6574_v62 = vmul.f32 0.03125, %v6567_v28  ;;  %v6674_v28 = vld [vmem:[%s10401_s14 + $0x150] sm:$0xff] }
0x1480   : > { %v11206_v3 = vsub.f32 %v6555_v57, %v6574_v62  ;;  %v6668_v57 = vld [vmem:[%s10401_s14 + $0x120] sm:$0xff]  ;;  %v6657_v62 = vld [vmem:[%s10401_s14 + $0xc8] sm:$0xff] }
0x1481   : > { %v6570_v49 = vpop.xlane.xlu0 %6569 }
0x1482   : > { %v6575_v51 = vmul.f32 0.03125, %v6570_v49  ;;  %v6582_v47 = vmul.f32 %v11206_v3, %v11206_v3  ;;  %v6656_v49 = vld [vmem:[%s10401_s14 + $0xc0] sm:$0xff] }
0x1484   : > { %v11210_v50 = vsub.f32 %v6556_v18, %v6575_v51  ;;  %v6590_v46 = vsel %vm836_vm1, %v6582_v47, 0.0  ;;  %v6653_v18 = vld [vmem:[%s10401_s14 + $0xa8] sm:$0xff]  ;;  %v6658_v51 = vld [vmem:[%s10401_s14 + $0xd0] sm:$0xff] }
0x1485   : > { %6591 = vadd.xlane.f32.xlu1 %v6590_v46  ;;  %v6641_v47 = vld [vmem:[%s10401_s14 + $0x48] sm:$0xff]  ;;  %v6640_v46 = vld [vmem:[%s10401_s14 + $0x40] sm:$0xff] }
0x1486   : > { %v6583_v53 = vmul.f32 %v11210_v50, %v11210_v50 }
0x1488   : > { %v6593_v4 = vsel %vm836_vm1, %v6583_v53, 0.0  ;;  %v6642_v53 = vld [vmem:[%s10401_s14 + $0x50] sm:$0xff] }
0x1489   : > { %6594 = vadd.xlane.f32.xlu0 %v6593_v4  ;;  %v6693_v4 = vld [vmem:[%s10401_s14 + $0x1e8] sm:$0xff] }
0x14d9   : > { %v6589_v26 = vpop.xlane.xlu0 %6588 }
0x14da   : > { %v6597_v29 = vmul.f32 0.03125, %v6589_v26  ;;  %v6694_v26 = vld [vmem:[%s10401_s14 + $0x1f0] sm:$0xff] }
0x14db   : > { %v6586_v32 = vpop.xlane.xlu1 %6585 }
0x14dc   : > { %v6601_v34 = vadd.f32 1e-05, %v6597_v29  ;;  %v6596_v37 = vmul.f32 0.03125, %v6586_v32  ;;  %v6677_v29 = vld [vmem:[%s10401_s14 + $0x168] sm:$0xff]  ;;  %v6679_v32 = vld [vmem:[%s10401_s14 + $0x178] sm:$0xff] }
0x14de   : > { %10164 = vrsqrt.f32 %v6601_v34  ;;  %v6600_v39 = vadd.f32 1e-05, %v6596_v37  ;;  %v6676_v34 = vld [vmem:[%s10401_s14 + $0x160] sm:$0xff]  ;;  %v6678_v37 = vld [vmem:[%s10401_s14 + $0x170] sm:$0xff] }
0x14e0   : > { %10166 = vrsqrt.f32 %v6600_v39  ;;  %v6661_v39 = vld [vmem:[%s10401_s14 + $0xe8] sm:$0xff] }
0x14eb   : > { %v10165_v42 = vpop.eup %10164 }
0x14ec   : > { %v6609_v35 = vmul.f32 %v10165_v42, %v11180_v2  ;;  %v6636_v2 = vld [vmem:[%s10401_s14 + $0x20] sm:$0xff]  ;;  %v6663_v42 = vld [vmem:[%s10401_s14 + $0xf8] sm:$0xff] }
0x14ed   : > { %v10167_v31 = vpop.eup %10166 }
0x14ee   : > { %v6608_v33 = vmul.f32 %v10167_v31, %v11182_v8  ;;  %v6619_v44 = vmul.f32 %v9068_v0, %v6609_v35  ;;  %v6689_v8 = vld [vmem:[%s10401_s14 + $0x1c8] sm:$0xff]  ;;  %v6660_v31 = vld [vmem:[%s10401_s14 + $0xe0] sm:$0xff]  ;;  %v6662_v35 = vld [vmem:[%s10401_s14 + $0xf0] sm:$0xff] }
0x14f0   : > { %v6618_v52 = vmul.f32 %v9068_v0, %v6608_v33  ;;  %v11246_v55 = vadd.f32 %v11230_v56, %v6619_v44  ;;  %v6645_v33 = vld [vmem:[%s10401_s14 + $0x68] sm:$0xff]  ;;  %v7599_v44 = vld [vmem:[%s10413_s18 + $0xf8] sm:$0xff] }
0x14f2   : > { %v11233_v45 = vadd.f32 %v11230_v56, %v6618_v52  ;;  %v6644_v52 = vld [vmem:[%s10401_s14 + $0x60] sm:$0xff] }
0x14f4   : > { %9070 = vmatmul.mubr.msk.f32.vlgmr.msra.gmra.mxu0 %vm836_vm1, %v11233_v45  ;;  %9074 = vmatmul.mubr.msk.f32.vlgmr.msra.gmra.mxu1 %vm836_vm1, %v11233_v45 }
0x14f5   : > { %6862 = vmatprep.mubr.f32.mxu0 %v10213_v13  ;;  %6951 = vmatprep.mubr.f32.mxu1 %v10213_v13 }
0x14f6   : > { %6995 = vmatpush1.msra.mxu0 %v6684_v54  ;;  %7084 = vmatpush1.msra.mxu1 %v6686_v7  ;;  %v7631_v54 = vld [vmem:[%s10413_s18 + $0x1f8] sm:$0xff] }
0x14f7   : > { %6996 = vmatprep.subr.mxu0 %v6669_v48  ;;  %7085 = vmatprep.subr.mxu1 %v6671_v58  ;;  %v7583_v7 = vld [vmem:[%s10413_s18 + $0x78] sm:$0xff]  ;;  %v7598_v58 = vld [vmem:[%s10413_s18 + $0xf0] sm:$0xff] }
0x14f8   : > { %9071 = vmatmul.mubr.msk.f32.gmra.mxu0 %vm836_vm1, %v11246_v55  ;;  %9075 = vmatmul.mubr.msk.f32.gmra.mxu1 %vm836_vm1, %v11246_v55  ;;  %v7615_v48 = vld [vmem:[%s10413_s18 + $0x178] sm:$0xff] }
0x14f9   : > { %6997 = vmatpush1.msra.mxu0 %v6668_v57  ;;  %7086 = vmatpush1.msra.mxu1 %v6670_v5  ;;  %v7630_v57 = vld [vmem:[%s10413_s18 + $0x1f0] sm:$0xff] }
0x14fa   : > { %6868 = vmatprep.mubr.f32.mxu0 %v10213_v13  ;;  %6957 = vmatprep.mubr.f32.mxu1 %v10213_v13  ;;  %v7582_v5 = vld [vmem:[%s10413_s18 + $0x70] sm:$0xff] }
0x14fb   : > { %6998 = vmatprep.subr.mxu0 %v6653_v18  ;;  %7087 = vmatprep.subr.mxu1 %v6655_v9  ;;  %v7614_v18 = vld [vmem:[%s10413_s18 + $0x170] sm:$0xff]  ;;  %v7597_v9 = vld [vmem:[%s10413_s18 + $0xe8] sm:$0xff] }
0x14fc   : > { %6999 = vmatpush1.msra.mxu0 %v6652_v59  ;;  %7088 = vmatpush1.msra.mxu1 %v6654_v60  ;;  %v7629_v59 = vld [vmem:[%s10413_s18 + $0x1e8] sm:$0xff] }
0x14fd   : > { %7000 = vmatprep.subr.mxu0 %v6637_v40  ;;  %7089 = vmatprep.subr.mxu1 %v6639_v23  ;;  %v7581_v60 = vld [vmem:[%s10413_s18 + $0x68] sm:$0xff]  ;;  %v7596_v23 = vld [vmem:[%s10413_s18 + $0xe0] sm:$0xff] }
0x14fe   : > { %7001 = vmatpush1.msra.mxu0 %v6636_v2  ;;  %7090 = vmatpush1.msra.mxu1 %v6638_v6  ;;  %v7613_v40 = vld [vmem:[%s10413_s18 + $0x168] sm:$0xff]  ;;  %v7628_v2 = vld [vmem:[%s10413_s18 + $0x1e0] sm:$0xff] }
0x14ff   : > { %7172 = vmatprep.subr.mxu0 %v6689_v8  ;;  %7261 = vmatprep.subr.mxu1 %v6691_v10  ;;  %v7580_v6 = vld [vmem:[%s10413_s18 + $0x60] sm:$0xff]  ;;  %v7595_v10 = vld [vmem:[%s10413_s18 + $0xd8] sm:$0xff] }
0x1500   : > { %v7612_v8 = vld [vmem:[%s10413_s18 + $0x160] sm:$0xff] }
0x150e   : > { %v6592_v38 = vpop.xlane.xlu1 %6591 }
0x150f   : > { %v6598_v11 = vmul.f32 0.03125, %v6592_v38  ;;  %v7627_v38 = vld [vmem:[%s10413_s18 + $0x1d8] sm:$0xff] }
0x1511   : > { %v6602_v36 = vadd.f32 1e-05, %v6598_v11  ;;  %v7611_v11 = vld [vmem:[%s10413_s18 + $0x158] sm:$0xff] }
0x1512   : > { %v6595_v12 = vpop.xlane.xlu0 %6594 }
0x1513   : > { %10168 = vrsqrt.f32 %v6602_v36  ;;  %v6599_v14 = vmul.f32 0.03125, %v6595_v12  ;;  %v7594_v36 = vld [vmem:[%s10413_s18 + $0xd0] sm:$0xff] }
0x1514   : > { %v7626_v12 = vld [vmem:[%s10413_s18 + $0x1d0] sm:$0xff] }
0x1515   : > { %v6603_v15 = vadd.f32 1e-05, %v6599_v14  ;;  %v7578_v14 = vld [vmem:[%s10413_s18 + $0x50] sm:$0xff] }
0x1517   : > { %10170 = vrsqrt.f32 %v6603_v15  ;;  %v7610_v15 = vld [vmem:[%s10413_s18 + $0x150] sm:$0xff] }
0x1520   : > { %v10169_v41 = vpop.eup %10168 }
0x1521   : > { %v6610_v16 = vmul.f32 %v10169_v41, %v11206_v3  ;;  %v6659_v3 = vld [vmem:[%s10401_s14 + $0xd8] sm:$0xff]  ;;  %v7593_v41 = vld [vmem:[%s10413_s18 + $0xc8] sm:$0xff] }
0x1523   : > { %v6620_v19 = vmul.f32 %v9068_v0, %v6610_v16  ;;  %v7625_v16 = vld [vmem:[%s10413_s18 + $0x1c8] sm:$0xff] }
0x1524   : > { %v10171_v24 = vpop.eup %10170 }
0x1525   : > { %v11268_v17 = vadd.f32 %v11230_v56, %v6620_v19  ;;  %v6611_v20 = vmul.f32 %v10171_v24, %v11210_v50  ;;  %v6643_v50 = vld [vmem:[%s10401_s14 + $0x58] sm:$0xff]  ;;  %v7577_v19 = vld [vmem:[%s10413_s18 + $0x48] sm:$0xff] }
0x1526   : > { %v7609_v24 = vld [vmem:[%s10413_s18 + $0x148] sm:$0xff] }
0x1527   : > { %v6621_v21 = vmul.f32 %v9068_v0, %v6611_v20  ;;  %9072 = vmatmul.mubr.msk.f32.gmra.mxu0 %vm836_vm1, %v11268_v17  ;;  %9076 = vmatmul.mubr.msk.f32.gmra.mxu1 %vm836_vm1, %v11268_v17  ;;  %v6647_v0 = vld [vmem:[%s10401_s14 + $0x78] sm:$0xff]  ;;  %v7592_v20 = vld [vmem:[%s10413_s18 + $0xc0] sm:$0xff] }
0x1528   : > { %6874 = vmatprep.mubr.f32.mxu0 %v10213_v13  ;;  %6963 = vmatprep.mubr.f32.mxu1 %v10213_v13 }
0x1529   : > { %v11278_v22 = vadd.f32 %v11230_v56, %v6621_v21  ;;  %v6646_v56 = vld [vmem:[%s10401_s14 + $0x70] sm:$0xff]  ;;  %v7624_v21 = vld [vmem:[%s10413_s18 + $0x1c0] sm:$0xff]  ;;  %s11972_s14 = sld [smem:[#allocation15_spill]] (!%p9105_p6) }
0x152b   : > { %11968 = vst [vmem:[#allocation7_spill] sm:$0xff] %v11278_v22  ;;  %9073 = vmatmul.mubr.msk.f32.gmra.mxu0 %vm836_vm1, %v11278_v22  ;;  %9077 = vmatmul.mubr.msk.f32.gmra.mxu1 %vm836_vm1, %v11278_v22 }
0x152c   : > { %7034 = vmatprep.mubr.f32.mxu0 %v10213_v13  ;;  %7123 = vmatprep.mubr.f32.mxu1 %v10213_v13 }
0x152f   : > { %9078 = vmatmul.mubr.msk.f32.vlgmr.msra.gmra.mxu0 %vm836_vm1, %v11233_v45  ;;  %9082 = vmatmul.mubr.msk.f32.vlgmr.msra.gmra.mxu1 %vm836_vm1, %v11233_v45 }
0x1530   : > { %7040 = vmatprep.mubr.f32.mxu0 %v10213_v13  ;;  %7129 = vmatprep.mubr.f32.mxu1 %v10213_v13 }
0x1531   : > { %7173 = vmatpush1.msra.mxu0 %v6688_v61  ;;  %7262 = vmatpush1.msra.mxu1 %v6690_v63  ;;  %v7576_v61 = vld [vmem:[%s10413_s18 + $0x40] sm:$0xff] }
0x1532   : > { %7174 = vmatprep.subr.mxu0 %v6673_v1  ;;  %7263 = vmatprep.subr.mxu1 %v6675_v27  ;;  %v7608_v63 = vld [vmem:[%s10413_s18 + $0x140] sm:$0xff]  ;;  %v7591_v1 = vld [vmem:[%s10413_s18 + $0xb8] sm:$0xff] }
0x1533   : > { %9079 = vmatmul.mubr.msk.f32.gmra.mxu0 %vm836_vm1, %v11246_v55  ;;  %9083 = vmatmul.mubr.msk.f32.gmra.mxu1 %vm836_vm1, %v11246_v55  ;;  %v7623_v27 = vld [vmem:[%s10413_s18 + $0x1b8] sm:$0xff] }
0x1534   : > { %7046 = vmatprep.mubr.f32.mxu0 %v10213_v13  ;;  %7135 = vmatprep.mubr.f32.mxu1 %v10213_v13 }
0x1535   : > { %7175 = vmatpush1.msra.mxu0 %v6672_v30  ;;  %7264 = vmatpush1.msra.mxu1 %v6674_v28  ;;  %v7575_v30 = vld [vmem:[%s10413_s18 + $0x38] sm:$0xff] }
0x1536   : > { %7176 = vmatprep.subr.mxu0 %v6657_v62  ;;  %7265 = vmatprep.subr.mxu1 %v6659_v3  ;;  %v7607_v28 = vld [vmem:[%s10413_s18 + $0x138] sm:$0xff]  ;;  %v7590_v62 = vld [vmem:[%s10413_s18 + $0xb0] sm:$0xff] }
0x1537   : > { %9080 = vmatmul.mubr.msk.f32.gmra.mxu0 %vm836_vm1, %v11268_v17  ;;  %9084 = vmatmul.mubr.msk.f32.gmra.mxu1 %vm836_vm1, %v11268_v17  ;;  %v7622_v3 = vld [vmem:[%s10413_s18 + $0x1b0] sm:$0xff] }
0x1538   : > { %7052 = vmatprep.mubr.f32.mxu0 %v10213_v13  ;;  %7141 = vmatprep.mubr.f32.mxu1 %v10213_v13 }
0x1539   : > { %7177 = vmatpush1.msra.mxu0 %v6656_v49  ;;  %7266 = vmatpush1.msra.mxu1 %v6658_v51  ;;  %v7574_v49 = vld [vmem:[%s10413_s18 + $0x30] sm:$0xff] }
0x153a   : > { %7178 = vmatprep.subr.mxu0 %v6641_v47  ;;  %7267 = vmatprep.subr.mxu1 %v6643_v50  ;;  %v7606_v51 = vld [vmem:[%s10413_s18 + $0x130] sm:$0xff]  ;;  %v7589_v47 = vld [vmem:[%s10413_s18 + $0xa8] sm:$0xff] }
0x153b   : > { %9081 = vmatmul.mubr.msk.f32.gmra.mxu0 %vm836_vm1, %v11278_v22  ;;  %9085 = vmatmul.mubr.msk.f32.gmra.mxu1 %vm836_vm1, %v11278_v22  ;;  %v7621_v50 = vld [vmem:[%s10413_s18 + $0x1a8] sm:$0xff] }
0x153c   : > { %7179 = vmatpush1.msra.mxu0 %v6640_v46  ;;  %7212 = vmatprep.mubr.f32.mxu0 %v10213_v13  ;;  %v7573_v46 = vld [vmem:[%s10413_s18 + $0x28] sm:$0xff] }
0x153d   : > { %7268 = vmatpush1.msra.mxu1 %v6642_v53  ;;  %7301 = vmatprep.mubr.f32.mxu1 %v10213_v13  ;;  %v7605_v53 = vld [vmem:[%s10413_s18 + $0x128] sm:$0xff] }
0x153e   : > { %7350 = vmatprep.subr.mxu0 %v6693_v4  ;;  %7439 = vmatprep.subr.mxu1 %v6695_v25  ;;  %v7588_v4 = vld [vmem:[%s10413_s18 + $0xa0] sm:$0xff] }
0x153f   : > { %9086 = vmatmul.mubr.msk.f32.vlgmr.msra.gmra.mxu0 %vm836_vm1, %v11233_v45  ;;  %9090 = vmatmul.mubr.msk.f32.vlgmr.msra.gmra.mxu1 %vm836_vm1, %v11233_v45  ;;  %v7620_v25 = vld [vmem:[%s10413_s18 + $0x1a0] sm:$0xff] }
0x1540   : > { %7218 = vmatprep.mubr.f32.mxu0 %v10213_v13  ;;  %7307 = vmatprep.mubr.f32.mxu1 %v10213_v13 }
0x1541   : > { %7351 = vmatpush1.msra.mxu0 %v6692_v43  ;;  %7440 = vmatpush1.msra.mxu1 %v6694_v26  ;;  %v7572_v43 = vld [vmem:[%s10413_s18 + $0x20] sm:$0xff] }
0x1542   : > { %7352 = vmatprep.subr.mxu0 %v6677_v29  ;;  %7441 = vmatprep.subr.mxu1 %v6679_v32  ;;  %v7604_v26 = vld [vmem:[%s10413_s18 + $0x120] sm:$0xff]  ;;  %v7587_v29 = vld [vmem:[%s10413_s18 + $0x98] sm:$0xff] }
0x1543   : > { %9087 = vmatmul.mubr.msk.f32.gmra.mxu0 %vm836_vm1, %v11246_v55  ;;  %9091 = vmatmul.mubr.msk.f32.gmra.mxu1 %vm836_vm1, %v11246_v55  ;;  %v7619_v32 = vld [vmem:[%s10413_s18 + $0x198] sm:$0xff] }
0x1544   : > { %7224 = vmatprep.mubr.f32.mxu0 %v10213_v13  ;;  %7313 = vmatprep.mubr.f32.mxu1 %v10213_v13 }
0x1545   : > { %7353 = vmatpush1.msra.mxu0 %v6676_v34  ;;  %7442 = vmatpush1.msra.mxu1 %v6678_v37  ;;  %v7571_v34 = vld [vmem:[%s10413_s18 + $0x18] sm:$0xff] }
0x1546   : > { %7354 = vmatprep.subr.mxu0 %v6661_v39  ;;  %7443 = vmatprep.subr.mxu1 %v6663_v42  ;;  %v7603_v37 = vld [vmem:[%s10413_s18 + $0x118] sm:$0xff]  ;;  %v7586_v39 = vld [vmem:[%s10413_s18 + $0x90] sm:$0xff] }
0x1547   : > { %9088 = vmatmul.mubr.msk.f32.gmra.mxu0 %vm836_vm1, %v11268_v17  ;;  %9092 = vmatmul.mubr.msk.f32.gmra.mxu1 %vm836_vm1, %v11268_v17  ;;  %v7618_v42 = vld [vmem:[%s10413_s18 + $0x190] sm:$0xff] }
0x1548   : > { %7230 = vmatprep.mubr.f32.mxu0 %v10213_v13  ;;  %7319 = vmatprep.mubr.f32.mxu1 %v10213_v13 }
0x1549   : > { %7355 = vmatpush1.msra.mxu0 %v6660_v31  ;;  %7444 = vmatpush1.msra.mxu1 %v6662_v35  ;;  %v7570_v31 = vld [vmem:[%s10413_s18 + $0x10] sm:$0xff] }
0x154a   : > { %7356 = vmatprep.subr.mxu0 %v6645_v33  ;;  %7445 = vmatprep.subr.mxu1 %v6647_v0  ;;  %v7602_v35 = vld [vmem:[%s10413_s18 + $0x110] sm:$0xff]  ;;  %v7585_v33 = vld [vmem:[%s10413_s18 + $0x88] sm:$0xff] }
0x154b   : > { %9089 = vmatmul.mubr.msk.f32.gmra.mxu0 %vm836_vm1, %v11278_v22  ;;  %9093 = vmatmul.mubr.msk.f32.gmra.mxu1 %vm836_vm1, %v11278_v22  ;;  %v7617_v0 = vld [vmem:[%s10413_s18 + $0x188] sm:$0xff] }
0x154c   : > { %7357 = vmatpush1.msra.mxu0 %v6644_v52  ;;  %7390 = vmatprep.mubr.f32.mxu0 %v10213_v13  ;;  %v7569_v52 = vld [vmem:[%s10413_s18 + $0x8] sm:$0xff] }
0x154d   : > { %7446 = vmatpush1.msra.mxu1 %v6646_v56  ;;  %7479 = vmatprep.mubr.f32.mxu1 %v10213_v13  ;;  %v7601_v56 = vld [vmem:[%s10413_s18 + $0x108] sm:$0xff] }
0x154e   : > { %9261 = vmatprep.subr.mxu0 %v7599_v44  ;;  %9305 = vmatprep.subr.mxu1 %v7631_v54  ;;  %v7584_v44 = vld [vmem:[%s10413_s18 + $0x80] sm:$0xff] }
0x154f   : > { %9094 = vmatmul.mubr.msk.f32.vlgmr.msra.gmra.mxu0 %vm836_vm1, %v11233_v45  ;;  %9098 = vmatmul.mubr.msk.f32.vlgmr.msra.gmra.mxu1 %vm836_vm1, %v11233_v45  ;;  %v7616_v54 = vld [vmem:[%s10413_s18 + $0x180] sm:$0xff] }
0x1550   : > { %7396 = vmatprep.mubr.f32.mxu0 %v10213_v13  ;;  %7485 = vmatprep.mubr.f32.mxu1 %v10213_v13 }
0x1551   : > { %9262 = vmatpush3.msra.mxu0 %v7583_v7  ;;  %9306 = vmatpush3.msra.mxu1 %v7615_v48  ;;  %v7568_v7 = vld [vmem:[%s10413_s18] sm:$0xff] }
0x1552   : > { %9263 = vmatprep.subr.mxu0 %v7598_v58  ;;  %9307 = vmatprep.subr.mxu1 %v7630_v57  ;;  %v7600_v48 = vld [vmem:[%s10413_s18 + $0x100] sm:$0xff]  ;;  %v7663_v58 = vld [vmem:[%s10413_s18 + $0x2f8] sm:$0xff] }
0x1553   : > { %9095 = vmatmul.mubr.msk.f32.gmra.mxu0 %vm836_vm1, %v11246_v55  ;;  %9099 = vmatmul.mubr.msk.f32.gmra.mxu1 %vm836_vm1, %v11246_v55  ;;  %v7695_v57 = vld [vmem:[%s10413_s18 + $0x3f8] sm:$0xff] }
0x1554   : > { %7402 = vmatprep.mubr.f32.mxu0 %v10213_v13  ;;  %7491 = vmatprep.mubr.f32.mxu1 %v10213_v13 }
0x1555   : > { %9264 = vmatpush3.msra.mxu0 %v7582_v5  ;;  %9308 = vmatpush3.msra.mxu1 %v7614_v18  ;;  %v6700_v5 = vlaneseq }
0x1556   : > { %9265 = vmatprep.subr.mxu0 %v7597_v9  ;;  %9309 = vmatprep.subr.mxu1 %v7629_v59 }
0x1557   : > { %9096 = vmatmul.mubr.msk.f32.gmra.mxu0 %vm836_vm1, %v11268_v17  ;;  %9100 = vmatmul.mubr.msk.f32.gmra.mxu1 %vm836_vm1, %v11268_v17  ;;  %v11452_v18 = vshrl.u32 %v6700_v5, 7  ;;  %v7673_v5 = vld [vmem:[%s10413_s18 + $0x348] sm:$0xff] }
0x1558   : > { %7408 = vmatprep.mubr.f32.mxu0 %v10213_v13  ;;  %7497 = vmatprep.mubr.f32.mxu1 %v10213_v13  ;;  %v7579_v13 = vld [vmem:[%s10413_s18 + $0x58] sm:$0xff] }
0x1559   : > { %9266 = vmatpush3.msra.mxu0 %v7581_v60  ;;  %9310 = vmatpush3.msra.mxu1 %v7613_v40  ;;  %v6702_v9 = vsub.s32 0, %v11452_v18  ;;  %v6710_v59 = vsub.s32 2, %v11452_v18  ;;  %v11457_v60 = vld [vmem:[%s10407_s30] sm:$0xff]  ;;  %v6706_v40 = vsub.s32 1, %v11452_v18 }
0x155a   : > { %9267 = vmatprep.subr.mxu0 %v7596_v23  ;;  %9311 = vmatprep.subr.mxu1 %v7628_v2  ;;  %v6714_v23 = vsub.s32 3, %v11452_v18 }
0x155b   : > { %9097 = vmatmul.mubr.msk.f32.gmra.mxu0 %vm836_vm1, %v11278_v22  ;;  %9101 = vmatmul.mubr.msk.f32.gmra.mxu1 %vm836_vm1, %v11278_v22  ;;  %v11464_v2 = vrot.slane %v11457_v60, %v6702_v9 }
0x155c   : > { %9268 = vmatpush3.msra.mxu0 %v7580_v6  ;;  %9312 = vmatpush3.msra.mxu1 %v7612_v8  ;;  %v11469_v6 = vrot.slane %v11457_v60, %v6710_v59  ;;  %v11474_v8 = vrot.slane %v11457_v60, %v6706_v40 }
0x155d   : > { %9269 = vmatprep.subr.mxu0 %v7595_v10  ;;  %9313 = vmatprep.subr.mxu1 %v7627_v38  ;;  %v11479_v10 = vrot.slane %v11457_v60, %v6714_v23 }
0x155e   : > { %9270 = vmatpush3.msra.mxu0 %v7579_v13  ;;  %9314 = vmatpush3.msra.mxu1 %v7611_v11 }
0x155f   : > { %9271 = vmatprep.subr.mxu0 %v7594_v36  ;;  %9315 = vmatprep.subr.mxu1 %v7626_v12 }
0x1560   : > { %9272 = vmatpush3.msra.mxu0 %v7578_v14  ;;  %9316 = vmatpush3.msra.mxu1 %v7610_v15 }
0x1561   : > { %9273 = vmatprep.subr.mxu0 %v7593_v41  ;;  %9317 = vmatprep.subr.mxu1 %v7625_v16 }
0x1562   : > { %9274 = vmatpush3.msra.mxu0 %v7577_v19  ;;  %9318 = vmatpush3.msra.mxu1 %v7609_v24 }
0x1563   : > { %9275 = vmatprep.subr.mxu0 %v7592_v20  ;;  %9319 = vmatprep.subr.mxu1 %v7624_v21 }
0x1564   : > { %9276 = vmatpush3.msra.mxu0 %v7576_v61  ;;  %9320 = vmatpush3.msra.mxu1 %v7608_v63 }
0x1565   : > { %9277 = vmatprep.subr.mxu0 %v7591_v1  ;;  %9321 = vmatprep.subr.mxu1 %v7623_v27 }
0x1566   : > { %9278 = vmatpush3.msra.mxu0 %v7575_v30  ;;  %9322 = vmatpush3.msra.mxu1 %v7607_v28  ;;  %v7647_v28 = vld [vmem:[%s10413_s18 + $0x278] sm:$0xff] }
0x1567   : > { %9279 = vmatprep.subr.mxu0 %v7590_v62  ;;  %9323 = vmatprep.subr.mxu1 %v7622_v3  ;;  %v7679_v62 = vld [vmem:[%s10413_s18 + $0x378] sm:$0xff] }
0x1568   : > { %9280 = vmatpush3.msra.mxu0 %v7574_v49  ;;  %9324 = vmatpush3.msra.mxu1 %v7606_v51  ;;  %v7662_v51 = vld [vmem:[%s10413_s18 + $0x2f0] sm:$0xff] }
0x1569   : > { %9281 = vmatprep.subr.mxu0 %v7589_v47  ;;  %9325 = vmatprep.subr.mxu1 %v7621_v50  ;;  %v7694_v47 = vld [vmem:[%s10413_s18 + $0x3f0] sm:$0xff] }
0x156a   : > { %9282 = vmatpush3.msra.mxu0 %v7573_v46  ;;  %9326 = vmatpush3.msra.mxu1 %v7605_v53 }
0x156b   : > { %9283 = vmatprep.subr.mxu0 %v7588_v4  ;;  %9327 = vmatprep.subr.mxu1 %v7620_v25  ;;  %v7646_v25 = vld [vmem:[%s10413_s18 + $0x270] sm:$0xff] }
0x156c   : > { %9284 = vmatpush3.msra.mxu0 %v7572_v43  ;;  %9328 = vmatpush3.msra.mxu1 %v7604_v26  ;;  %v7678_v43 = vld [vmem:[%s10413_s18 + $0x370] sm:$0xff]  ;;  %v7661_v26 = vld [vmem:[%s10413_s18 + $0x2e8] sm:$0xff] }
0x156d   : > { %9285 = vmatprep.subr.mxu0 %v7587_v29  ;;  %9329 = vmatprep.subr.mxu1 %v7619_v32  ;;  %v7693_v29 = vld [vmem:[%s10413_s18 + $0x3e8] sm:$0xff] }
0x156e   : > { %9286 = vmatpush3.msra.mxu0 %v7571_v34  ;;  %9330 = vmatpush3.msra.mxu1 %v7603_v37  ;;  %v7645_v32 = vld [vmem:[%s10413_s18 + $0x268] sm:$0xff]  ;;  %v7660_v37 = vld [vmem:[%s10413_s18 + $0x2e0] sm:$0xff] }
0x156f   : > { %9287 = vmatprep.subr.mxu0 %v7586_v39  ;;  %9331 = vmatprep.subr.mxu1 %v7618_v42  ;;  %v7677_v34 = vld [vmem:[%s10413_s18 + $0x368] sm:$0xff]  ;;  %v7692_v39 = vld [vmem:[%s10413_s18 + $0x3e0] sm:$0xff] }
0x1570   : > { %9288 = vmatpush3.msra.mxu0 %v7570_v31  ;;  %9332 = vmatpush3.msra.mxu1 %v7602_v35  ;;  %v7644_v42 = vld [vmem:[%s10413_s18 + $0x260] sm:$0xff]  ;;  %v7659_v35 = vld [vmem:[%s10413_s18 + $0x2d8] sm:$0xff] }
0x1571   : > { %9289 = vmatprep.subr.mxu0 %v7585_v33  ;;  %9333 = vmatprep.subr.mxu1 %v7617_v0  ;;  %v7676_v31 = vld [vmem:[%s10413_s18 + $0x360] sm:$0xff]  ;;  %v7691_v33 = vld [vmem:[%s10413_s18 + $0x3d8] sm:$0xff] }
0x1572   : > { %9290 = vmatpush3.msra.mxu0 %v7569_v52  ;;  %9334 = vmatpush3.msra.mxu1 %v7601_v56  ;;  %v7643_v0 = vld [vmem:[%s10413_s18 + $0x258] sm:$0xff]  ;;  %v7658_v56 = vld [vmem:[%s10413_s18 + $0x2d0] sm:$0xff] }
0x1573   : > { %9291 = vmatprep.subr.mxu0 %v7584_v44  ;;  %9335 = vmatprep.subr.mxu1 %v7616_v54  ;;  %v7675_v52 = vld [vmem:[%s10413_s18 + $0x358] sm:$0xff]  ;;  %v7690_v44 = vld [vmem:[%s10413_s18 + $0x3d0] sm:$0xff] }
0x1574   : > { %9292 = vmatpush3.msra.mxu0 %v7568_v7  ;;  %9336 = vmatpush3.msra.mxu1 %v7600_v48  ;;  %v7642_v54 = vld [vmem:[%s10413_s18 + $0x250] sm:$0xff]  ;;  %v7657_v48 = vld [vmem:[%s10413_s18 + $0x2c8] sm:$0xff] }
0x1575   : > { %9349 = vmatprep.subr.mxu0 %v7663_v58  ;;  %9393 = vmatprep.subr.mxu1 %v7695_v57  ;;  %v7674_v7 = vld [vmem:[%s10413_s18 + $0x350] sm:$0xff]  ;;  %v7689_v58 = vld [vmem:[%s10413_s18 + $0x3c8] sm:$0xff] }
0x1576   : > { %v7641_v57 = vld [vmem:[%s10413_s18 + $0x248] sm:$0xff] }
0x15b4   : > { %v6858_v38 = vpop.f32.mrf.mxu0  ;;  %v6947_v13 = vpop.f32.mrf.mxu1 }
0x15b5   : > { %v6859_v11 = vadd.f32 %v6858_v38, %v11464_v2  ;;  %v6948_v36 = vadd.f32 %v6947_v13, %v11469_v6  ;;  %v7656_v38 = vld [vmem:[%s10413_s18 + $0x2c0] sm:$0xff] }
0x15b6   : > { %v6860_v12 = vpop.f32.mrf.mxu0  ;;  %v6949_v14 = vpop.f32.mrf.mxu1  ;;  %v7688_v13 = vld [vmem:[%s10413_s18 + $0x3c0] sm:$0xff] }
0x15b7   : > { %v6861_v15 = vadd.f32 %v6860_v12, %v11474_v8  ;;  %v6950_v41 = vadd.f32 %v6949_v14, %v11479_v10  ;;  %v7504_v21 = vmax.f32 %v6859_v11, 0.0  ;;  %v7506_v61 = vmax.f32 %v6948_v36, 0.0  ;;  %v7640_v11 = vld [vmem:[%s10413_s18 + $0x240] sm:$0xff]  ;;  %v7655_v12 = vld [vmem:[%s10413_s18 + $0x2b8] sm:$0xff] }
0x15b8   : > { %v6864_v16 = vpop.f32.mrf.mxu0  ;;  %v6953_v19 = vpop.f32.mrf.mxu1  ;;  %v7672_v36 = vld [vmem:[%s10413_s18 + $0x340] sm:$0xff]  ;;  %v7687_v14 = vld [vmem:[%s10413_s18 + $0x3b8] sm:$0xff] }
0x15b9   : > { %v7505_v24 = vmax.f32 %v6861_v15, 0.0  ;;  %v7507_v20 = vmax.f32 %v6950_v41, 0.0  ;;  %v6865_v63 = vadd.f32 %v6864_v16, %v11464_v2  ;;  %v6954_v1 = vadd.f32 %v6953_v19, %v11469_v6  ;;  %v7639_v15 = vld [vmem:[%s10413_s18 + $0x238] sm:$0xff]  ;;  %v7654_v16 = vld [vmem:[%s10413_s18 + $0x2b0] sm:$0xff] }
0x15ba   : > { %v6866_v27 = vpop.f32.mrf.mxu0  ;;  %v6955_v30 = vpop.f32.mrf.mxu1  ;;  %v7671_v41 = vld [vmem:[%s10413_s18 + $0x338] sm:$0xff]  ;;  %v7686_v19 = vld [vmem:[%s10413_s18 + $0x3b0] sm:$0xff] }
0x15bb   : > { %v6867_v3 = vadd.f32 %v6866_v27, %v11474_v8  ;;  %v6956_v49 = vadd.f32 %v6955_v30, %v11479_v10  ;;  %7895 = vmatprep.mubr.f32.mxu0 %v7505_v24  ;;  %7980 = vmatprep.mubr.f32.mxu1 %v7507_v20  ;;  %v7520_v53 = vmax.f32 %v6865_v63, 0.0  ;;  %v7522_v4 = vmax.f32 %v6954_v1, 0.0  ;;  %v7638_v24 = vld [vmem:[%s10413_s18 + $0x230] sm:$0xff]  ;;  %v7637_v63 = vld [vmem:[%s10413_s18 + $0x228] sm:$0xff]  ;;  %v7652_v27 = vld [vmem:[%s10413_s18 + $0x2a0] sm:$0xff] }
0x15bc   : > { %7896 = vmatmul.mubr.f32.vlgmr.msra.gmra.mxu0 %v7504_v21  ;;  %7981 = vmatmul.mubr.f32.vlgmr.msra.gmra.mxu1 %v7506_v61  ;;  %v7670_v20 = vld [vmem:[%s10413_s18 + $0x330] sm:$0xff]  ;;  %v7653_v21 = vld [vmem:[%s10413_s18 + $0x2a8] sm:$0xff]  ;;  %v7684_v30 = vld [vmem:[%s10413_s18 + $0x3a0] sm:$0xff] }
0x15bd   : > { %v7521_v50 = vmax.f32 %v6867_v3, 0.0  ;;  %v7523_v46 = vmax.f32 %v6956_v49, 0.0  ;;  %9350 = vmatpush3.msra.mxu0 %v7647_v28  ;;  %9394 = vmatpush3.msra.mxu1 %v7679_v62  ;;  %v7685_v61 = vld [vmem:[%s10413_s18 + $0x3a8] sm:$0xff]  ;;  %v7636_v28 = vld [vmem:[%s10413_s18 + $0x220] sm:$0xff]  ;;  %v7651_v3 = vld [vmem:[%s10413_s18 + $0x298] sm:$0xff] }
0x15be   : > { %9351 = vmatprep.subr.mxu0 %v7662_v51  ;;  %9395 = vmatprep.subr.mxu1 %v7694_v47  ;;  %v7669_v1 = vld [vmem:[%s10413_s18 + $0x328] sm:$0xff]  ;;  %v7668_v62 = vld [vmem:[%s10413_s18 + $0x320] sm:$0xff]  ;;  %v7683_v49 = vld [vmem:[%s10413_s18 + $0x398] sm:$0xff] }
0x15bf   : > { %7900 = vmatprep.mubr.f32.mxu0 %v7521_v50  ;;  %7985 = vmatprep.mubr.f32.mxu1 %v7523_v46  ;;  %v7635_v51 = vld [vmem:[%s10413_s18 + $0x218] sm:$0xff]  ;;  %v7650_v50 = vld [vmem:[%s10413_s18 + $0x290] sm:$0xff] }
0x15c0   : > { %7901 = vmatmul.mubr.f32.gmra.mxu0 %v7520_v53  ;;  %7986 = vmatmul.mubr.f32.gmra.mxu1 %v7522_v4  ;;  %v7667_v47 = vld [vmem:[%s10413_s18 + $0x318] sm:$0xff]  ;;  %v7682_v46 = vld [vmem:[%s10413_s18 + $0x390] sm:$0xff] }
0x15c1   : > { %9352 = vmatpush3.msra.mxu0 %v7646_v25  ;;  %9396 = vmatpush3.msra.mxu1 %v7678_v43  ;;  %v7634_v53 = vld [vmem:[%s10413_s18 + $0x210] sm:$0xff]  ;;  %v7649_v25 = vld [vmem:[%s10413_s18 + $0x288] sm:$0xff] }
0x15c2   : > { %9353 = vmatprep.subr.mxu0 %v7661_v26  ;;  %9397 = vmatprep.subr.mxu1 %v7693_v29  ;;  %v7666_v4 = vld [vmem:[%s10413_s18 + $0x310] sm:$0xff]  ;;  %v7681_v43 = vld [vmem:[%s10413_s18 + $0x388] sm:$0xff] }
0x15c3   : > { %9354 = vmatpush3.msra.mxu0 %v7645_v32  ;;  %9398 = vmatpush3.msra.mxu1 %v7677_v34  ;;  %v7633_v26 = vld [vmem:[%s10413_s18 + $0x208] sm:$0xff]  ;;  %v7648_v32 = vld [vmem:[%s10413_s18 + $0x280] sm:$0xff] }
0x15c4   : > { %9355 = vmatprep.subr.mxu0 %v7660_v37  ;;  %9399 = vmatprep.subr.mxu1 %v7692_v39  ;;  %v7665_v29 = vld [vmem:[%s10413_s18 + $0x308] sm:$0xff]  ;;  %v7680_v34 = vld [vmem:[%s10413_s18 + $0x380] sm:$0xff] }
0x15c5   : > { %9356 = vmatpush3.msra.mxu0 %v7644_v42  ;;  %9400 = vmatpush3.msra.mxu1 %v7676_v31  ;;  %v7632_v37 = vld [vmem:[%s10413_s18 + $0x200] sm:$0xff]  ;;  %v7727_v42 = vld [vmem:[%s10413_s18 + $0x4f8] sm:$0xff] }
0x15c6   : > { %9357 = vmatprep.subr.mxu0 %v7659_v35  ;;  %9401 = vmatprep.subr.mxu1 %v7691_v33  ;;  %v7664_v39 = vld [vmem:[%s10413_s18 + $0x300] sm:$0xff]  ;;  %v7759_v31 = vld [vmem:[%s10413_s18 + $0x5f8] sm:$0xff] }
0x15c7   : > { %9358 = vmatpush3.msra.mxu0 %v7643_v0  ;;  %9402 = vmatpush3.msra.mxu1 %v7675_v52  ;;  %v6718_v0 = vsub.s32 4, %v11452_v18  ;;  %v6726_v52 = vsub.s32 6, %v11452_v18 }
0x15c8   : > { %9359 = vmatprep.subr.mxu0 %v7658_v56  ;;  %9403 = vmatprep.subr.mxu1 %v7690_v44  ;;  %v6722_v56 = vsub.s32 5, %v11452_v18 }
0x15c9   : > { %9360 = vmatpush3.msra.mxu0 %v7642_v54  ;;  %9404 = vmatpush3.msra.mxu1 %v7674_v7 }
0x15ca   : > { %9361 = vmatprep.subr.mxu0 %v7657_v48  ;;  %9405 = vmatprep.subr.mxu1 %v7689_v58 }
0x15cb   : > { %9362 = vmatpush3.msra.mxu0 %v7641_v57  ;;  %9406 = vmatpush3.msra.mxu1 %v7673_v5  ;;  %v6730_v5 = vsub.s32 7, %v11452_v18  ;;  %v7762_v18 = vld [vmem:[%s10413_s18 + $0x610] sm:$0xff] }
0x15cc   : > { %9363 = vmatprep.subr.mxu0 %v7656_v38  ;;  %9407 = vmatprep.subr.mxu1 %v7688_v13 }
0x15cd   : > { %9364 = vmatpush3.msra.mxu0 %v7640_v11  ;;  %9408 = vmatpush3.msra.mxu1 %v7672_v36  ;;  %v11564_v11 = vrot.slane %v11457_v60, %v6718_v0 }
0x15ce   : > { %9365 = vmatprep.subr.mxu0 %v7655_v12  ;;  %9409 = vmatprep.subr.mxu1 %v7687_v14  ;;  %v11569_v14 = vrot.slane %v11457_v60, %v6726_v52 }
0x15cf   : > { %9366 = vmatpush3.msra.mxu0 %v7639_v15  ;;  %9410 = vmatpush3.msra.mxu1 %v7671_v41  ;;  %v11574_v15 = vrot.slane %v11457_v60, %v6722_v56 }
0x15d0   : > { %9367 = vmatprep.subr.mxu0 %v7654_v16  ;;  %9411 = vmatprep.subr.mxu1 %v7686_v19 }
0x15d1   : > { %9368 = vmatpush3.msra.mxu0 %v7638_v24  ;;  %9412 = vmatpush3.msra.mxu1 %v7670_v20 }
0x15d2   : > { %9369 = vmatprep.subr.mxu0 %v7653_v21  ;;  %9413 = vmatprep.subr.mxu1 %v7685_v61 }
0x15d3   : > { %9370 = vmatpush3.msra.mxu0 %v7637_v63  ;;  %9414 = vmatpush3.msra.mxu1 %v7669_v1  ;;  %v11583_v1 = vrot.slane %v11457_v60, %v6730_v5 }
0x15d4   : > { %9371 = vmatprep.subr.mxu0 %v7652_v27  ;;  %9415 = vmatprep.subr.mxu1 %v7684_v30 }
0x15d5   : > { %9372 = vmatpush3.msra.mxu0 %v7636_v28  ;;  %9416 = vmatpush3.msra.mxu1 %v7668_v62 }
0x15d6   : > { %9373 = vmatprep.subr.mxu0 %v7651_v3  ;;  %9417 = vmatprep.subr.mxu1 %v7683_v49 }
0x15d7   : > { %9374 = vmatpush3.msra.mxu0 %v7635_v51  ;;  %9418 = vmatpush3.msra.mxu1 %v7667_v47 }
0x15d8   : > { %9375 = vmatprep.subr.mxu0 %v7650_v50  ;;  %9419 = vmatprep.subr.mxu1 %v7682_v46 }
0x15d9   : > { %9376 = vmatpush3.msra.mxu0 %v7634_v53  ;;  %9420 = vmatpush3.msra.mxu1 %v7666_v4 }
0x15da   : > { %9377 = vmatprep.subr.mxu0 %v7649_v25  ;;  %9421 = vmatprep.subr.mxu1 %v7681_v43 }
0x15db   : > { %9378 = vmatpush3.msra.mxu0 %v7633_v26  ;;  %9422 = vmatpush3.msra.mxu1 %v7665_v29  ;;  %v7711_v29 = vld [vmem:[%s10413_s18 + $0x478] sm:$0xff] }
0x15dc   : > { %9379 = vmatprep.subr.mxu0 %v7648_v32  ;;  %9423 = vmatprep.subr.mxu1 %v7680_v34  ;;  %v7743_v32 = vld [vmem:[%s10413_s18 + $0x578] sm:$0xff] }
0x15dd   : > { %9380 = vmatpush3.msra.mxu0 %v7632_v37  ;;  %9424 = vmatpush3.msra.mxu1 %v7664_v39  ;;  %v7726_v39 = vld [vmem:[%s10413_s18 + $0x4f0] sm:$0xff] }
0x15de   : > { %9437 = vmatprep.subr.mxu0 %v7727_v42  ;;  %9481 = vmatprep.subr.mxu1 %v7759_v31  ;;  %v7758_v42 = vld [vmem:[%s10413_s18 + $0x5f0] sm:$0xff] }
0x15e7   : > { %v6870_v35 = vpop.f32.mrf.mxu0  ;;  %v6959_v33 = vpop.f32.mrf.mxu1 }
0x15e8   : > { %v6871_v44 = vadd.f32 %v6870_v35, %v11464_v2  ;;  %v6960_v54 = vadd.f32 %v6959_v33, %v11469_v6 }
0x15e9   : > { %v6872_v7 = vpop.f32.mrf.mxu0  ;;  %v6961_v48 = vpop.f32.mrf.mxu1 }
0x15ea   : > { %v6873_v58 = vadd.f32 %v6872_v7, %v11474_v8  ;;  %v6962_v57 = vadd.f32 %v6961_v48, %v11479_v10  ;;  %v7536_v41 = vmax.f32 %v6871_v44, 0.0  ;;  %v7538_v16 = vmax.f32 %v6960_v54, 0.0  ;;  %v7710_v54 = vld [vmem:[%s10413_s18 + $0x470] sm:$0xff] }
0x15eb   : > { %v6876_v38 = vpop.f32.mrf.mxu0  ;;  %v6965_v13 = vpop.f32.mrf.mxu1  ;;  %v7742_v7 = vld [vmem:[%s10413_s18 + $0x570] sm:$0xff] }
0x15ec   : > { %v7537_v36 = vmax.f32 %v6873_v58, 0.0  ;;  %v7539_v12 = vmax.f32 %v6962_v57, 0.0  ;;  %v6877_v19 = vadd.f32 %v6876_v38, %v11464_v2  ;;  %v6966_v24 = vadd.f32 %v6965_v13, %v11469_v6  ;;  %v7725_v13 = vld [vmem:[%s10413_s18 + $0x4e8] sm:$0xff] }
0x15ed   : > { %v6878_v20 = vpop.f32.mrf.mxu0  ;;  %v6967_v21 = vpop.f32.mrf.mxu1 }
0x15ee   : > { %v6879_v61 = vadd.f32 %v6878_v20, %v11474_v8  ;;  %v6968_v63 = vadd.f32 %v6967_v21, %v11479_v10  ;;  %7905 = vmatprep.mubr.f32.mxu0 %v7537_v36  ;;  %7990 = vmatprep.mubr.f32.mxu1 %v7539_v12  ;;  %v7552_v6 = vmax.f32 %v6877_v19, 0.0  ;;  %v7554_v62 = vmax.f32 %v6966_v24, 0.0  ;;  %v7757_v36 = vld [vmem:[%s10413_s18 + $0x5e8] sm:$0xff] }
0x15ef   : > { %v7036_v27 = vpop.f32.mrf.mxu0  ;;  %v7125_v30 = vpop.f32.mrf.mxu1  ;;  %7906 = vmatmul.mubr.f32.gmra.mxu0 %v7536_v41  ;;  %7991 = vmatmul.mubr.f32.gmra.mxu1 %v7538_v16  ;;  %v7709_v21 = vld [vmem:[%s10413_s18 + $0x468] sm:$0xff] }
0x15f0   : > { %v7553_v2 = vmax.f32 %v6879_v61, 0.0  ;;  %v7555_v28 = vmax.f32 %v6968_v63, 0.0  ;;  %v7037_v3 = vadd.f32 %v7036_v27, %v11564_v11  ;;  %v7126_v8 = vadd.f32 %v7125_v30, %v11569_v14  ;;  %v7741_v61 = vld [vmem:[%s10413_s18 + $0x568] sm:$0xff]  ;;  %v7724_v63 = vld [vmem:[%s10413_s18 + $0x4e0] sm:$0xff] }
0x15f1   : > { %v7038_v10 = vpop.f32.mrf.mxu0  ;;  %v7127_v49 = vpop.f32.mrf.mxu1  ;;  %v7756_v27 = vld [vmem:[%s10413_s18 + $0x5e0] sm:$0xff] }
0x15f2   : > { %v7039_v51 = vadd.f32 %v7038_v10, %v11574_v15  ;;  %v7128_v60 = vadd.f32 %v7127_v49, %v11583_v1  ;;  %7910 = vmatprep.mubr.f32.mxu0 %v7553_v2  ;;  %7995 = vmatprep.mubr.f32.mxu1 %v7555_v28  ;;  %v7508_v4 = vmax.f32 %v7037_v3, 0.0  ;;  %v7510_v25 = vmax.f32 %v7126_v8, 0.0  ;;  %v7708_v8 = vld [vmem:[%s10413_s18 + $0x460] sm:$0xff] }
0x15f3   : > { %v7042_v47 = vpop.f32.mrf.mxu0  ;;  %v7131_v50 = vpop.f32.mrf.mxu1  ;;  %7911 = vmatmul.mubr.f32.gmra.mxu0 %v7552_v6  ;;  %7996 = vmatmul.mubr.f32.gmra.mxu1 %v7554_v62  ;;  %v7740_v10 = vld [vmem:[%s10413_s18 + $0x560] sm:$0xff] }
0x15f4   : > { %v7509_v46 = vmax.f32 %v7039_v51, 0.0  ;;  %v7511_v53 = vmax.f32 %v7128_v60, 0.0  ;;  %v7043_v31 = vadd.f32 %v7042_v47, %v11564_v11  ;;  %v7132_v35 = vadd.f32 %v7131_v50, %v11569_v14  ;;  %v7723_v60 = vld [vmem:[%s10413_s18 + $0x4d8] sm:$0xff] }
0x15f5   : > { %v7044_v43 = vpop.f32.mrf.mxu0  ;;  %v7133_v26 = vpop.f32.mrf.mxu1  ;;  %v7755_v47 = vld [vmem:[%s10413_s18 + $0x5d8] sm:$0xff] }
0x15f6   : > { %v7045_v34 = vadd.f32 %v7044_v43, %v11574_v15  ;;  %v7134_v37 = vadd.f32 %v7133_v26, %v11583_v1  ;;  %8065 = vmatprep.mubr.f32.mxu0 %v7509_v46  ;;  %8150 = vmatprep.mubr.f32.mxu1 %v7511_v53  ;;  %v7524_v16 = vmax.f32 %v7043_v31, 0.0  ;;  %v7526_v19 = vmax.f32 %v7132_v35, 0.0  ;;  %v11620_v53 = vld [vmem:[%s10407_s30 + $0x8] sm:$0xff]  ;;  %v7707_v43 = vld [vmem:[%s10413_s18 + $0x458] sm:$0xff]  ;;  %v7722_v26 = vld [vmem:[%s10413_s18 + $0x4d0] sm:$0xff] }
0x15f7   : > { %v7048_v33 = vpop.f32.mrf.mxu0  ;;  %v7137_v44 = vpop.f32.mrf.mxu1  ;;  %8066 = vmatmul.mubr.f32.vlgmr.msra.gmra.mxu0 %v7508_v4  ;;  %8151 = vmatmul.mubr.f32.vlgmr.msra.gmra.mxu1 %v7510_v25  ;;  %v7706_v35 = vld [vmem:[%s10413_s18 + $0x450] sm:$0xff] }
0x15f8   : > { %v7525_v48 = vmax.f32 %v7045_v34, 0.0  ;;  %v7527_v58 = vmax.f32 %v7134_v37, 0.0  ;;  %9438 = vmatpush3.msra.mxu0 %v7711_v29  ;;  %9482 = vmatpush3.msra.mxu1 %v7743_v32  ;;  %v7049_v30 = vadd.f32 %v7048_v33, %v11564_v11  ;;  %v7138_v2 = vadd.f32 %v7137_v44, %v11569_v14  ;;  %v7754_v29 = vld [vmem:[%s10413_s18 + $0x5d0] sm:$0xff]  ;;  %v7753_v44 = vld [vmem:[%s10413_s18 + $0x5c8] sm:$0xff] }
0x15f9   : > { %9439 = vmatprep.subr.mxu0 %v7726_v39  ;;  %9483 = vmatprep.subr.mxu1 %v7758_v42  ;;  %v7050_v57 = vpop.f32.mrf.mxu0  ;;  %v7139_v38 = vpop.f32.mrf.mxu1  ;;  %v11634_v34 = vrot.slane %v11620_v53, %v6714_v23  ;;  %v7738_v33 = vld [vmem:[%s10413_s18 + $0x550] sm:$0xff] }
0x15fa   : > { %v7051_v12 = vadd.f32 %v7050_v57, %v11574_v15  ;;  %v7140_v41 = vadd.f32 %v7139_v38, %v11583_v1  ;;  %9440 = vmatpush3.msra.mxu0 %v7710_v54  ;;  %9484 = vmatpush3.msra.mxu1 %v7742_v7  ;;  %v7540_v4 = vmax.f32 %v7049_v30, 0.0  ;;  %v7542_v25 = vmax.f32 %v7138_v2, 0.0  ;;  %v7720_v57 = vld [vmem:[%s10413_s18 + $0x4c0] sm:$0xff]  ;;  %v7702_v30 = vld [vmem:[%s10413_s18 + $0x430] sm:$0xff] }
0x15fb   : > { %8070 = vmatprep.mubr.f32.mxu0 %v7525_v48  ;;  %8155 = vmatprep.mubr.f32.mxu1 %v7527_v58  ;;  %v7054_v24 = vpop.f32.mrf.mxu0  ;;  %v7143_v20 = vpop.f32.mrf.mxu1  ;;  %v7705_v48 = vld [vmem:[%s10413_s18 + $0x448] sm:$0xff]  ;;  %v7752_v38 = vld [vmem:[%s10413_s18 + $0x5c0] sm:$0xff]  ;;  %v7734_v2 = vld [vmem:[%s10413_s18 + $0x530] sm:$0xff] }
0x15fc   : > { %9441 = vmatprep.subr.mxu0 %v7725_v13  ;;  %9485 = vmatprep.subr.mxu1 %v7757_v36  ;;  %v7541_v28 = vmax.f32 %v7051_v12, 0.0  ;;  %v7543_v6 = vmax.f32 %v7140_v41, 0.0  ;;  %v7055_v37 = vadd.f32 %v7054_v24, %v11564_v11  ;;  %v7144_v39 = vadd.f32 %v7143_v20, %v11569_v14  ;;  %v7721_v11 = vld [vmem:[%s10413_s18 + $0x4c8] sm:$0xff]  ;;  %v7704_v36 = vld [vmem:[%s10413_s18 + $0x440] sm:$0xff]  ;;  %v7703_v24 = vld [vmem:[%s10413_s18 + $0x438] sm:$0xff] }
0x15fd   : > { %8071 = vmatmul.mubr.f32.gmra.mxu0 %v7524_v16  ;;  %8156 = vmatmul.mubr.f32.gmra.mxu1 %v7526_v19  ;;  %v7056_v62 = vpop.f32.mrf.mxu0  ;;  %v7145_v3 = vpop.f32.mrf.mxu1  ;;  %v7737_v58 = vld [vmem:[%s10413_s18 + $0x548] sm:$0xff]  ;;  %v7736_v12 = vld [vmem:[%s10413_s18 + $0x540] sm:$0xff]  ;;  %v7719_v16 = vld [vmem:[%s10413_s18 + $0x4b8] sm:$0xff] }
0x15fe   : > { %9442 = vmatpush3.msra.mxu0 %v7709_v21  ;;  %9486 = vmatpush3.msra.mxu1 %v7741_v61  ;;  %v7057_v49 = vadd.f32 %v7056_v62, %v11574_v15  ;;  %v7146_v51 = vadd.f32 %v7145_v3, %v11583_v1  ;;  %v7739_v15 = vld [vmem:[%s10413_s18 + $0x558] sm:$0xff]  ;;  %v11627_v1 = vrot.slane %v11620_v53, %v6706_v40  ;;  %v7556_v54 = vmax.f32 %v7055_v37, 0.0  ;;  %v7718_v61 = vld [vmem:[%s10413_s18 + $0x4b0] sm:$0xff]  ;;  %v7701_v62 = vld [vmem:[%s10413_s18 + $0x428] sm:$0xff] }
0x15ff   : > { %9443 = vmatprep.subr.mxu0 %v7724_v63  ;;  %9487 = vmatprep.subr.mxu1 %v7756_v27  ;;  %v11615_v50 = vpop.f32.mrf.mxu0  ;;  %v11617_v46 = vpop.f32.mrf.mxu1  ;;  %v7558_v7 = vmax.f32 %v7144_v39, 0.0  ;;  %v7751_v19 = vld [vmem:[%s10413_s18 + $0x5b8] sm:$0xff]  ;;  %v7750_v63 = vld [vmem:[%s10413_s18 + $0x5b0] sm:$0xff]  ;;  %v7733_v3 = vld [vmem:[%s10413_s18 + $0x528] sm:$0xff] }
0x1600   : > { %9444 = vmatpush3.msra.mxu0 %v7708_v8  ;;  %9488 = vmatpush3.msra.mxu1 %v7740_v10  ;;  %v7557_v42 = vmax.f32 %v7057_v49, 0.0  ;;  %v7559_v31 = vmax.f32 %v7146_v51, 0.0  ;;  %v7735_v20 = vld [vmem:[%s10413_s18 + $0x538] sm:$0xff]  ;;  %v7716_v10 = vld [vmem:[%s10413_s18 + $0x4a0] sm:$0xff]  ;;  %v7714_v37 = vld [vmem:[%s10413_s18 + $0x490] sm:$0xff] }
0x1601   : > { %8075 = vmatprep.mubr.f32.mxu0 %v7541_v28  ;;  %8160 = vmatprep.mubr.f32.mxu1 %v7543_v6  ;;  %v7216_v32 = vpop.f32.mrf.mxu0  ;;  %v7305_v40 = vpop.f32.mrf.mxu1  ;;  %v7717_v28 = vld [vmem:[%s10413_s18 + $0x4a8] sm:$0xff]  ;;  %v7748_v49 = vld [vmem:[%s10413_s18 + $0x5a0] sm:$0xff] }
0x1602   : > { %9445 = vmatprep.subr.mxu0 %v7723_v60  ;;  %9489 = vmatprep.subr.mxu1 %v7755_v47  ;;  %v7217_v23 = vadd.f32 %v7216_v32, %v11627_v1  ;;  %v7306_v14 = vadd.f32 %v7305_v40, %v11634_v34  ;;  %v7749_v6 = vld [vmem:[%s10413_s18 + $0x5a8] sm:$0xff]  ;;  %v7700_v60 = vld [vmem:[%s10413_s18 + $0x420] sm:$0xff] }
0x1603   : > { %8076 = vmatmul.mubr.f32.gmra.mxu0 %v7540_v4  ;;  %8161 = vmatmul.mubr.f32.gmra.mxu1 %v7542_v25  ;;  %v11654_v21 = vpop.f32.mrf.mxu0  ;;  %v11658_v27 = vpop.f32.mrf.mxu1  ;;  %v7732_v47 = vld [vmem:[%s10413_s18 + $0x520] sm:$0xff]  ;;  %v7715_v4 = vld [vmem:[%s10413_s18 + $0x498] sm:$0xff]  ;;  %v7745_v40 = vld [vmem:[%s10413_s18 + $0x588] sm:$0xff] }
0x1604   : > { %9446 = vmatpush3.msra.mxu0 %v7707_v43  ;;  %9490 = vmatpush3.msra.mxu1 %v7739_v15  ;;  %v7513_v13 = vmax.f32 %v7217_v23, 0.0  ;;  %v7515_v41 = vmax.f32 %v7306_v14, 0.0  ;;  %v7747_v25 = vld [vmem:[%s10413_s18 + $0x598] sm:$0xff]  ;;  %v11675_v43 = vrot.slane %v11620_v53, %v6702_v9  ;;  %v11680_v15 = vrot.slane %v11620_v53, %v6710_v59  ;;  %v7746_v9 = vld [vmem:[%s10413_s18 + $0x590] sm:$0xff]  ;;  %v7697_v23 = vld [vmem:[%s10413_s18 + $0x408] sm:$0xff] }
0x1605   : > { %9447 = vmatprep.subr.mxu0 %v7722_v26  ;;  %9491 = vmatprep.subr.mxu1 %v7754_v29  ;;  %v7222_v8 = vpop.f32.mrf.mxu0  ;;  %v7311_v51 = vpop.f32.mrf.mxu1  ;;  %v7699_v26 = vld [vmem:[%s10413_s18 + $0x418] sm:$0xff]  ;;  %v7698_v59 = vld [vmem:[%s10413_s18 + $0x410] sm:$0xff]  ;;  %v7712_v14 = vld [vmem:[%s10413_s18 + $0x480] sm:$0xff] }
0x1606   : > { %9448 = vmatpush3.msra.mxu0 %v7706_v35  ;;  %9492 = vmatpush3.msra.mxu1 %v7738_v33  ;;  %v7731_v29 = vld [vmem:[%s10413_s18 + $0x518] sm:$0xff]  ;;  %v7215_v35 = vadd.f32 %v11615_v50, %v11675_v43  ;;  %v7304_v33 = vadd.f32 %v11617_v46, %v11680_v15  ;;  %v7312_v50 = vadd.f32 %v7311_v51, %v11634_v34  ;;  %v7696_v46 = vld [vmem:[%s10413_s18 + $0x400] sm:$0xff]  ;;  %v7821_v51 = vld [vmem:[%s10413_s18 + $0x7e8] sm:$0xff] }
0x1607   : > { %8080 = vmatprep.mubr.f32.mxu0 %v7557_v42  ;;  %8165 = vmatprep.mubr.f32.mxu1 %v7559_v31  ;;  %v11684_v32 = vpop.f32.mrf.mxu0  ;;  %v11688_v39 = vpop.f32.mrf.mxu1  ;;  %v7730_v42 = vld [vmem:[%s10413_s18 + $0x510] sm:$0xff]  ;;  %v7713_v31 = vld [vmem:[%s10413_s18 + $0x488] sm:$0xff] }
0x1608   : > { %9449 = vmatprep.subr.mxu0 %v7721_v11  ;;  %9493 = vmatprep.subr.mxu1 %v7753_v44  ;;  %v7729_v11 = vld [vmem:[%s10413_s18 + $0x508] sm:$0xff] }
0x1609   : > { %8081 = vmatmul.mubr.f32.gmra.mxu0 %v7556_v54  ;;  %8166 = vmatmul.mubr.f32.gmra.mxu1 %v7558_v7  ;;  %v7228_v44 = vpop.f32.mrf.mxu0  ;;  %v7744_v54 = vld [vmem:[%s10413_s18 + $0x580] sm:$0xff]  ;;  %v7223_v7 = vadd.f32 %v7222_v8, %v11627_v1 }
0x160a   : > { %9450 = vmatpush3.msra.mxu0 %v7705_v48  ;;  %9494 = vmatpush3.msra.mxu1 %v7737_v58  ;;  %v7317_v48 = vpop.f32.mrf.mxu1  ;;  %v7728_v58 = vld [vmem:[%s10413_s18 + $0x500] sm:$0xff] }
0x160b   : > { %9451 = vmatprep.subr.mxu0 %v7720_v57  ;;  %9495 = vmatprep.subr.mxu1 %v7752_v38  ;;  %v7512_v57 = vmax.f32 %v7215_v35, 0.0  ;;  %v7514_v38 = vmax.f32 %v7304_v33, 0.0 }
0x160c   : > { %9452 = vmatpush3.msra.mxu0 %v7704_v36  ;;  %9496 = vmatpush3.msra.mxu1 %v7736_v12  ;;  %v7823_v36 = vld [vmem:[%s10413_s18 + $0x7f8] sm:$0xff]  ;;  %v11708_v12 = vpop.f32.mrf.mxu0 }
0x160d   : > { %9453 = vmatprep.subr.mxu0 %v7719_v16  ;;  %8235 = vmatprep.mubr.f32.mxu0 %v7513_v13  ;;  %v7791_v13 = vld [vmem:[%s10413_s18 + $0x6f8] sm:$0xff]  ;;  %v7310_v16 = vadd.f32 %v11658_v27, %v11680_v15  ;;  %v7774_v27 = vld [vmem:[%s10413_s18 + $0x670] sm:$0xff] }
0x160e   : > { %9497 = vmatprep.subr.mxu1 %v7751_v19  ;;  %8320 = vmatprep.mubr.f32.mxu1 %v7515_v41  ;;  %v7221_v41 = vadd.f32 %v11654_v21, %v11675_v43  ;;  %v7529_v19 = vmax.f32 %v7223_v7, 0.0  ;;  %v7229_v21 = vadd.f32 %v7228_v44, %v11627_v1  ;;  %v11750_v44 = vrot.slane %v11620_v53, %v6730_v5  ;;  %v7786_v5 = vld [vmem:[%s10413_s18 + $0x6d0] sm:$0xff] }
0x160f   : > { %9454 = vmatpush3.msra.mxu0 %v7703_v24  ;;  %9498 = vmatpush3.msra.mxu1 %v7735_v20  ;;  %v7531_v24 = vmax.f32 %v7312_v50, 0.0  ;;  %v7321_v20 = vpop.f32.mrf.mxu1  ;;  %v7530_v8 = vmax.f32 %v7310_v16, 0.0  ;;  %v7769_v16 = vld [vmem:[%s10413_s18 + $0x648] sm:$0xff] }
0x1610   : > { %9455 = vmatprep.subr.mxu0 %v7718_v61  ;;  %9499 = vmatprep.subr.mxu1 %v7750_v63  ;;  %v7775_v61 = vld [vmem:[%s10413_s18 + $0x678] sm:$0xff] }
0x1611   : > { %9456 = vmatpush3.msra.mxu0 %v7702_v30  ;;  %9500 = vmatpush3.msra.mxu1 %v7734_v2  ;;  %v7807_v63 = vld [vmem:[%s10413_s18 + $0x778] sm:$0xff]  ;;  %v7790_v30 = vld [vmem:[%s10413_s18 + $0x6f0] sm:$0xff] }
0x1612   : > { %9457 = vmatprep.subr.mxu0 %v7717_v28  ;;  %9501 = vmatprep.subr.mxu1 %v7749_v6  ;;  %v7822_v2 = vld [vmem:[%s10413_s18 + $0x7f0] sm:$0xff]  ;;  %v7318_v28 = vadd.f32 %v7317_v48, %v11634_v34  ;;  %v7771_v48 = vld [vmem:[%s10413_s18 + $0x658] sm:$0xff] }
0x1613   : > { %9458 = vmatpush3.msra.mxu0 %v7701_v62  ;;  %9502 = vmatpush3.msra.mxu1 %v7733_v3  ;;  %v7806_v6 = vld [vmem:[%s10413_s18 + $0x770] sm:$0xff]  ;;  %v7234_v62 = vpop.f32.mrf.mxu0  ;;  %v7528_v3 = vmax.f32 %v7221_v41, 0.0  ;;  %v7817_v41 = vld [vmem:[%s10413_s18 + $0x7c8] sm:$0xff] }
0x1614   : > { %9459 = vmatprep.subr.mxu0 %v7716_v10  ;;  %9503 = vmatprep.subr.mxu1 %v7748_v49  ;;  %v7323_v10 = vpop.f32.mrf.mxu1  ;;  %v7789_v49 = vld [vmem:[%s10413_s18 + $0x6e8] sm:$0xff] }
0x1615   : > { %9460 = vmatpush3.msra.mxu0 %v7700_v60  ;;  %9504 = vmatpush3.msra.mxu1 %v7732_v47  ;;  %v7227_v60 = vadd.f32 %v11684_v32, %v11675_v43  ;;  %v7316_v47 = vadd.f32 %v11688_v39, %v11680_v15  ;;  %v7235_v32 = vadd.f32 %v7234_v62, %v11627_v1  ;;  %v7787_v1 = vld [vmem:[%s10413_s18 + $0x6d8] sm:$0xff] }
0x1616   : > { %9461 = vmatprep.subr.mxu0 %v7715_v4  ;;  %9505 = vmatprep.subr.mxu1 %v7747_v25  ;;  %v7545_v4 = vmax.f32 %v7229_v21, 0.0  ;;  %v7547_v25 = vmax.f32 %v7318_v28, 0.0  ;;  %v7324_v39 = vadd.f32 %v7323_v10, %v11634_v34  ;;  %v7819_v34 = vld [vmem:[%s10413_s18 + $0x7d8] sm:$0xff]  ;;  %v7768_v21 = vld [vmem:[%s10413_s18 + $0x640] sm:$0xff]  ;;  %v7814_v10 = vld [vmem:[%s10413_s18 + $0x7b0] sm:$0xff] }
0x1617   : > { %9462 = vmatpush3.msra.mxu0 %v7699_v26  ;;  %9506 = vmatpush3.msra.mxu1 %v7731_v29  ;;  %v7773_v26 = vld [vmem:[%s10413_s18 + $0x668] sm:$0xff]  ;;  %v7544_v35 = vmax.f32 %v7227_v60, 0.0  ;;  %v7546_v33 = vmax.f32 %v7316_v47, 0.0  ;;  %v7800_v28 = vld [vmem:[%s10413_s18 + $0x740] sm:$0xff]  ;;  %v7767_v62 = vld [vmem:[%s10413_s18 + $0x638] sm:$0xff] }
0x1618   : > { %9463 = vmatprep.subr.mxu0 %v7714_v37  ;;  %9507 = vmatprep.subr.mxu1 %v7746_v9  ;;  %v7805_v29 = vld [vmem:[%s10413_s18 + $0x768] sm:$0xff]  ;;  %v11730_v37 = vpop.f32.mrf.mxu0  ;;  %v7788_v9 = vld [vmem:[%s10413_s18 + $0x6e0] sm:$0xff]  ;;  %v7563_v7 = vmax.f32 %v7324_v39, 0.0  ;;  %v7766_v60 = vld [vmem:[%s10413_s18 + $0x630] sm:$0xff] }
0x1619   : > { %9464 = vmatpush3.msra.mxu0 %v7698_v59  ;;  %9508 = vmatpush3.msra.mxu1 %v7730_v42  ;;  %v7820_v59 = vld [vmem:[%s10413_s18 + $0x7e0] sm:$0xff]  ;;  %v11736_v42 = vpop.f32.mrf.mxu1  ;;  %v7798_v47 = vld [vmem:[%s10413_s18 + $0x730] sm:$0xff] }
0x161a   : > { %9465 = vmatprep.subr.mxu0 %v7713_v31  ;;  %9509 = vmatprep.subr.mxu1 %v7745_v40  ;;  %v7772_v31 = vld [vmem:[%s10413_s18 + $0x660] sm:$0xff] }
0x161b   : > { %9466 = vmatpush3.msra.mxu0 %v7697_v23  ;;  %9510 = vmatpush3.msra.mxu1 %v7729_v11  ;;  %v7804_v40 = vld [vmem:[%s10413_s18 + $0x760] sm:$0xff]  ;;  %v11743_v23 = vrot.slane %v11620_v53, %v6722_v56  ;;  %v7394_v11 = vpop.f32.mrf.mxu0  ;;  %v7233_v56 = vadd.f32 %v11708_v12, %v11675_v43  ;;  %v7483_v50 = vpop.f32.mrf.mxu1  ;;  %v7770_v43 = vld [vmem:[%s10413_s18 + $0x650] sm:$0xff]  ;;  %v7785_v12 = vld [vmem:[%s10413_s18 + $0x6c8] sm:$0xff] }
0x161c   : > { %9467 = vmatprep.subr.mxu0 %v7712_v14  ;;  %9511 = vmatprep.subr.mxu1 %v7744_v54  ;;  %v7322_v14 = vadd.f32 %v7321_v20, %v11680_v15  ;;  %v7561_v54 = vmax.f32 %v7235_v32, 0.0  ;;  %v7802_v15 = vld [vmem:[%s10413_s18 + $0x750] sm:$0xff] }
0x161d   : > { %9468 = vmatpush3.msra.mxu0 %v7696_v46  ;;  %9512 = vmatpush3.msra.mxu1 %v7728_v58  ;;  %v7803_v46 = vld [vmem:[%s10413_s18 + $0x758] sm:$0xff]  ;;  %v7818_v58 = vld [vmem:[%s10413_s18 + $0x7d0] sm:$0xff] }
0x161e   : > { %8236 = vmatmul.mubr.f32.vlgmr.msra.gmra.mxu0 %v7512_v57  ;;  %8321 = vmatmul.mubr.f32.vlgmr.msra.gmra.mxu1 %v7514_v38  ;;  %v7395_v57 = vadd.f32 %v7394_v11, %v11743_v23  ;;  %v7484_v38 = vadd.f32 %v7483_v50, %v11750_v44  ;;  %v7763_v11 = vld [vmem:[%s10413_s18 + $0x618] sm:$0xff]  ;;  %v7809_v50 = vld [vmem:[%s10413_s18 + $0x788] sm:$0xff] }
0x161f   : > { %9525 = vmatprep.subr.mxu0 %v7791_v13  ;;  %9569 = vmatprep.subr.mxu1 %v7823_v36  ;;  %v7560_v13 = vmax.f32 %v7233_v56, 0.0  ;;  %v7562_v36 = vmax.f32 %v7322_v14, 0.0  ;;  %v7795_v56 = vld [vmem:[%s10413_s18 + $0x718] sm:$0xff]  ;;  %v7778_v14 = vld [vmem:[%s10413_s18 + $0x690] sm:$0xff] }
0x1620   : > { %8240 = vmatprep.mubr.f32.mxu0 %v7529_v19  ;;  %8325 = vmatprep.mubr.f32.mxu1 %v7531_v24  ;;  %v7517_v19 = vmax.f32 %v7395_v57, 0.0  ;;  %v7801_v24 = vld [vmem:[%s10413_s18 + $0x748] sm:$0xff]  ;;  %v7519_v20 = vmax.f32 %v7484_v38, 0.0  ;;  %v7808_v38 = vld [vmem:[%s10413_s18 + $0x780] sm:$0xff] }
0x1621   : > { %9526 = vmatpush3.msra.mxu0 %v7775_v61  ;;  %9570 = vmatpush3.msra.mxu1 %v7807_v63  ;;  %v7784_v61 = vld [vmem:[%s10413_s18 + $0x6c0] sm:$0xff] }
0x1622   : > { %9527 = vmatprep.subr.mxu0 %v7790_v30  ;;  %9571 = vmatprep.subr.mxu1 %v7822_v2  ;;  %v7816_v63 = vld [vmem:[%s10413_s18 + $0x7c0] sm:$0xff]  ;;  %v11769_v30 = vpop.f32.mrf.mxu0  ;;  %v11771_v2 = vpop.f32.mrf.mxu1 }
0x1623   : > { %9528 = vmatpush3.msra.mxu0 %v7774_v27  ;;  %9572 = vmatpush3.msra.mxu1 %v7806_v6  ;;  %v7783_v27 = vld [vmem:[%s10413_s18 + $0x6b8] sm:$0xff] }
0x1624   : > { %8241 = vmatmul.mubr.f32.gmra.mxu0 %v7528_v3  ;;  %8326 = vmatmul.mubr.f32.gmra.mxu1 %v7530_v8  ;;  %v7815_v6 = vld [vmem:[%s10413_s18 + $0x7b8] sm:$0xff]  ;;  %v7782_v8 = vld [vmem:[%s10413_s18 + $0x6b0] sm:$0xff] }
0x1625   : > { %9529 = vmatprep.subr.mxu0 %v7789_v49  ;;  %9573 = vmatprep.subr.mxu1 %v7821_v51  ;;  %v7799_v3 = vld [vmem:[%s10413_s18 + $0x738] sm:$0xff]  ;;  %v7400_v49 = vpop.f32.mrf.mxu0  ;;  %v7489_v51 = vpop.f32.mrf.mxu1 }
0x1626   : > { %8245 = vmatprep.mubr.f32.mxu0 %v7545_v4  ;;  %8330 = vmatprep.mubr.f32.mxu1 %v7547_v25  ;;  %v7781_v4 = vld [vmem:[%s10413_s18 + $0x6a8] sm:$0xff]  ;;  %v7401_v57 = vadd.f32 %v7400_v49, %v11743_v23 }
0x1627   : > { %9530 = vmatpush3.msra.mxu0 %v7773_v26  ;;  %9574 = vmatpush3.msra.mxu1 %v7805_v29  ;;  %v7813_v25 = vld [vmem:[%s10413_s18 + $0x7a8] sm:$0xff]  ;;  %v11789_v32 = vpop.f32.mrf.mxu0  ;;  %v11791_v39 = vpop.f32.mrf.mxu1 }
0x1628   : > { %9531 = vmatprep.subr.mxu0 %v7788_v9  ;;  %9575 = vmatprep.subr.mxu1 %v7820_v59  ;;  %v7765_v26 = vld [vmem:[%s10413_s18 + $0x628] sm:$0xff]  ;;  %v7780_v9 = vld [vmem:[%s10413_s18 + $0x6a0] sm:$0xff] }
0x1629   : > { %9532 = vmatpush3.msra.mxu0 %v7772_v31  ;;  %9576 = vmatpush3.msra.mxu1 %v7804_v40  ;;  %v7797_v29 = vld [vmem:[%s10413_s18 + $0x728] sm:$0xff]  ;;  %v7812_v59 = vld [vmem:[%s10413_s18 + $0x7a0] sm:$0xff] }
0x162a   : > { %8246 = vmatmul.mubr.f32.gmra.mxu0 %v7544_v35  ;;  %8331 = vmatmul.mubr.f32.gmra.mxu1 %v7546_v33  ;;  %v7764_v31 = vld [vmem:[%s10413_s18 + $0x620] sm:$0xff]  ;;  %v7779_v35 = vld [vmem:[%s10413_s18 + $0x698] sm:$0xff] }
0x162b   : > { %9533 = vmatprep.subr.mxu0 %v7787_v1  ;;  %9577 = vmatprep.subr.mxu1 %v7819_v34  ;;  %v7796_v40 = vld [vmem:[%s10413_s18 + $0x720] sm:$0xff]  ;;  %v7811_v33 = vld [vmem:[%s10413_s18 + $0x798] sm:$0xff]  ;;  %v11800_v1 = vrot.slane %v11620_v53, %v6718_v0  ;;  %v11805_v34 = vrot.slane %v11620_v53, %v6726_v52  ;;  %v7495_v0 = vpop.f32.mrf.mxu1  ;;  %v7794_v52 = vld [vmem:[%s10413_s18 + $0x710] sm:$0xff] }
0x162c   : > { %8250 = vmatprep.mubr.f32.mxu0 %v7561_v54  ;;  %8335 = vmatprep.mubr.f32.mxu1 %v7563_v7  ;;  %v7810_v54 = vld [vmem:[%s10413_s18 + $0x790] sm:$0xff]  ;;  %v7406_v7 = vpop.f32.mrf.mxu0  ;;  %v7777_v53 = vld [vmem:[%s10413_s18 + $0x688] sm:$0xff] }
0x162d   : > { %9534 = vmatpush3.msra.mxu0 %v7771_v48  ;;  %9578 = vmatpush3.msra.mxu1 %v7803_v46  ;;  %v7393_v48 = vadd.f32 %v11730_v37, %v11800_v1  ;;  %v7482_v46 = vadd.f32 %v11736_v42, %v11805_v34  ;;  %v7760_v37 = vld [vmem:[%s10413_s18 + $0x600] sm:$0xff] }
0x162e   : > { %9535 = vmatprep.subr.mxu0 %v7786_v5  ;;  %9579 = vmatprep.subr.mxu1 %v7818_v58  ;;  %v7761_v5 = vld [vmem:[%s10413_s18 + $0x608] sm:$0xff] }
0x162f   : > { %9536 = vmatpush3.msra.mxu0 %v7770_v43  ;;  %9580 = vmatpush3.msra.mxu1 %v7802_v15  ;;  %v7793_v58 = vld [vmem:[%s10413_s18 + $0x708] sm:$0xff]  ;;  %v7490_v43 = vadd.f32 %v7489_v51, %v11750_v44  ;;  %v7776_v15 = vld [vmem:[%s10413_s18 + $0x680] sm:$0xff]  ;;  %v7516_v42 = vmax.f32 %v7393_v48, 0.0 }
0x1630   : > { %8251 = vmatmul.mubr.f32.gmra.mxu0 %v7560_v13  ;;  %8336 = vmatmul.mubr.f32.gmra.mxu1 %v7562_v36  ;;  %v7410_v13 = vpop.f32.mrf.mxu0  ;;  %v7499_v36 = vpop.f32.mrf.mxu1 }
0x1631   : > { %9537 = vmatprep.subr.mxu0 %v7785_v12  ;;  %9581 = vmatprep.subr.mxu1 %v7817_v41  ;;  %v7792_v12 = vld [vmem:[%s10413_s18 + $0x700] sm:$0xff]  ;;  %v7518_v41 = vmax.f32 %v7482_v46, 0.0  ;;  %s11973_s18 = sld [smem:[#allocation16_spill]] (!%p9105_p6) }
0x1632   : > { %9538 = vmatpush3.msra.mxu0 %v7769_v16  ;;  %8405 = vmatprep.mubr.f32.mxu0 %v7517_v19  ;;  %v7399_v16 = vadd.f32 %v11769_v30, %v11800_v1  ;;  %v7488_v19 = vadd.f32 %v11771_v2, %v11805_v34  ;;  %v7405_v2 = vadd.f32 %v11789_v32, %v11800_v1 }
0x1633   : > { %9582 = vmatpush3.msra.mxu1 %v7801_v24  ;;  %8490 = vmatprep.mubr.f32.mxu1 %v7519_v20  ;;  %v7533_v24 = vmax.f32 %v7401_v57, 0.0  ;;  %v7535_v20 = vmax.f32 %v7490_v43, 0.0 }
0x1634   : > { %9539 = vmatprep.subr.mxu0 %v7784_v61  ;;  %9583 = vmatprep.subr.mxu1 %v7816_v63  ;;  %v7407_v61 = vadd.f32 %v7406_v7, %v11743_v23  ;;  %v7496_v63 = vadd.f32 %v7495_v0, %v11750_v44  ;;  %v7532_v30 = vmax.f32 %v7399_v16, 0.0  ;;  %v7548_v49 = vmax.f32 %v7405_v2, 0.0 }
0x1635   : > { %9540 = vmatpush3.msra.mxu0 %v7768_v21  ;;  %9584 = vmatpush3.msra.mxu1 %v7800_v28  ;;  %v7412_v21 = vpop.f32.mrf.mxu0  ;;  %v7501_v28 = vpop.f32.mrf.mxu1 }
0x1636   : > { %9541 = vmatprep.subr.mxu0 %v7783_v27  ;;  %9585 = vmatprep.subr.mxu1 %v7815_v6  ;;  %v7534_v27 = vmax.f32 %v7488_v19, 0.0  ;;  %v7494_v6 = vadd.f32 %v11791_v39, %v11805_v34 }
0x1637   : > { %9542 = vmatpush3.msra.mxu0 %v7767_v62  ;;  %9586 = vmatpush3.msra.mxu1 %v7799_v3  ;;  %v7549_v62 = vmax.f32 %v7407_v61, 0.0  ;;  %v7551_v3 = vmax.f32 %v7496_v63, 0.0  ;;  %v9102_v63 = vld [vmem:[%s793_s22] ss:$0 sm:$0xff] }
0x1638   : > { %9543 = vmatprep.subr.mxu0 %v7782_v8  ;;  %9587 = vmatprep.subr.mxu1 %v7814_v10  ;;  %v7413_v8 = vadd.f32 %v7412_v21, %v11743_v23  ;;  %v7502_v10 = vadd.f32 %v7501_v28, %v11750_v44  ;;  %v7550_v51 = vmax.f32 %v7494_v6, 0.0 }
0x1639   : > { %9544 = vmatpush3.msra.mxu0 %v7766_v60  ;;  %9588 = vmatpush3.msra.mxu1 %v7798_v47  ;;  %v7411_v60 = vadd.f32 %v7410_v13, %v11800_v1  ;;  %v7500_v47 = vadd.f32 %v7499_v36, %v11805_v34 }
0x163a   : > { %9545 = vmatprep.subr.mxu0 %v7781_v4  ;;  %9589 = vmatprep.subr.mxu1 %v7813_v25  ;;  %v7565_v4 = vmax.f32 %v7413_v8, 0.0  ;;  %v7567_v25 = vmax.f32 %v7502_v10, 0.0 }
0x163b   : > { %9546 = vmatpush3.msra.mxu0 %v7765_v26  ;;  %9590 = vmatpush3.msra.mxu1 %v7797_v29  ;;  %v7564_v26 = vmax.f32 %v7411_v60, 0.0  ;;  %v7566_v23 = vmax.f32 %v7500_v47, 0.0 }
0x163c   : > { %9547 = vmatprep.subr.mxu0 %v7780_v9  ;;  %9591 = vmatprep.subr.mxu1 %v7812_v59 }
0x163d   : > { %9548 = vmatpush3.msra.mxu0 %v7764_v31  ;;  %9592 = vmatpush3.msra.mxu1 %v7796_v40 }
0x163e   : > { %9549 = vmatprep.subr.mxu0 %v7779_v35  ;;  %9593 = vmatprep.subr.mxu1 %v7811_v33 }
0x163f   : > { %9550 = vmatpush3.msra.mxu0 %v7763_v11  ;;  %9594 = vmatpush3.msra.mxu1 %v7795_v56 }
0x1640   : > { %9551 = vmatprep.subr.mxu0 %v7778_v14  ;;  %9595 = vmatprep.subr.mxu1 %v7810_v54 }
0x1641   : > { %9552 = vmatpush3.msra.mxu0 %v7762_v18  ;;  %9596 = vmatpush3.msra.mxu1 %v7794_v52 }
0x1642   : > { %9553 = vmatprep.subr.mxu0 %v7777_v53  ;;  %9597 = vmatprep.subr.mxu1 %v7809_v50 }
0x1643   : > { %9554 = vmatpush3.msra.mxu0 %v7761_v5  ;;  %9598 = vmatpush3.msra.mxu1 %v7793_v58 }
0x1644   : > { %9555 = vmatprep.subr.mxu0 %v7776_v15  ;;  %9599 = vmatprep.subr.mxu1 %v7808_v38 }
0x1645   : > { %9556 = vmatpush3.msra.mxu0 %v7760_v37  ;;  %9600 = vmatpush3.msra.mxu1 %v7792_v12 }
0x1646   : > { %8406 = vmatmul.mubr.f32.vlgmr.msra.gmra.mxu0 %v7516_v42  ;;  %8491 = vmatmul.mubr.f32.vlgmr.msra.gmra.mxu1 %v7518_v41 }
0x1647   : > { %8410 = vmatprep.mubr.f32.mxu0 %v7533_v24  ;;  %8495 = vmatprep.mubr.f32.mxu1 %v7535_v20 }
0x164a   : > { %8411 = vmatmul.mubr.f32.gmra.mxu0 %v7532_v30  ;;  %8496 = vmatmul.mubr.f32.gmra.mxu1 %v7534_v27 }
0x164b   : > { %8415 = vmatprep.mubr.f32.mxu0 %v7549_v62  ;;  %8500 = vmatprep.mubr.f32.mxu1 %v7551_v3 }
0x164e   : > { %8416 = vmatmul.mubr.f32.gmra.mxu0 %v7548_v49  ;;  %8501 = vmatmul.mubr.f32.gmra.mxu1 %v7550_v51 }
0x164f   : > { %8420 = vmatprep.mubr.f32.mxu0 %v7565_v4  ;;  %8505 = vmatprep.mubr.f32.mxu1 %v7567_v25 }
0x1652   : > { %8421 = vmatmul.mubr.f32.gmra.mxu0 %v7564_v26  ;;  %8506 = vmatmul.mubr.f32.gmra.mxu1 %v7566_v23 }
0x167c   : > { %v9293_v44 = vpop.f32.mrf.mxu0  ;;  %v9337_v29 = vpop.f32.mrf.mxu1 }
0x167e   : > { %v9294_v9 = vpop.f32.mrf.mxu0  ;;  %v9338_v59 = vpop.f32.mrf.mxu1 }
0x167f   : > { %v9295_v61 = vadd.f32 %v9294_v9, %v9293_v44  ;;  %v9339_v2 = vadd.f32 %v9338_v59, %v9337_v29 }
0x1680   : > { %v9296_v32 = vpop.f32.mrf.mxu0  ;;  %v9340_v39 = vpop.f32.mrf.mxu1 }
0x1681   : > { %v7898_v30 = vadd.f32 %v9295_v61, %v9102_v63 }
0x1682   : > { %v9297_v31 = vpop.f32.mrf.mxu0  ;;  %v9341_v40 = vpop.f32.mrf.mxu1 }
0x1683   : > { %v9298_v27 = vadd.f32 %v9297_v31, %v9296_v32  ;;  %v7983_v10 = vadd.f32 %v9339_v2, %v7898_v30  ;;  %v9342_v51 = vadd.f32 %v9341_v40, %v9340_v39 }
0x1685   : > { %v7903_v49 = vadd.f32 %v9298_v27, %v9102_v63 }
0x1687   : > { %v7988_v23 = vadd.f32 %v9342_v51, %v7903_v49 }
0x16af   : > { %v9299_v35 = vpop.f32.mrf.mxu0  ;;  %v9343_v33 = vpop.f32.mrf.mxu1 }
0x16b1   : > { %v9300_v1 = vpop.f32.mrf.mxu0  ;;  %v9344_v34 = vpop.f32.mrf.mxu1 }
0x16b2   : > { %v9301_v62 = vadd.f32 %v9300_v1, %v9299_v35  ;;  %v9345_v61 = vadd.f32 %v9344_v34, %v9343_v33 }
0x16b3   : > { %v9302_v11 = vpop.f32.mrf.mxu0  ;;  %v11841_v56 = vpop.f32.mrf.mxu1 }
0x16b4   : > { %v7908_v4 = vadd.f32 %v9301_v62, %v9102_v63 }
0x16b5   : > { %v9303_v14 = vpop.f32.mrf.mxu0  ;;  %v9347_v54 = vpop.f32.mrf.mxu1 }
0x16b6   : > { %v9304_v44 = vadd.f32 %v9303_v14, %v9302_v11  ;;  %v7993_v31 = vadd.f32 %v9345_v61, %v7908_v4  ;;  %v9348_v27 = vadd.f32 %v9347_v54, %v11841_v56 }
0x16b7   : > { %v9381_v7 = vpop.f32.mrf.mxu0  ;;  %v9425_v0 = vpop.f32.mrf.mxu1 }
0x16b9   : > { %v9382_v18 = vpop.f32.mrf.mxu0  ;;  %v9426_v52 = vpop.f32.mrf.mxu1 }
0x16ba   : > { %v9383_v6 = vadd.f32 %v9382_v18, %v9381_v7  ;;  %v9427_v9 = vadd.f32 %v9426_v52, %v9425_v0  ;;  %v7913_v7 = vadd.f32 %v9304_v44, %v9102_v63 }
0x16bc   : > { %v8068_v60 = vadd.f32 %v9383_v6, %v7983_v10 }
0x16bd   : > { %v9384_v53 = vpop.f32.mrf.mxu0  ;;  %v9428_v50 = vpop.f32.mrf.mxu1 }
0x16be   : > { %v8153_v29 = vadd.f32 %v9427_v9, %v8068_v60 }
0x16bf   : > { %v9385_v48 = vpop.f32.mrf.mxu0  ;;  %v9429_v46 = vpop.f32.mrf.mxu1 }
0x16c0   : > { %v9386_v47 = vadd.f32 %v9385_v48, %v9384_v53  ;;  %v9430_v18 = vadd.f32 %v9429_v46, %v9428_v50 }
0x16c2   : > { %v8073_v59 = vadd.f32 %v9386_v47, %v7988_v23 }
0x16c3   : > { %v9387_v5 = vpop.f32.mrf.mxu0  ;;  %v9431_v58 = vpop.f32.mrf.mxu1 }
0x16c4   : > { %v8158_v2 = vadd.f32 %v9430_v18, %v8073_v59 }
0x16c5   : > { %v9388_v57 = vpop.f32.mrf.mxu0  ;;  %v9432_v43 = vpop.f32.mrf.mxu1 }
0x16c6   : > { %v9389_v32 = vadd.f32 %v9388_v57, %v9387_v5  ;;  %v9433_v0 = vadd.f32 %v9432_v43, %v9431_v58  ;;  %v7998_v5 = vadd.f32 %v9348_v27, %v7913_v7 }
0x16c8   : > { %v8078_v53 = vadd.f32 %v9389_v32, %v7993_v31 }
0x16c9   : > { %v9390_v15 = vpop.f32.mrf.mxu0  ;;  %v11843_v38 = vpop.f32.mrf.mxu1 }
0x16ca   : > { %v8163_v63 = vadd.f32 %v9433_v0, %v8078_v53 }
0x16cb   : > { %v9391_v13 = vpop.f32.mrf.mxu0  ;;  %v11845_v36 = vpop.f32.mrf.mxu1 }
0x16cc   : > { %v9392_v11 = vadd.f32 %v9391_v13, %v9390_v15  ;;  %v9436_v56 = vadd.f32 %v11845_v36, %v11843_v38 }
0x16ce   : > { %v8083_v46 = vadd.f32 %v9392_v11, %v7998_v5 }
0x16d0   : > { %v8168_v10 = vadd.f32 %v9436_v56, %v8083_v46 }
0x16de   : > { %v9469_v37 = vpop.f32.mrf.mxu0  ;;  %v9513_v12 = vpop.f32.mrf.mxu1 }
0x16e0   : > { %v9470_v42 = vpop.f32.mrf.mxu0  ;;  %v9514_v41 = vpop.f32.mrf.mxu1 }
0x16e1   : > { %v9471_v22 = vadd.f32 %v9470_v42, %v9469_v37  ;;  %v9515_v14 = vadd.f32 %v9514_v41, %v9513_v12 }
0x16e3   : > { %v8238_v39 = vadd.f32 %v9471_v22, %v8153_v29 }
0x16e4   : > { %v9472_v16 = vpop.f32.mrf.mxu0  ;;  %v9516_v19 = vpop.f32.mrf.mxu1 }
0x16e5   : > { %v8323_v57 = vadd.f32 %v9515_v14, %v8238_v39 }
0x16e6   : > { %v9473_v24 = vpop.f32.mrf.mxu0  ;;  %v9517_v20 = vpop.f32.mrf.mxu1 }
0x16e7   : > { %v9474_v40 = vadd.f32 %v9473_v24, %v9472_v16  ;;  %v9518_v16 = vadd.f32 %v9517_v20, %v9516_v19 }
0x16e9   : > { %v8243_v37 = vadd.f32 %v9474_v40, %v8158_v2 }
0x16ea   : > { %v9475_v21 = vpop.f32.mrf.mxu0  ;;  %v9519_v28 = vpop.f32.mrf.mxu1 }
0x16eb   : > { %v8328_v43 = vadd.f32 %v9518_v16, %v8243_v37 }
0x16ec   : > { %v9476_v3 = vpop.f32.mrf.mxu0  ;;  %v9520_v8 = vpop.f32.mrf.mxu1 }
0x16ed   : > { %v9477_v33 = vadd.f32 %v9476_v3, %v9475_v21  ;;  %v9521_v21 = vadd.f32 %v9520_v8, %v9519_v28 }
0x16ef   : > { %v8248_v54 = vadd.f32 %v9477_v33, %v8163_v63 }
0x16f0   : > { %v9478_v25 = vpop.f32.mrf.mxu0  ;;  %v11852_v26 = vpop.f32.mrf.mxu1 }
0x16f1   : > { %v8333_v20 = vadd.f32 %v9521_v21, %v8248_v54 }
0x16f2   : > { %v9479_v35 = vpop.f32.mrf.mxu0  ;;  %v9523_v1 = vpop.f32.mrf.mxu1 }
0x16f3   : > { %v9480_v13 = vadd.f32 %v9479_v35, %v9478_v25  ;;  %v9524_v28 = vadd.f32 %v9523_v1, %v11852_v26  ;;  %v11969_v26 = vld [vmem:[#allocation7_spill] sm:$0xff] }
0x16f5   : > { %v8253_v4 = vadd.f32 %v9480_v13, %v8168_v10  ;;  %v9103_v10 = vld [vmem:[%s796_s2] ss:$0 sm:$0xff] }
0x1706   : > { %v9557_v48 = vpop.f32.mrf.mxu0  ;;  %v9601_v30 = vpop.f32.mrf.mxu1 }
0x1708   : > { %v9558_v34 = vpop.f32.mrf.mxu0  ;;  %v9602_v52 = vpop.f32.mrf.mxu1 }
0x1709   : > { %v9559_v42 = vadd.f32 %v9558_v34, %v9557_v48  ;;  %v9603_v6 = vadd.f32 %v9602_v52, %v9601_v30 }
0x170a   : > { %v9560_v50 = vpop.f32.mrf.mxu0  ;;  %v9604_v22 = vpop.f32.mrf.mxu1 }
0x170b   : > { %v8408_v24 = vadd.f32 %v9559_v42, %v8323_v57 }
0x170c   : > { %v9561_v15 = vpop.f32.mrf.mxu0  ;;  %v9605_v58 = vpop.f32.mrf.mxu1 }
0x170d   : > { %v8493_v12 = vadd.f32 %v9603_v6, %v8408_v24  ;;  %v9562_v41 = vadd.f32 %v9561_v15, %v9560_v50  ;;  %v9606_v51 = vadd.f32 %v9605_v58, %v9604_v22 }
0x170e   : > { %v9563_v62 = vpop.f32.mrf.mxu0  ;;  %v9607_v3 = vpop.f32.mrf.mxu1 }
0x170f   : > { %v8413_v49 = vadd.f32 %v9562_v41, %v8328_v43  ;;  %v8511_v19 = vadd.f32 %v8493_v12, %v11233_v45  ;;  %v8338_v45 = vadd.f32 %v9524_v28, %v8253_v4 }
0x1710   : > { %v9564_v60 = vpop.f32.mrf.mxu0  ;;  %v9608_v47 = vpop.f32.mrf.mxu1 }
0x1711   : > { %v8498_v38 = vadd.f32 %v9606_v51, %v8413_v49  ;;  %v9565_v36 = vadd.f32 %v9564_v60, %v9563_v62  ;;  %v8517_v23 = vsel %vm836_vm1, %v8511_v19, 0.0  ;;  %v9609_v9 = vadd.f32 %v9608_v47, %v9607_v3  ;;  %v9104_v51 = vld [vmem:[%s799_s26] ss:$0 sm:$0xff]  ;;  %s11970_s26 = sld [smem:[#allocation13_spill]] (!%p9105_p6) }
0x1712   : > { %v9566_v44 = vpop.f32.mrf.mxu0  ;;  %v9610_v25 = vpop.f32.mrf.mxu1  ;;  %8518 = vadd.xlane.f32.xlu1 %v8517_v23 }
0x1713   : > { %v8418_v8 = vadd.f32 %v9565_v36, %v8333_v20  ;;  %v8512_v61 = vadd.f32 %v8498_v38, %v11246_v55 }
0x1714   : > { %v9567_v32 = vpop.f32.mrf.mxu0  ;;  %v9611_v29 = vpop.f32.mrf.mxu1 }
0x1715   : > { %v8503_v59 = vadd.f32 %v9609_v9, %v8418_v8  ;;  %v9568_v31 = vadd.f32 %v9567_v32, %v9566_v44  ;;  %v8520_v35 = vsel %vm836_vm1, %v8512_v61, 0.0  ;;  %v9612_v18 = vadd.f32 %v9611_v29, %v9610_v25 }
0x1716   : > { %8521 = vadd.xlane.f32.xlu0 %v8520_v35 }
0x1717   : > { %v8423_v7 = vadd.f32 %v9568_v31, %v8338_v45  ;;  %v8513_v39 = vadd.f32 %v8503_v59, %v11268_v17 }
0x1719   : > { %v8508_v40 = vadd.f32 %v9612_v18, %v8423_v7  ;;  %v8523_v53 = vsel %vm836_vm1, %v8513_v39, 0.0 }
0x171a   : > { %8524 = vadd.xlane.f32.xlu1 %v8523_v53 }
0x171b   : > { %v8514_v1 = vadd.f32 %v8508_v40, %v11969_v26 }
0x171d   : > { %v8526_v55 = vsel %vm836_vm1, %v8514_v1, 0.0 }
0x171e   : > { %8527 = vadd.xlane.f32.xlu0 %v8526_v55 }
0x179b   : > { %v8519_v48 = vpop.xlane.xlu1 %8518 }
0x179c   : > { %v8529_v30 = vmul.f32 0.03125, %v8519_v48 }
0x179e   : > { %v8533_v27 = vsub.f32 %v8511_v19, %v8529_v30 }
0x179f   : > { %v8522_v2 = vpop.xlane.xlu0 %8521 }
0x17a0   : > { %v8530_v11 = vmul.f32 0.03125, %v8522_v2  ;;  %v8537_v14 = vmul.f32 %v8533_v27, %v8533_v27 }
0x17a2   : > { %v8534_v0 = vsub.f32 %v8512_v61, %v8530_v11  ;;  %v8541_v33 = vsel %vm836_vm1, %v8537_v14, 0.0 }
0x17a3   : > { %8542 = vadd.xlane.f32.xlu1 %v8541_v33  ;;  %v8525_v17 = vpop.xlane.xlu1 %8524 }
0x17a4   : > { %v8531_v34 = vmul.f32 0.03125, %v8525_v17  ;;  %v8538_v52 = vmul.f32 %v8534_v0, %v8534_v0 }
0x17a6   : > { %v8535_v5 = vsub.f32 %v8513_v39, %v8531_v34  ;;  %v8544_v57 = vsel %vm836_vm1, %v8538_v52, 0.0 }
0x17a7   : > { %8545 = vadd.xlane.f32.xlu0 %v8544_v57  ;;  %v8528_v37 = vpop.xlane.xlu0 %8527 }
0x17a8   : > { %v8532_v42 = vmul.f32 0.03125, %v8528_v37  ;;  %v8539_v63 = vmul.f32 %v8535_v5, %v8535_v5 }
0x17aa   : > { %v8536_v50 = vsub.f32 %v8514_v1, %v8532_v42  ;;  %v8547_v22 = vsel %vm836_vm1, %v8539_v63, 0.0 }
0x17ab   : > { %8548 = vadd.xlane.f32.xlu1 %v8547_v22 }
0x17ac   : > { %v8540_v46 = vmul.f32 %v8536_v50, %v8536_v50 }
0x17ae   : > { %v8550_v16 = vsel %vm836_vm1, %v8540_v46, 0.0 }
0x17af   : > { %8551 = vadd.xlane.f32.xlu0 %v8550_v16 }
0x182c   : > { %v8543_v24 = vpop.xlane.xlu1 %8542 }
0x182d   : > { %v8553_v6 = vmul.f32 0.03125, %v8543_v24 }
0x182f   : > { %v8557_v56 = vadd.f32 1e-05, %v8553_v6 }
0x1830   : > { %v8546_v54 = vpop.xlane.xlu0 %8545 }
0x1831   : > { %10172 = vrsqrt.f32 %v8557_v56  ;;  %v8554_v15 = vmul.f32 0.03125, %v8546_v54 }
0x1833   : > { %v8558_v58 = vadd.f32 1e-05, %v8554_v15 }
0x1834   : > { %v8549_v43 = vpop.xlane.xlu1 %8548 }
0x1835   : > { %10174 = vrsqrt.f32 %v8558_v58  ;;  %v8555_v13 = vmul.f32 0.03125, %v8549_v43 }
0x1837   : > { %v8559_v12 = vadd.f32 1e-05, %v8555_v13 }
0x1838   : > { %v8552_v41 = vpop.xlane.xlu0 %8551 }
0x1839   : > { %10176 = vrsqrt.f32 %v8559_v12  ;;  %v8556_v21 = vmul.f32 0.03125, %v8552_v41 }
0x183b   : > { %v8560_v62 = vadd.f32 1e-05, %v8556_v21 }
0x183d   : > { %10178 = vrsqrt.f32 %v8560_v62 }
0x183e   : > { %v10173_v3 = vpop.eup %10172 }
0x183f   : > { %v8565_v49 = vmul.f32 %v10173_v3, %v8533_v27 }
0x1841   : > { %v8575_v19 = vmul.f32 %v9103_v10, %v8565_v49 }
0x1842   : > { %v10175_v20 = vpop.eup %10174 }
0x1843   : > { %v8585_v60 = vadd.f32 %v9104_v51, %v8575_v19  ;;  %v8566_v47 = vmul.f32 %v10175_v20, %v8534_v0 }
0x1845   : > { %8589 = vst.msk [vmem:[#allocation2] sm:$0xff] %vm836_vm1, %v8585_v60  ;;  %v8576_v4 = vmul.f32 %v9103_v10, %v8566_v47 }
0x1846   : > { %v10177_v38 = vpop.eup %10176 }
0x1847   : > { %v8586_v36 = vadd.f32 %v9104_v51, %v8576_v4  ;;  %v8567_v23 = vmul.f32 %v10177_v38, %v8535_v5 }
0x1849   : > { %8590 = vst.msk [vmem:[#allocation2 + $0x8] sm:$0xff] %vm836_vm1, %v8586_v36  ;;  %v8577_v44 = vmul.f32 %v9103_v10, %v8567_v23 }
0x184a   : > { %v10179_v25 = vpop.eup %10178 }
0x184b   : > { %v8587_v28 = vadd.f32 %v9104_v51, %v8577_v44  ;;  %v8568_v8 = vmul.f32 %v10179_v25, %v8536_v50 }
0x184d   : > { %8591 = vst.msk [vmem:[#allocation2 + $0x10] sm:$0xff] %vm836_vm1, %v8587_v28  ;;  %v8578_v9 = vmul.f32 %v9103_v10, %v8568_v8  ;;  %8596 = sbr.rel (%p9105_p6) target bundleno = 6707 (0x1a33), region = 100 }
0x184f   : > { %v8588_v61 = vadd.f32 %v9104_v51, %v8578_v9 }
0x1851   : > { %8592 = vst.msk [vmem:[#allocation2 + $0x18] sm:$0xff] %vm836_vm1, %v8588_v61 }
0x1852   : > { %v8628_v32 = vld [vmem:[%s11970_s26 + $0x18] sm:$0xff]  ;;  %v8597_v29 = vsel %vm836_vm1, %v8585_v60, 0.0  ;;  %v10245_v45 = vmov 0.0   ;;  %v8627_v59 = vld [vmem:[%s11970_s26 + $0x10] sm:$0xff]  ;;  %vm10246_vm10 = vmmov 0   ;;  %v8604_v35 = vsel %vm836_vm1, %v8586_v36, 0.0 }
0x1853   : > { %9966 = vmatprep.subr.mxu0 %v10245_v45  ;;  %9974 = vmatprep.mubr.msk.f32.mxu0 %vm10246_vm10, %v10245_v45  ;;  %v8598_v31 = vrot.slane %v8597_v29, 4  ;;  %v8611_v7 = vsel %vm836_vm1, %v8587_v28, 0.0  ;;  %v8618_v18 = vsel %vm836_vm1, %v8588_v61, 0.0  ;;  %v8605_v39 = vrot.slane %v8604_v35, 4  ;;  %v8626_v26 = vld [vmem:[%s11970_s26 + $0x8] sm:$0xff]  ;;  %v8625_v27 = vld [vmem:[%s11970_s26] sm:$0xff] }
0x1854   : > { %9967 = vmatpush3.msra.mxu0 %v8628_v32  ;;  %v8612_v40 = vrot.slane %v8611_v7, 4  ;;  %v8619_v53 = vrot.slane %v8618_v18, 4  ;;  %vm8640_vm11 = vcmask 1041409   ;;  %vm8642_vm12 = vcmask 1042434   ;;  %v9106_v56 = vld [vmem:[%s11971_s8] ss:$0 sm:$0xff] }
0x1855   : > { %9968 = vmatprep.subr.mxu0 %v10245_v45  ;;  %v8599_v1 = vadd.f32 %v8598_v31, %v8597_v29  ;;  %v8606_v55 = vadd.f32 %v8605_v39, %v8604_v35  ;;  %vm8644_vm13 = vcmask 1043459   ;;  %v9108_v43 = vld [vmem:[%s11972_s14] ss:$0 sm:$0xff]  ;;  %vm8727_vm14 = vcmask 257024  }
0x1856   : > { %9969 = vmatpush3.msra.mxu0 %v8627_v59  ;;  %v8613_v48 = vadd.f32 %v8612_v40, %v8611_v7  ;;  %v8620_v30 = vadd.f32 %v8619_v53, %v8618_v18  ;;  %v10247_v21 = vmov 0   ;;  %v9109_v62 = vld [vmem:[#allocation3] ss:$0 sm:$0xff] }
0x1857   : > { %9970 = vmatprep.subr.mxu0 %v10245_v45  ;;  %v8600_v2 = vrot.slane %v8599_v1, 2  ;;  %v8607_v11 = vrot.slane %v8606_v55, 2  ;;  %10188 = vset.pattern.permute.xlu0 %v10247_v21 }
0x1858   : > { %9971 = vmatpush3.msra.mxu0 %v8626_v26  ;;  %v8614_v14 = vrot.slane %v8613_v48, 2  ;;  %v8621_v0 = vrot.slane %v8620_v30, 2 }
0x1859   : > { %9972 = vmatprep.subr.mxu0 %v10245_v45  ;;  %v8601_v33 = vadd.f32 %v8600_v2, %v8599_v1  ;;  %v8608_v17 = vadd.f32 %v8607_v11, %v8606_v55 }
0x185a   : > { %9973 = vmatpush3.msra.mxu0 %v8625_v27  ;;  %v8615_v34 = vadd.f32 %v8614_v14, %v8613_v48  ;;  %v8622_v52 = vadd.f32 %v8621_v0, %v8620_v30 }
0x185b   : > { %v8602_v5 = vrot.slane %v8601_v33, 1  ;;  %v8609_v57 = vrot.slane %v8608_v17, 1 }
0x185c   : > { %v8616_v37 = vrot.slane %v8615_v34, 1  ;;  %v8623_v42 = vrot.slane %v8622_v52, 1 }
0x185d   : > { %v8603_v63 = vadd.f32 %v8602_v5, %v8601_v33  ;;  %v8610_v50 = vadd.f32 %v8609_v57, %v8608_v17 }
0x185e   : > { %v8617_v22 = vadd.f32 %v8616_v37, %v8615_v34  ;;  %v8624_v46 = vadd.f32 %v8623_v42, %v8622_v52 }
0x185f   : > { %v8641_v16 = vsel %vm8640_vm11, %v8610_v50, %v8603_v63 }
0x1860   : > { %v8643_v24 = vsel %vm8642_vm12, %v8617_v22, %v8641_v16 }
0x1861   : > { %v8645_v6 = vsel %vm8644_vm13, %v8624_v46, %v8643_v24 }
0x1862   : > { %9975 = vmatmul.mubr.msk.f32.vlgmr.msra.gmra.mxu0 %vm836_vm1, %v8645_v6 }
0x1922   : > { %v8714_v54 = vpop.f32.mrf.mxu0 }
0x1923   : > { %v8715_v15 = vadd.f32 %v9106_v56, %v8714_v54 }
0x1924   : > { %v9976_v58 = vpop.f32.mrf.mxu0 }
0x1925   : > { %v8718_v13 = vmax.f32 %v8715_v15, 0.0 }
0x1927   : > { %v8726_v12 = vmul.f32 %v9108_v43, %v8718_v13 }
0x1929   : > { %v8728_v41 = vsel %vm8727_vm14, %v8726_v12, 0.0 }
0x192a   : > { %8729 = vadd.xlane.f32.xlu0 %v8728_v41 }
0x19b3   : > { %v8730_v3 = vpop.xlane.xlu0 %8729 }
0x19b4   : > { %v8738_v10 = vadd.f32 %v9109_v62, %v8730_v3 }
0x19b6   : > { %8741 = vperm.xlu0 %10188, %v8738_v10  }
0x1a31   : > { %v8742_v49 = vpop.permute.xlu0 %8741 }
0x1a32   : > { %8744 = vst [vmem:[%s11973_s18] sm:$0xf] %v8742_v49 }
0x1a33 PF: > { %s11974_s24 = sld [smem:[#allocation5_spill]] }
0x1a34   : > { %s11975_s29 = sld [smem:[#allocation4_spill]] }
0x1a35   : > { %s11976_s30 = sld [smem:[#allocation6_spill]] }
0x1a39   : > { %s30_s0 = sadd.s32 1, %s11974_s24  }
0x1a3a   : > { %p27_p7 = scmp.ge.s32.totalorder %s30_s0, 4  }
0x1a3c   :  { %29 = sbr.rel (!%p27_p7) target bundleno = 10 (0xa), region = 169 }

</bundles_post_ra>
